<compile_context>
chip_gen: v7x
topology: tpu7x:2x2x1
jax: 0.10.0
libtpu: 0.0.40
codegen_flags: <defaults>
</compile_context>

<pallas_src>
import functools

import jax
import jax.numpy as jnp
from jax.experimental import pallas as pl
from jax.experimental.pallas import tpu as pltpu


_CH = [3, 3 * 8, 3 * 4, 3 * 2, 3, 3]             # 3 -> 24 -> 12 -> 6 -> 3 -> 3
_CFG = [(1, 0), (2, 1), (2, 1), (2, 1), (2, 1)]  # (stride, padding), K=4
_EPS = 1e-5

# (output parity, 3x3 tap index) -> 4x4 kernel tap (None = never hits a real
# input pixel for that parity).  Derived from oh = 2*ih - 1 + kh with
# oh = 2*a + pe and padded-input row index a + r  (r in {0,1,2}).
_KTAP = {(0, 0): 3, (0, 1): 1, (0, 2): None,
         (1, 0): None, (1, 1): 2, (1, 2): 0}


# ---------------------------------------------------------------------------
# Pallas kernels
# ---------------------------------------------------------------------------
def _gemm_bn_relu_kernel(w_ref, p_ref, g_ref, b_ref, o_ref, *, n_rep, cout, eps):
    """O = W @ P (bf16 in, f32 acc) + fused training-mode BatchNorm + ReLU.

    Rows of O are ordered (rep, channel) where rep = output parity (stride-2
    layers) or kernel tap (layer 1).  Per-channel batch stats therefore fold
    the n_rep row blocks and reduce along the lane (N*H*W) axis.  The output
    ref doubles as staging for the raw GEMM result (everything is VMEM).
    """
    o_ref[...] = jnp.dot(w_ref[...], p_ref[...],
                         preferred_element_type=jnp.float32)
    m = o_ref.shape[1]
    count = float(n_rep * m)

    # per-channel mean (count = N * H_out * W_out, matching PyTorch BN)
    ch_sum = jnp.zeros((cout, 1), jnp.float32)
    for t in range(n_rep):
        ch_sum = ch_sum + jnp.sum(o_ref[t * cout:(t + 1) * cout, :],
                                  axis=1, keepdims=True)
    mean = ch_sum / count

    # per-channel biased variance (two-pass for accuracy)
    ch_sq = jnp.zeros((cout, 1), jnp.float32)
    for t in range(n_rep):
        xc = o_ref[t * cout:(t + 1) * cout, :] - mean
        ch_sq = ch_sq + jnp.sum(xc * xc, axis=1, keepdims=True)
    inv = jax.lax.rsqrt(ch_sq / count + eps)

    scale = inv * g_ref[...]              # (cout, 1)
    shift = b_ref[...] - mean * scale     # (cout, 1)
    for t in range(n_rep):
        blk = o_ref[t * cout:(t + 1) * cout, :]
        o_ref[t * cout:(t + 1) * cout, :] = jnp.maximum(blk * scale + shift, 0.0)


def _gemm_tanh_kernel(w_ref, p_ref, o_ref):
    o = jnp.dot(w_ref[...], p_ref[...], preferred_element_type=jnp.float32)
    o_ref[...] = jnp.tanh(o).astype(o_ref.dtype)


# ---------------------------------------------------------------------------
# pallas_call wrappers
# ---------------------------------------------------------------------------
def gemm_bn_relu(w, p, gamma, beta, *, n_rep, cout, eps=_EPS):
    """Fused (R,K)@(K,M) + BatchNorm + ReLU; single VMEM-resident block."""
    r, _ = w.shape
    _, m = p.shape
    return pl.pallas_call(
        functools.partial(_gemm_bn_relu_kernel,
                          n_rep=n_rep, cout=cout, eps=eps),
        out_shape=jax.ShapeDtypeStruct((r, m), jnp.float32),
    )(w, p, gamma, beta)


def gemm_tanh(w, p, *, lane_tile=512):
    """Fused (R,K)@(K,M) + tanh, tiled over lanes ('parallel' for megacore)."""
    r, k = w.shape
    _, m = p.shape
    tm = lane_tile if (m % lane_tile == 0 and m >= 2 * lane_tile) else m
    return pl.pallas_call(
        _gemm_tanh_kernel,
        out_shape=jax.ShapeDtypeStruct((r, m), jnp.float32),
        grid_spec=pltpu.PrefetchScalarGridSpec(
            num_scalar_prefetch=0,
            grid=(m // tm,),
            in_specs=[pl.BlockSpec((r, k), lambda i: (0, 0)),
                      pl.BlockSpec((k, tm), lambda i: (0, i))],
            out_specs=pl.BlockSpec((r, tm), lambda i: (0, i)),
        ),
        compiler_params=pltpu.CompilerParams(
            dimension_semantics=("parallel",)),
    )(w, p)


# ---------------------------------------------------------------------------
# One-time weight packing (PyTorch ConvTranspose2d layout (Cin, Cout, K, K))
# ---------------------------------------------------------------------------
def _pack_w_layer1(w):
    # -> (16*Cout, Cin), rows ordered (kh, kw, co); bf16.
    cin, cout = w.shape[0], w.shape[1]
    return jnp.transpose(w, (2, 3, 1, 0)).reshape(16 * cout, cin).astype(
        jnp.bfloat16)


def _pack_w_stride2(w):
    # -> (4*Cout, 9*Cin) parity-decomposed GEMM weight; bf16.
    # Rows ordered (parity = pe*2+pw, co); cols ordered (3x3 tap = r*3+c, ci).
    cin, cout = w.shape[0], w.shape[1]
    wm = jnp.zeros((4 * cout, 9 * cin), jnp.float32)
    for pe in range(2):
        for pw in range(2):
            par = pe * 2 + pw
            for r in range(3):
                kh = _KTAP[(pe, r)]
                if kh is None:
                    continue
                for c in range(3):
                    kw = _KTAP[(pw, c)]
                    if kw is None:
                        continue
                    tap = r * 3 + c
                    wm = wm.at[par * cout:(par + 1) * cout,
                               tap * cin:(tap + 1) * cin].set(w[:, :, kh, kw].T)
    return wm.astype(jnp.bfloat16)


def init_raw_weights(key):
    keys = jax.random.split(key, len(_CFG))
    return [0.02 * jax.random.normal(keys[i], (_CH[i], _CH[i + 1], 4, 4),
                                     jnp.float32)
            for i in range(len(_CFG))]


def pack_params(raw_w):
    params = {"w": [_pack_w_layer1(raw_w[0])]
                   + [_pack_w_stride2(w) for w in raw_w[1:]],
              "bn": []}
    for i in range(4):  # fresh nn.BatchNorm2d affine: gamma=1, beta=0
        cout = _CH[i + 1]
        params["bn"].append((jnp.ones((cout, 1), jnp.float32),
                             jnp.zeros((cout, 1), jnp.float32)))
    return params


# ---------------------------------------------------------------------------
# Tiny XLA glue between layers (channel-major activations (C, N, H, W))
# ---------------------------------------------------------------------------
def _patches_3x3(a):
    """(C, N, H, W) -> bf16 (9*C, N*H*W) patch matrix, rows = (tap, ci)."""
    c, n, h, w = a.shape
    ap = jnp.pad(a, ((0, 0), (0, 0), (1, 1), (1, 1)))
    taps = [ap[:, :, r:r + h, cc:cc + w] for r in range(3) for cc in range(3)]
    return jnp.stack(taps, axis=0).reshape(9 * c, n * h * w).astype(jnp.bfloat16)


def _pixel_shuffle(o, cout, n, h, w):
    """(4*cout, n*h*w) parity-major rows -> (cout, n, 2h, 2w)."""
    y = o.reshape(2, 2, cout, n, h, w)          # (pe, pw, co, n, a, b)
    y = jnp.transpose(y, (2, 3, 4, 0, 5, 1))    # (co, n, a, pe, b, pw)
    return y.reshape(cout, n, 2 * h, 2 * w)


# ---------------------------------------------------------------------------
# Generator forward
# ---------------------------------------------------------------------------
def generator_forward(x_nchw, params):
    n = x_nchw.shape[0]

    # Layer 1: ConvT(3,24,4,1,0) on a 1x1 input == outer product GEMM.
    x0 = x_nchw.reshape(n, _CH[0]).T.astype(jnp.bfloat16)           # (Cin, N)
    gamma, beta = params["bn"][0]
    o = gemm_bn_relu(params["w"][0], x0, gamma, beta, n_rep=16, cout=_CH[1])
    a = o.reshape(4, 4, _CH[1], n).transpose(2, 3, 0, 1)            # (24,N,4,4)

    # Layers 2-4: parity-decomposed stride-2 ConvT + fused BN + ReLU.
    for i in range(1, 4):
        cout = _CH[i + 1]
        _, _, h, w = a.shape
        gamma, beta = params["bn"][i]
        o = gemm_bn_relu(params["w"][i], _patches_3x3(a), gamma, beta,
                         n_rep=4, cout=cout)
        a = _pixel_shuffle(o, cout, n, h, w)

    # Layer 5: parity-decomposed stride-2 ConvT + fused tanh.
    _, _, h, w = a.shape
    o = gemm_tanh(params["w"][4], _patches_3x3(a))
    a = _pixel_shuffle(o, _CH[5], n, h, w)                          # (3,N,64,64)
    return jnp.transpose(a, (1, 0, 2, 3))                           # -> NCHW


# ---------------------------------------------------------------------------
# Pure-JAX f32 reference (standard dilated-conv form of ConvTranspose2d)
# ---------------------------------------------------------------------------
def _ref_conv_transpose(x, w, stride, padding):
    k = w.shape[2]
    rhs = jnp.transpose(jnp.flip(w, (2, 3)), (1, 0, 2, 3))          # OIHW
    pad = k - 1 - padding
    return jax.lax.conv_general_dilated(
        x, rhs, window_strides=(1, 1), padding=[(pad, pad), (pad, pad)],
        lhs_dilation=(stride, stride),
        dimension_numbers=("NCHW", "OIHW", "NCHW"))


def reference_forward(x, raw_w):
    h = x
    for i, (s, p) in enumerate(_CFG):
        h = _ref_conv_transpose(h, raw_w[i], s, p)
        if i < len(_CFG) - 1:
            mu = jnp.mean(h, axis=(0, 2, 3), keepdims=True)
            var = jnp.mean((h - mu) ** 2, axis=(0, 2, 3), keepdims=True)
            h = jnp.maximum((h - mu) * jax.lax.rsqrt(var + _EPS), 0.0)
        else:
            h = jnp.tanh(h)
    return h


if __name__ == "__main__":
    key = jax.random.PRNGKey(0)
    kx, kw = jax.random.split(key)
    # DCGAN-style latent: (N, 3, 1, 1) -> output (N, 3, 64, 64)
    x = jax.random.normal(kx, (2, 3, 1, 1), jnp.float32)
    raw_w = init_raw_weights(kw)
    params = pack_params(raw_w)

    out = jax.block_until_ready(jax.jit(generator_forward)(x, params))
    assert out.shape == (2, 3, 64, 64), out.shape
    assert bool(jnp.all(jnp.isfinite(out)))

    # Correctness check against a pure-JAX f32 reference (bf16 GEMM operands
    # in the Pallas path => loose-ish tolerance; structural bugs would be >3x).
    ref = jax.block_until_ready(jax.jit(reference_forward)(x, raw_w))
    err = float(jnp.max(jnp.abs(out - ref)))
    assert err < 1e-1, f"max abs err vs reference: {err}"

    print("KERNEL_OK")
</pallas_src>

<mosaic_0001>
module attributes {stable_mosaic.version = 11 : i64} {
  func.func @_gemm_bn_relu_kernel(%arg0: memref<384x3xbf16, #tpu.memory_space<vmem>>, %arg1: memref<3x2xbf16, #tpu.memory_space<vmem>>, %arg2: memref<24x1xf32, #tpu.memory_space<vmem>>, %arg3: memref<24x1xf32, #tpu.memory_space<vmem>>, %arg4: memref<384x2xf32, #tpu.memory_space<vmem>>) attributes {dimension_semantics = [], scalar_prefetch = 0 : i64, scratch_operands = 0 : i64, tpu.core_type = #tpu.core_type<tc>} {
    %c0 = arith.constant 0 : index
    %c0_0 = arith.constant 0 : index
    %0 = vector.load %arg0[%c0, %c0_0] : memref<384x3xbf16, #tpu.memory_space<vmem>>, vector<384x3xbf16>
    %c0_1 = arith.constant 0 : index
    %c0_2 = arith.constant 0 : index
    %1 = vector.load %arg1[%c0_1, %c0_2] : memref<3x2xbf16, #tpu.memory_space<vmem>>, vector<3x2xbf16>
    %cst = arith.constant dense<0.000000e+00> : vector<384x2xf32>
    %2 = tpu.matmul %0, %1, %cst {dimension_numbers = #tpu.dot_dimension_numbers<[1], [0], [0], [1], [0, 0, 1, 1], [], []>} : vector<384x3xbf16>, vector<3x2xbf16>, vector<384x2xf32> -> vector<384x2xf32>
    %c0_3 = arith.constant 0 : index
    %c0_4 = arith.constant 0 : index
    %3 = vector.load %arg4[%c0_3, %c0_4] : memref<384x2xf32, #tpu.memory_space<vmem>>, vector<384x2xf32>
    tpu.vector_store %arg4[%c0_3, %c0_4], %2 {strides = array<i32>} : memref<384x2xf32, #tpu.memory_space<vmem>>, vector<384x2xf32>,
    %cst_5 = arith.constant 0.000000e+00 : f32
    %4 = vector.broadcast %cst_5 : f32 to vector<24x1xf32>
    %c0_6 = arith.constant 0 : index
    %c0_7 = arith.constant 0 : index
    %5 = vector.load %arg4[%c0_6, %c0_7] : memref<384x2xf32, #tpu.memory_space<vmem>>, vector<24x2xf32>
    %cst_8 = arith.constant dense<0.000000e+00> : vector<24xf32>
    %6 = vector.multi_reduction <add>, %5, %cst_8 [1] : vector<24x2xf32> to vector<24xf32>
    %7 = vector.shape_cast %6 : vector<24xf32> to vector<24x1xf32>
    %8 = arith.addf %4, %7 : vector<24x1xf32>
    %c24 = arith.constant 24 : index
    %c0_9 = arith.constant 0 : index
    %9 = vector.load %arg4[%c24, %c0_9] : memref<384x2xf32, #tpu.memory_space<vmem>>, vector<24x2xf32>
    %cst_10 = arith.constant dense<0.000000e+00> : vector<24xf32>
    %10 = vector.multi_reduction <add>, %9, %cst_10 [1] : vector<24x2xf32> to vector<24xf32>
    %11 = vector.shape_cast %10 : vector<24xf32> to vector<24x1xf32>
    %12 = arith.addf %8, %11 : vector<24x1xf32>
    %c48 = arith.constant 48 : index
    %c0_11 = arith.constant 0 : index
    %13 = vector.load %arg4[%c48, %c0_11] : memref<384x2xf32, #tpu.memory_space<vmem>>, vector<24x2xf32>
    %cst_12 = arith.constant dense<0.000000e+00> : vector<24xf32>
    %14 = vector.multi_reduction <add>, %13, %cst_12 [1] : vector<24x2xf32> to vector<24xf32>
    %15 = vector.shape_cast %14 : vector<24xf32> to vector<24x1xf32>
    %16 = arith.addf %12, %15 : vector<24x1xf32>
    %c72 = arith.constant 72 : index
    %c0_13 = arith.constant 0 : index
    %17 = vector.load %arg4[%c72, %c0_13] : memref<384x2xf32, #tpu.memory_space<vmem>>, vector<24x2xf32>
    %cst_14 = arith.constant dense<0.000000e+00> : vector<24xf32>
    %18 = vector.multi_reduction <add>, %17, %cst_14 [1] : vector<24x2xf32> to vector<24xf32>
    %19 = vector.shape_cast %18 : vector<24xf32> to vector<24x1xf32>
    %20 = arith.addf %16, %19 : vector<24x1xf32>
    %c96 = arith.constant 96 : index
    %c0_15 = arith.constant 0 : index
    %21 = vector.load %arg4[%c96, %c0_15] : memref<384x2xf32, #tpu.memory_space<vmem>>, vector<24x2xf32>
    %cst_16 = arith.constant dense<0.000000e+00> : vector<24xf32>
    %22 = vector.multi_reduction <add>, %21, %cst_16 [1] : vector<24x2xf32> to vector<24xf32>
    %23 = vector.shape_cast %22 : vector<24xf32> to vector<24x1xf32>
    %24 = arith.addf %20, %23 : vector<24x1xf32>
    %c120 = arith.constant 120 : index
    %c0_17 = arith.constant 0 : index
    %25 = vector.load %arg4[%c120, %c0_17] : memref<384x2xf32, #tpu.memory_space<vmem>>, vector<24x2xf32>
    %cst_18 = arith.constant dense<0.000000e+00> : vector<24xf32>
    %26 = vector.multi_reduction <add>, %25, %cst_18 [1] : vector<24x2xf32> to vector<24xf32>
    %27 = vector.shape_cast %26 : vector<24xf32> to vector<24x1xf32>
    %28 = arith.addf %24, %27 : vector<24x1xf32>
    %c144 = arith.constant 144 : index
    %c0_19 = arith.constant 0 : index
    %29 = vector.load %arg4[%c144, %c0_19] : memref<384x2xf32, #tpu.memory_space<vmem>>, vector<24x2xf32>
    %cst_20 = arith.constant dense<0.000000e+00> : vector<24xf32>
    %30 = vector.multi_reduction <add>, %29, %cst_20 [1] : vector<24x2xf32> to vector<24xf32>
    %31 = vector.shape_cast %30 : vector<24xf32> to vector<24x1xf32>
    %32 = arith.addf %28, %31 : vector<24x1xf32>
    %c168 = arith.constant 168 : index
    %c0_21 = arith.constant 0 : index
    %33 = vector.load %arg4[%c168, %c0_21] : memref<384x2xf32, #tpu.memory_space<vmem>>, vector<24x2xf32>
    %cst_22 = arith.constant dense<0.000000e+00> : vector<24xf32>
    %34 = vector.multi_reduction <add>, %33, %cst_22 [1] : vector<24x2xf32> to vector<24xf32>
    %35 = vector.shape_cast %34 : vector<24xf32> to vector<24x1xf32>
    %36 = arith.addf %32, %35 : vector<24x1xf32>
    %c192 = arith.constant 192 : index
    %c0_23 = arith.constant 0 : index
    %37 = vector.load %arg4[%c192, %c0_23] : memref<384x2xf32, #tpu.memory_space<vmem>>, vector<24x2xf32>
    %cst_24 = arith.constant dense<0.000000e+00> : vector<24xf32>
    %38 = vector.multi_reduction <add>, %37, %cst_24 [1] : vector<24x2xf32> to vector<24xf32>
    %39 = vector.shape_cast %38 : vector<24xf32> to vector<24x1xf32>
    %40 = arith.addf %36, %39 : vector<24x1xf32>
    %c216 = arith.constant 216 : index
    %c0_25 = arith.constant 0 : index
    %41 = vector.load %arg4[%c216, %c0_25] : memref<384x2xf32, #tpu.memory_space<vmem>>, vector<24x2xf32>
    %cst_26 = arith.constant dense<0.000000e+00> : vector<24xf32>
    %42 = vector.multi_reduction <add>, %41, %cst_26 [1] : vector<24x2xf32> to vector<24xf32>
    %43 = vector.shape_cast %42 : vector<24xf32> to vector<24x1xf32>
    %44 = arith.addf %40, %43 : vector<24x1xf32>
    %c240 = arith.constant 240 : index
    %c0_27 = arith.constant 0 : index
    %45 = vector.load %arg4[%c240, %c0_27] : memref<384x2xf32, #tpu.memory_space<vmem>>, vector<24x2xf32>
    %cst_28 = arith.constant dense<0.000000e+00> : vector<24xf32>
    %46 = vector.multi_reduction <add>, %45, %cst_28 [1] : vector<24x2xf32> to vector<24xf32>
    %47 = vector.shape_cast %46 : vector<24xf32> to vector<24x1xf32>
    %48 = arith.addf %44, %47 : vector<24x1xf32>
    %c264 = arith.constant 264 : index
    %c0_29 = arith.constant 0 : index
    %49 = vector.load %arg4[%c264, %c0_29] : memref<384x2xf32, #tpu.memory_space<vmem>>, vector<24x2xf32>
    %cst_30 = arith.constant dense<0.000000e+00> : vector<24xf32>
    %50 = vector.multi_reduction <add>, %49, %cst_30 [1] : vector<24x2xf32> to vector<24xf32>
    %51 = vector.shape_cast %50 : vector<24xf32> to vector<24x1xf32>
    %52 = arith.addf %48, %51 : vector<24x1xf32>
    %c288 = arith.constant 288 : index
    %c0_31 = arith.constant 0 : index
    %53 = vector.load %arg4[%c288, %c0_31] : memref<384x2xf32, #tpu.memory_space<vmem>>, vector<24x2xf32>
    %cst_32 = arith.constant dense<0.000000e+00> : vector<24xf32>
    %54 = vector.multi_reduction <add>, %53, %cst_32 [1] : vector<24x2xf32> to vector<24xf32>
    %55 = vector.shape_cast %54 : vector<24xf32> to vector<24x1xf32>
    %56 = arith.addf %52, %55 : vector<24x1xf32>
    %c312 = arith.constant 312 : index
    %c0_33 = arith.constant 0 : index
    %57 = vector.load %arg4[%c312, %c0_33] : memref<384x2xf32, #tpu.memory_space<vmem>>, vector<24x2xf32>
    %cst_34 = arith.constant dense<0.000000e+00> : vector<24xf32>
    %58 = vector.multi_reduction <add>, %57, %cst_34 [1] : vector<24x2xf32> to vector<24xf32>
    %59 = vector.shape_cast %58 : vector<24xf32> to vector<24x1xf32>
    %60 = arith.addf %56, %59 : vector<24x1xf32>
    %c336 = arith.constant 336 : index
    %c0_35 = arith.constant 0 : index
    %61 = vector.load %arg4[%c336, %c0_35] : memref<384x2xf32, #tpu.memory_space<vmem>>, vector<24x2xf32>
    %cst_36 = arith.constant dense<0.000000e+00> : vector<24xf32>
    %62 = vector.multi_reduction <add>, %61, %cst_36 [1] : vector<24x2xf32> to vector<24xf32>
    %63 = vector.shape_cast %62 : vector<24xf32> to vector<24x1xf32>
    %64 = arith.addf %60, %63 : vector<24x1xf32>
    %c360 = arith.constant 360 : index
    %c0_37 = arith.constant 0 : index
    %65 = vector.load %arg4[%c360, %c0_37] : memref<384x2xf32, #tpu.memory_space<vmem>>, vector<24x2xf32>
    %cst_38 = arith.constant dense<0.000000e+00> : vector<24xf32>
    %66 = vector.multi_reduction <add>, %65, %cst_38 [1] : vector<24x2xf32> to vector<24xf32>
    %67 = vector.shape_cast %66 : vector<24xf32> to vector<24x1xf32>
    %68 = arith.addf %64, %67 : vector<24x1xf32>
    %cst_39 = arith.constant 3.200000e+01 : f32
    %69 = vector.broadcast %cst_39 : f32 to vector<24x1xf32>
    %70 = arith.divf %68, %69 : vector<24x1xf32>
    %cst_40 = arith.constant 0.000000e+00 : f32
    %71 = vector.broadcast %cst_40 : f32 to vector<24x1xf32>
    %c0_41 = arith.constant 0 : index
    %c0_42 = arith.constant 0 : index
    %72 = vector.load %arg4[%c0_41, %c0_42] : memref<384x2xf32, #tpu.memory_space<vmem>>, vector<24x2xf32>
    %73 = vector.broadcast %70 : vector<24x1xf32> to vector<24x2xf32>
    %74 = arith.subf %72, %73 : vector<24x2xf32>
    %75 = arith.mulf %74, %74 : vector<24x2xf32>
    %cst_43 = arith.constant dense<0.000000e+00> : vector<24xf32>
    %76 = vector.multi_reduction <add>, %75, %cst_43 [1] : vector<24x2xf32> to vector<24xf32>
    %77 = vector.shape_cast %76 : vector<24xf32> to vector<24x1xf32>
    %78 = arith.addf %71, %77 : vector<24x1xf32>
    %c24_44 = arith.constant 24 : index
    %c0_45 = arith.constant 0 : index
    %79 = vector.load %arg4[%c24_44, %c0_45] : memref<384x2xf32, #tpu.memory_space<vmem>>, vector<24x2xf32>
    %80 = vector.broadcast %70 : vector<24x1xf32> to vector<24x2xf32>
    %81 = arith.subf %79, %80 : vector<24x2xf32>
    %82 = arith.mulf %81, %81 : vector<24x2xf32>
    %cst_46 = arith.constant dense<0.000000e+00> : vector<24xf32>
    %83 = vector.multi_reduction <add>, %82, %cst_46 [1] : vector<24x2xf32> to vector<24xf32>
    %84 = vector.shape_cast %83 : vector<24xf32> to vector<24x1xf32>
    %85 = arith.addf %78, %84 : vector<24x1xf32>
    %c48_47 = arith.constant 48 : index
    %c0_48 = arith.constant 0 : index
    %86 = vector.load %arg4[%c48_47, %c0_48] : memref<384x2xf32, #tpu.memory_space<vmem>>, vector<24x2xf32>
    %87 = vector.broadcast %70 : vector<24x1xf32> to vector<24x2xf32>
    %88 = arith.subf %86, %87 : vector<24x2xf32>
    %89 = arith.mulf %88, %88 : vector<24x2xf32>
    %cst_49 = arith.constant dense<0.000000e+00> : vector<24xf32>
    %90 = vector.multi_reduction <add>, %89, %cst_49 [1] : vector<24x2xf32> to vector<24xf32>
    %91 = vector.shape_cast %90 : vector<24xf32> to vector<24x1xf32>
    %92 = arith.addf %85, %91 : vector<24x1xf32>
    %c72_50 = arith.constant 72 : index
    %c0_51 = arith.constant 0 : index
    %93 = vector.load %arg4[%c72_50, %c0_51] : memref<384x2xf32, #tpu.memory_space<vmem>>, vector<24x2xf32>
    %94 = vector.broadcast %70 : vector<24x1xf32> to vector<24x2xf32>
    %95 = arith.subf %93, %94 : vector<24x2xf32>
    %96 = arith.mulf %95, %95 : vector<24x2xf32>
    %cst_52 = arith.constant dense<0.000000e+00> : vector<24xf32>
    %97 = vector.multi_reduction <add>, %96, %cst_52 [1] : vector<24x2xf32> to vector<24xf32>
    %98 = vector.shape_cast %97 : vector<24xf32> to vector<24x1xf32>
    %99 = arith.addf %92, %98 : vector<24x1xf32>
    %c96_53 = arith.constant 96 : index
    %c0_54 = arith.constant 0 : index
    %100 = vector.load %arg4[%c96_53, %c0_54] : memref<384x2xf32, #tpu.memory_space<vmem>>, vector<24x2xf32>
    %101 = vector.broadcast %70 : vector<24x1xf32> to vector<24x2xf32>
    %102 = arith.subf %100, %101 : vector<24x2xf32>
    %103 = arith.mulf %102, %102 : vector<24x2xf32>
    %cst_55 = arith.constant dense<0.000000e+00> : vector<24xf32>
    %104 = vector.multi_reduction <add>, %103, %cst_55 [1] : vector<24x2xf32> to vector<24xf32>
    %105 = vector.shape_cast %104 : vector<24xf32> to vector<24x1xf32>
    %106 = arith.addf %99, %105 : vector<24x1xf32>
    %c120_56 = arith.constant 120 : index
    %c0_57 = arith.constant 0 : index
    %107 = vector.load %arg4[%c120_56, %c0_57] : memref<384x2xf32, #tpu.memory_space<vmem>>, vector<24x2xf32>
    %108 = vector.broadcast %70 : vector<24x1xf32> to vector<24x2xf32>
    %109 = arith.subf %107, %108 : vector<24x2xf32>
    %110 = arith.mulf %109, %109 : vector<24x2xf32>
    %cst_58 = arith.constant dense<0.000000e+00> : vector<24xf32>
    %111 = vector.multi_reduction <add>, %110, %cst_58 [1] : vector<24x2xf32> to vector<24xf32>
    %112 = vector.shape_cast %111 : vector<24xf32> to vector<24x1xf32>
    %113 = arith.addf %106, %112 : vector<24x1xf32>
    %c144_59 = arith.constant 144 : index
    %c0_60 = arith.constant 0 : index
    %114 = vector.load %arg4[%c144_59, %c0_60] : memref<384x2xf32, #tpu.memory_space<vmem>>, vector<24x2xf32>
    %115 = vector.broadcast %70 : vector<24x1xf32> to vector<24x2xf32>
    %116 = arith.subf %114, %115 : vector<24x2xf32>
    %117 = arith.mulf %116, %116 : vector<24x2xf32>
    %cst_61 = arith.constant dense<0.000000e+00> : vector<24xf32>
    %118 = vector.multi_reduction <add>, %117, %cst_61 [1] : vector<24x2xf32> to vector<24xf32>
    %119 = vector.shape_cast %118 : vector<24xf32> to vector<24x1xf32>
    %120 = arith.addf %113, %119 : vector<24x1xf32>
    %c168_62 = arith.constant 168 : index
    %c0_63 = arith.constant 0 : index
    %121 = vector.load %arg4[%c168_62, %c0_63] : memref<384x2xf32, #tpu.memory_space<vmem>>, vector<24x2xf32>
    %122 = vector.broadcast %70 : vector<24x1xf32> to vector<24x2xf32>
    %123 = arith.subf %121, %122 : vector<24x2xf32>
    %124 = arith.mulf %123, %123 : vector<24x2xf32>
    %cst_64 = arith.constant dense<0.000000e+00> : vector<24xf32>
    %125 = vector.multi_reduction <add>, %124, %cst_64 [1] : vector<24x2xf32> to vector<24xf32>
    %126 = vector.shape_cast %125 : vector<24xf32> to vector<24x1xf32>
    %127 = arith.addf %120, %126 : vector<24x1xf32>
    %c192_65 = arith.constant 192 : index
    %c0_66 = arith.constant 0 : index
    %128 = vector.load %arg4[%c192_65, %c0_66] : memref<384x2xf32, #tpu.memory_space<vmem>>, vector<24x2xf32>
    %129 = vector.broadcast %70 : vector<24x1xf32> to vector<24x2xf32>
    %130 = arith.subf %128, %129 : vector<24x2xf32>
    %131 = arith.mulf %130, %130 : vector<24x2xf32>
    %cst_67 = arith.constant dense<0.000000e+00> : vector<24xf32>
    %132 = vector.multi_reduction <add>, %131, %cst_67 [1] : vector<24x2xf32> to vector<24xf32>
    %133 = vector.shape_cast %132 : vector<24xf32> to vector<24x1xf32>
    %134 = arith.addf %127, %133 : vector<24x1xf32>
    %c216_68 = arith.constant 216 : index
    %c0_69 = arith.constant 0 : index
    %135 = vector.load %arg4[%c216_68, %c0_69] : memref<384x2xf32, #tpu.memory_space<vmem>>, vector<24x2xf32>
    %136 = vector.broadcast %70 : vector<24x1xf32> to vector<24x2xf32>
    %137 = arith.subf %135, %136 : vector<24x2xf32>
    %138 = arith.mulf %137, %137 : vector<24x2xf32>
    %cst_70 = arith.constant dense<0.000000e+00> : vector<24xf32>
    %139 = vector.multi_reduction <add>, %138, %cst_70 [1] : vector<24x2xf32> to vector<24xf32>
    %140 = vector.shape_cast %139 : vector<24xf32> to vector<24x1xf32>
    %141 = arith.addf %134, %140 : vector<24x1xf32>
    %c240_71 = arith.constant 240 : index
    %c0_72 = arith.constant 0 : index
    %142 = vector.load %arg4[%c240_71, %c0_72] : memref<384x2xf32, #tpu.memory_space<vmem>>, vector<24x2xf32>
    %143 = vector.broadcast %70 : vector<24x1xf32> to vector<24x2xf32>
    %144 = arith.subf %142, %143 : vector<24x2xf32>
    %145 = arith.mulf %144, %144 : vector<24x2xf32>
    %cst_73 = arith.constant dense<0.000000e+00> : vector<24xf32>
    %146 = vector.multi_reduction <add>, %145, %cst_73 [1] : vector<24x2xf32> to vector<24xf32>
    %147 = vector.shape_cast %146 : vector<24xf32> to vector<24x1xf32>
    %148 = arith.addf %141, %147 : vector<24x1xf32>
    %c264_74 = arith.constant 264 : index
    %c0_75 = arith.constant 0 : index
    %149 = vector.load %arg4[%c264_74, %c0_75] : memref<384x2xf32, #tpu.memory_space<vmem>>, vector<24x2xf32>
    %150 = vector.broadcast %70 : vector<24x1xf32> to vector<24x2xf32>
    %151 = arith.subf %149, %150 : vector<24x2xf32>
    %152 = arith.mulf %151, %151 : vector<24x2xf32>
    %cst_76 = arith.constant dense<0.000000e+00> : vector<24xf32>
    %153 = vector.multi_reduction <add>, %152, %cst_76 [1] : vector<24x2xf32> to vector<24xf32>
    %154 = vector.shape_cast %153 : vector<24xf32> to vector<24x1xf32>
    %155 = arith.addf %148, %154 : vector<24x1xf32>
    %c288_77 = arith.constant 288 : index
    %c0_78 = arith.constant 0 : index
    %156 = vector.load %arg4[%c288_77, %c0_78] : memref<384x2xf32, #tpu.memory_space<vmem>>, vector<24x2xf32>
    %157 = vector.broadcast %70 : vector<24x1xf32> to vector<24x2xf32>
    %158 = arith.subf %156, %157 : vector<24x2xf32>
    %159 = arith.mulf %158, %158 : vector<24x2xf32>
    %cst_79 = arith.constant dense<0.000000e+00> : vector<24xf32>
    %160 = vector.multi_reduction <add>, %159, %cst_79 [1] : vector<24x2xf32> to vector<24xf32>
    %161 = vector.shape_cast %160 : vector<24xf32> to vector<24x1xf32>
    %162 = arith.addf %155, %161 : vector<24x1xf32>
    %c312_80 = arith.constant 312 : index
    %c0_81 = arith.constant 0 : index
    %163 = vector.load %arg4[%c312_80, %c0_81] : memref<384x2xf32, #tpu.memory_space<vmem>>, vector<24x2xf32>
    %164 = vector.broadcast %70 : vector<24x1xf32> to vector<24x2xf32>
    %165 = arith.subf %163, %164 : vector<24x2xf32>
    %166 = arith.mulf %165, %165 : vector<24x2xf32>
    %cst_82 = arith.constant dense<0.000000e+00> : vector<24xf32>
    %167 = vector.multi_reduction <add>, %166, %cst_82 [1] : vector<24x2xf32> to vector<24xf32>
    %168 = vector.shape_cast %167 : vector<24xf32> to vector<24x1xf32>
    %169 = arith.addf %162, %168 : vector<24x1xf32>
    %c336_83 = arith.constant 336 : index
    %c0_84 = arith.constant 0 : index
    %170 = vector.load %arg4[%c336_83, %c0_84] : memref<384x2xf32, #tpu.memory_space<vmem>>, vector<24x2xf32>
    %171 = vector.broadcast %70 : vector<24x1xf32> to vector<24x2xf32>
    %172 = arith.subf %170, %171 : vector<24x2xf32>
    %173 = arith.mulf %172, %172 : vector<24x2xf32>
    %cst_85 = arith.constant dense<0.000000e+00> : vector<24xf32>
    %174 = vector.multi_reduction <add>, %173, %cst_85 [1] : vector<24x2xf32> to vector<24xf32>
    %175 = vector.shape_cast %174 : vector<24xf32> to vector<24x1xf32>
    %176 = arith.addf %169, %175 : vector<24x1xf32>
    %c360_86 = arith.constant 360 : index
    %c0_87 = arith.constant 0 : index
    %177 = vector.load %arg4[%c360_86, %c0_87] : memref<384x2xf32, #tpu.memory_space<vmem>>, vector<24x2xf32>
    %178 = vector.broadcast %70 : vector<24x1xf32> to vector<24x2xf32>
    %179 = arith.subf %177, %178 : vector<24x2xf32>
    %180 = arith.mulf %179, %179 : vector<24x2xf32>
    %cst_88 = arith.constant dense<0.000000e+00> : vector<24xf32>
    %181 = vector.multi_reduction <add>, %180, %cst_88 [1] : vector<24x2xf32> to vector<24xf32>
    %182 = vector.shape_cast %181 : vector<24xf32> to vector<24x1xf32>
    %183 = arith.addf %176, %182 : vector<24x1xf32>
    %cst_89 = arith.constant 3.200000e+01 : f32
    %184 = vector.broadcast %cst_89 : f32 to vector<24x1xf32>
    %185 = arith.divf %183, %184 : vector<24x1xf32>
    %cst_90 = arith.constant 9.99999974E-6 : f32
    %186 = vector.broadcast %cst_90 : f32 to vector<24x1xf32>
    %187 = arith.addf %185, %186 : vector<24x1xf32>
    %188 = math.rsqrt %187 : vector<24x1xf32>
    %c0_91 = arith.constant 0 : index
    %c0_92 = arith.constant 0 : index
    %189 = vector.load %arg2[%c0_91, %c0_92] : memref<24x1xf32, #tpu.memory_space<vmem>>, vector<24x1xf32>
    %190 = arith.mulf %188, %189 : vector<24x1xf32>
    %c0_93 = arith.constant 0 : index
    %c0_94 = arith.constant 0 : index
    %191 = vector.load %arg3[%c0_93, %c0_94] : memref<24x1xf32, #tpu.memory_space<vmem>>, vector<24x1xf32>
    %192 = arith.mulf %70, %190 : vector<24x1xf32>
    %193 = arith.subf %191, %192 : vector<24x1xf32>
    %c0_95 = arith.constant 0 : index
    %c0_96 = arith.constant 0 : index
    %194 = vector.load %arg4[%c0_95, %c0_96] : memref<384x2xf32, #tpu.memory_space<vmem>>, vector<24x2xf32>
    %195 = vector.broadcast %190 : vector<24x1xf32> to vector<24x2xf32>
    %196 = arith.mulf %194, %195 : vector<24x2xf32>
    %197 = vector.broadcast %193 : vector<24x1xf32> to vector<24x2xf32>
    %198 = arith.addf %196, %197 : vector<24x2xf32>
    %cst_97 = arith.constant 0.000000e+00 : f32
    %199 = vector.broadcast %cst_97 : f32 to vector<24x2xf32>
    %200 = arith.maximumf %198, %199 : vector<24x2xf32>
    %c0_98 = arith.constant 0 : index
    %c0_99 = arith.constant 0 : index
    %201 = vector.load %arg4[%c0_98, %c0_99] : memref<384x2xf32, #tpu.memory_space<vmem>>, vector<24x2xf32>
    tpu.vector_store %arg4[%c0_98, %c0_99], %200 {strides = array<i32>} : memref<384x2xf32, #tpu.memory_space<vmem>>, vector<24x2xf32>,
    %c24_100 = arith.constant 24 : index
    %c0_101 = arith.constant 0 : index
    %202 = vector.load %arg4[%c24_100, %c0_101] : memref<384x2xf32, #tpu.memory_space<vmem>>, vector<24x2xf32>
    %203 = vector.broadcast %190 : vector<24x1xf32> to vector<24x2xf32>
    %204 = arith.mulf %202, %203 : vector<24x2xf32>
    %205 = vector.broadcast %193 : vector<24x1xf32> to vector<24x2xf32>
    %206 = arith.addf %204, %205 : vector<24x2xf32>
    %cst_102 = arith.constant 0.000000e+00 : f32
    %207 = vector.broadcast %cst_102 : f32 to vector<24x2xf32>
    %208 = arith.maximumf %206, %207 : vector<24x2xf32>
    %c24_103 = arith.constant 24 : index
    %c0_104 = arith.constant 0 : index
    %209 = vector.load %arg4[%c24_103, %c0_104] : memref<384x2xf32, #tpu.memory_space<vmem>>, vector<24x2xf32>
    tpu.vector_store %arg4[%c24_103, %c0_104], %208 {strides = array<i32>} : memref<384x2xf32, #tpu.memory_space<vmem>>, vector<24x2xf32>,
    %c48_105 = arith.constant 48 : index
    %c0_106 = arith.constant 0 : index
    %210 = vector.load %arg4[%c48_105, %c0_106] : memref<384x2xf32, #tpu.memory_space<vmem>>, vector<24x2xf32>
    %211 = vector.broadcast %190 : vector<24x1xf32> to vector<24x2xf32>
    %212 = arith.mulf %210, %211 : vector<24x2xf32>
    %213 = vector.broadcast %193 : vector<24x1xf32> to vector<24x2xf32>
    %214 = arith.addf %212, %213 : vector<24x2xf32>
    %cst_107 = arith.constant 0.000000e+00 : f32
    %215 = vector.broadcast %cst_107 : f32 to vector<24x2xf32>
    %216 = arith.maximumf %214, %215 : vector<24x2xf32>
    %c48_108 = arith.constant 48 : index
    %c0_109 = arith.constant 0 : index
    %217 = vector.load %arg4[%c48_108, %c0_109] : memref<384x2xf32, #tpu.memory_space<vmem>>, vector<24x2xf32>
    tpu.vector_store %arg4[%c48_108, %c0_109], %216 {strides = array<i32>} : memref<384x2xf32, #tpu.memory_space<vmem>>, vector<24x2xf32>,
    %c72_110 = arith.constant 72 : index
    %c0_111 = arith.constant 0 : index
    %218 = vector.load %arg4[%c72_110, %c0_111] : memref<384x2xf32, #tpu.memory_space<vmem>>, vector<24x2xf32>
    %219 = vector.broadcast %190 : vector<24x1xf32> to vector<24x2xf32>
    %220 = arith.mulf %218, %219 : vector<24x2xf32>
    %221 = vector.broadcast %193 : vector<24x1xf32> to vector<24x2xf32>
    %222 = arith.addf %220, %221 : vector<24x2xf32>
    %cst_112 = arith.constant 0.000000e+00 : f32
    %223 = vector.broadcast %cst_112 : f32 to vector<24x2xf32>
    %224 = arith.maximumf %222, %223 : vector<24x2xf32>
    %c72_113 = arith.constant 72 : index
    %c0_114 = arith.constant 0 : index
    %225 = vector.load %arg4[%c72_113, %c0_114] : memref<384x2xf32, #tpu.memory_space<vmem>>, vector<24x2xf32>
    tpu.vector_store %arg4[%c72_113, %c0_114], %224 {strides = array<i32>} : memref<384x2xf32, #tpu.memory_space<vmem>>, vector<24x2xf32>,
    %c96_115 = arith.constant 96 : index
    %c0_116 = arith.constant 0 : index
    %226 = vector.load %arg4[%c96_115, %c0_116] : memref<384x2xf32, #tpu.memory_space<vmem>>, vector<24x2xf32>
    %227 = vector.broadcast %190 : vector<24x1xf32> to vector<24x2xf32>
    %228 = arith.mulf %226, %227 : vector<24x2xf32>
    %229 = vector.broadcast %193 : vector<24x1xf32> to vector<24x2xf32>
    %230 = arith.addf %228, %229 : vector<24x2xf32>
    %cst_117 = arith.constant 0.000000e+00 : f32
    %231 = vector.broadcast %cst_117 : f32 to vector<24x2xf32>
    %232 = arith.maximumf %230, %231 : vector<24x2xf32>
    %c96_118 = arith.constant 96 : index
    %c0_119 = arith.constant 0 : index
    %233 = vector.load %arg4[%c96_118, %c0_119] : memref<384x2xf32, #tpu.memory_space<vmem>>, vector<24x2xf32>
    tpu.vector_store %arg4[%c96_118, %c0_119], %232 {strides = array<i32>} : memref<384x2xf32, #tpu.memory_space<vmem>>, vector<24x2xf32>,
    %c120_120 = arith.constant 120 : index
    %c0_121 = arith.constant 0 : index
    %234 = vector.load %arg4[%c120_120, %c0_121] : memref<384x2xf32, #tpu.memory_space<vmem>>, vector<24x2xf32>
    %235 = vector.broadcast %190 : vector<24x1xf32> to vector<24x2xf32>
    %236 = arith.mulf %234, %235 : vector<24x2xf32>
    %237 = vector.broadcast %193 : vector<24x1xf32> to vector<24x2xf32>
    %238 = arith.addf %236, %237 : vector<24x2xf32>
    %cst_122 = arith.constant 0.000000e+00 : f32
    %239 = vector.broadcast %cst_122 : f32 to vector<24x2xf32>
    %240 = arith.maximumf %238, %239 : vector<24x2xf32>
    %c120_123 = arith.constant 120 : index
    %c0_124 = arith.constant 0 : index
    %241 = vector.load %arg4[%c120_123, %c0_124] : memref<384x2xf32, #tpu.memory_space<vmem>>, vector<24x2xf32>
    tpu.vector_store %arg4[%c120_123, %c0_124], %240 {strides = array<i32>} : memref<384x2xf32, #tpu.memory_space<vmem>>, vector<24x2xf32>,
    %c144_125 = arith.constant 144 : index
    %c0_126 = arith.constant 0 : index
    %242 = vector.load %arg4[%c144_125, %c0_126] : memref<384x2xf32, #tpu.memory_space<vmem>>, vector<24x2xf32>
    %243 = vector.broadcast %190 : vector<24x1xf32> to vector<24x2xf32>
    %244 = arith.mulf %242, %243 : vector<24x2xf32>
    %245 = vector.broadcast %193 : vector<24x1xf32> to vector<24x2xf32>
    %246 = arith.addf %244, %245 : vector<24x2xf32>
    %cst_127 = arith.constant 0.000000e+00 : f32
    %247 = vector.broadcast %cst_127 : f32 to vector<24x2xf32>
    %248 = arith.maximumf %246, %247 : vector<24x2xf32>
    %c144_128 = arith.constant 144 : index
    %c0_129 = arith.constant 0 : index
    %249 = vector.load %arg4[%c144_128, %c0_129] : memref<384x2xf32, #tpu.memory_space<vmem>>, vector<24x2xf32>
    tpu.vector_store %arg4[%c144_128, %c0_129], %248 {strides = array<i32>} : memref<384x2xf32, #tpu.memory_space<vmem>>, vector<24x2xf32>,
    %c168_130 = arith.constant 168 : index
    %c0_131 = arith.constant 0 : index
    %250 = vector.load %arg4[%c168_130, %c0_131] : memref<384x2xf32, #tpu.memory_space<vmem>>, vector<24x2xf32>
    %251 = vector.broadcast %190 : vector<24x1xf32> to vector<24x2xf32>
    %252 = arith.mulf %250, %251 : vector<24x2xf32>
    %253 = vector.broadcast %193 : vector<24x1xf32> to vector<24x2xf32>
    %254 = arith.addf %252, %253 : vector<24x2xf32>
    %cst_132 = arith.constant 0.000000e+00 : f32
    %255 = vector.broadcast %cst_132 : f32 to vector<24x2xf32>
    %256 = arith.maximumf %254, %255 : vector<24x2xf32>
    %c168_133 = arith.constant 168 : index
    %c0_134 = arith.constant 0 : index
    %257 = vector.load %arg4[%c168_133, %c0_134] : memref<384x2xf32, #tpu.memory_space<vmem>>, vector<24x2xf32>
    tpu.vector_store %arg4[%c168_133, %c0_134], %256 {strides = array<i32>} : memref<384x2xf32, #tpu.memory_space<vmem>>, vector<24x2xf32>,
    %c192_135 = arith.constant 192 : index
    %c0_136 = arith.constant 0 : index
    %258 = vector.load %arg4[%c192_135, %c0_136] : memref<384x2xf32, #tpu.memory_space<vmem>>, vector<24x2xf32>
    %259 = vector.broadcast %190 : vector<24x1xf32> to vector<24x2xf32>
    %260 = arith.mulf %258, %259 : vector<24x2xf32>
    %261 = vector.broadcast %193 : vector<24x1xf32> to vector<24x2xf32>
    %262 = arith.addf %260, %261 : vector<24x2xf32>
    %cst_137 = arith.constant 0.000000e+00 : f32
    %263 = vector.broadcast %cst_137 : f32 to vector<24x2xf32>
    %264 = arith.maximumf %262, %263 : vector<24x2xf32>
    %c192_138 = arith.constant 192 : index
    %c0_139 = arith.constant 0 : index
    %265 = vector.load %arg4[%c192_138, %c0_139] : memref<384x2xf32, #tpu.memory_space<vmem>>, vector<24x2xf32>
    tpu.vector_store %arg4[%c192_138, %c0_139], %264 {strides = array<i32>} : memref<384x2xf32, #tpu.memory_space<vmem>>, vector<24x2xf32>,
    %c216_140 = arith.constant 216 : index
    %c0_141 = arith.constant 0 : index
    %266 = vector.load %arg4[%c216_140, %c0_141] : memref<384x2xf32, #tpu.memory_space<vmem>>, vector<24x2xf32>
    %267 = vector.broadcast %190 : vector<24x1xf32> to vector<24x2xf32>
    %268 = arith.mulf %266, %267 : vector<24x2xf32>
    %269 = vector.broadcast %193 : vector<24x1xf32> to vector<24x2xf32>
    %270 = arith.addf %268, %269 : vector<24x2xf32>
    %cst_142 = arith.constant 0.000000e+00 : f32
    %271 = vector.broadcast %cst_142 : f32 to vector<24x2xf32>
    %272 = arith.maximumf %270, %271 : vector<24x2xf32>
    %c216_143 = arith.constant 216 : index
    %c0_144 = arith.constant 0 : index
    %273 = vector.load %arg4[%c216_143, %c0_144] : memref<384x2xf32, #tpu.memory_space<vmem>>, vector<24x2xf32>
    tpu.vector_store %arg4[%c216_143, %c0_144], %272 {strides = array<i32>} : memref<384x2xf32, #tpu.memory_space<vmem>>, vector<24x2xf32>,
    %c240_145 = arith.constant 240 : index
    %c0_146 = arith.constant 0 : index
    %274 = vector.load %arg4[%c240_145, %c0_146] : memref<384x2xf32, #tpu.memory_space<vmem>>, vector<24x2xf32>
    %275 = vector.broadcast %190 : vector<24x1xf32> to vector<24x2xf32>
    %276 = arith.mulf %274, %275 : vector<24x2xf32>
    %277 = vector.broadcast %193 : vector<24x1xf32> to vector<24x2xf32>
    %278 = arith.addf %276, %277 : vector<24x2xf32>
    %cst_147 = arith.constant 0.000000e+00 : f32
    %279 = vector.broadcast %cst_147 : f32 to vector<24x2xf32>
    %280 = arith.maximumf %278, %279 : vector<24x2xf32>
    %c240_148 = arith.constant 240 : index
    %c0_149 = arith.constant 0 : index
    %281 = vector.load %arg4[%c240_148, %c0_149] : memref<384x2xf32, #tpu.memory_space<vmem>>, vector<24x2xf32>
    tpu.vector_store %arg4[%c240_148, %c0_149], %280 {strides = array<i32>} : memref<384x2xf32, #tpu.memory_space<vmem>>, vector<24x2xf32>,
    %c264_150 = arith.constant 264 : index
    %c0_151 = arith.constant 0 : index
    %282 = vector.load %arg4[%c264_150, %c0_151] : memref<384x2xf32, #tpu.memory_space<vmem>>, vector<24x2xf32>
    %283 = vector.broadcast %190 : vector<24x1xf32> to vector<24x2xf32>
    %284 = arith.mulf %282, %283 : vector<24x2xf32>
    %285 = vector.broadcast %193 : vector<24x1xf32> to vector<24x2xf32>
    %286 = arith.addf %284, %285 : vector<24x2xf32>
    %cst_152 = arith.constant 0.000000e+00 : f32
    %287 = vector.broadcast %cst_152 : f32 to vector<24x2xf32>
    %288 = arith.maximumf %286, %287 : vector<24x2xf32>
    %c264_153 = arith.constant 264 : index
    %c0_154 = arith.constant 0 : index
    %289 = vector.load %arg4[%c264_153, %c0_154] : memref<384x2xf32, #tpu.memory_space<vmem>>, vector<24x2xf32>
    tpu.vector_store %arg4[%c264_153, %c0_154], %288 {strides = array<i32>} : memref<384x2xf32, #tpu.memory_space<vmem>>, vector<24x2xf32>,
    %c288_155 = arith.constant 288 : index
    %c0_156 = arith.constant 0 : index
    %290 = vector.load %arg4[%c288_155, %c0_156] : memref<384x2xf32, #tpu.memory_space<vmem>>, vector<24x2xf32>
    %291 = vector.broadcast %190 : vector<24x1xf32> to vector<24x2xf32>
    %292 = arith.mulf %290, %291 : vector<24x2xf32>
    %293 = vector.broadcast %193 : vector<24x1xf32> to vector<24x2xf32>
    %294 = arith.addf %292, %293 : vector<24x2xf32>
    %cst_157 = arith.constant 0.000000e+00 : f32
    %295 = vector.broadcast %cst_157 : f32 to vector<24x2xf32>
    %296 = arith.maximumf %294, %295 : vector<24x2xf32>
    %c288_158 = arith.constant 288 : index
    %c0_159 = arith.constant 0 : index
    %297 = vector.load %arg4[%c288_158, %c0_159] : memref<384x2xf32, #tpu.memory_space<vmem>>, vector<24x2xf32>
    tpu.vector_store %arg4[%c288_158, %c0_159], %296 {strides = array<i32>} : memref<384x2xf32, #tpu.memory_space<vmem>>, vector<24x2xf32>,
    %c312_160 = arith.constant 312 : index
    %c0_161 = arith.constant 0 : index
    %298 = vector.load %arg4[%c312_160, %c0_161] : memref<384x2xf32, #tpu.memory_space<vmem>>, vector<24x2xf32>
    %299 = vector.broadcast %190 : vector<24x1xf32> to vector<24x2xf32>
    %300 = arith.mulf %298, %299 : vector<24x2xf32>
    %301 = vector.broadcast %193 : vector<24x1xf32> to vector<24x2xf32>
    %302 = arith.addf %300, %301 : vector<24x2xf32>
    %cst_162 = arith.constant 0.000000e+00 : f32
    %303 = vector.broadcast %cst_162 : f32 to vector<24x2xf32>
    %304 = arith.maximumf %302, %303 : vector<24x2xf32>
    %c312_163 = arith.constant 312 : index
    %c0_164 = arith.constant 0 : index
    %305 = vector.load %arg4[%c312_163, %c0_164] : memref<384x2xf32, #tpu.memory_space<vmem>>, vector<24x2xf32>
    tpu.vector_store %arg4[%c312_163, %c0_164], %304 {strides = array<i32>} : memref<384x2xf32, #tpu.memory_space<vmem>>, vector<24x2xf32>,
    %c336_165 = arith.constant 336 : index
    %c0_166 = arith.constant 0 : index
    %306 = vector.load %arg4[%c336_165, %c0_166] : memref<384x2xf32, #tpu.memory_space<vmem>>, vector<24x2xf32>
    %307 = vector.broadcast %190 : vector<24x1xf32> to vector<24x2xf32>
    %308 = arith.mulf %306, %307 : vector<24x2xf32>
    %309 = vector.broadcast %193 : vector<24x1xf32> to vector<24x2xf32>
    %310 = arith.addf %308, %309 : vector<24x2xf32>
    %cst_167 = arith.constant 0.000000e+00 : f32
    %311 = vector.broadcast %cst_167 : f32 to vector<24x2xf32>
    %312 = arith.maximumf %310, %311 : vector<24x2xf32>
    %c336_168 = arith.constant 336 : index
    %c0_169 = arith.constant 0 : index
    %313 = vector.load %arg4[%c336_168, %c0_169] : memref<384x2xf32, #tpu.memory_space<vmem>>, vector<24x2xf32>
    tpu.vector_store %arg4[%c336_168, %c0_169], %312 {strides = array<i32>} : memref<384x2xf32, #tpu.memory_space<vmem>>, vector<24x2xf32>,
    %c360_170 = arith.constant 360 : index
    %c0_171 = arith.constant 0 : index
    %314 = vector.load %arg4[%c360_170, %c0_171] : memref<384x2xf32, #tpu.memory_space<vmem>>, vector<24x2xf32>
    %315 = vector.broadcast %190 : vector<24x1xf32> to vector<24x2xf32>
    %316 = arith.mulf %314, %315 : vector<24x2xf32>
    %317 = vector.broadcast %193 : vector<24x1xf32> to vector<24x2xf32>
    %318 = arith.addf %316, %317 : vector<24x2xf32>
    %cst_172 = arith.constant 0.000000e+00 : f32
    %319 = vector.broadcast %cst_172 : f32 to vector<24x2xf32>
    %320 = arith.maximumf %318, %319 : vector<24x2xf32>
    %c360_173 = arith.constant 360 : index
    %c0_174 = arith.constant 0 : index
    %321 = vector.load %arg4[%c360_173, %c0_174] : memref<384x2xf32, #tpu.memory_space<vmem>>, vector<24x2xf32>
    tpu.vector_store %arg4[%c360_173, %c0_174], %320 {strides = array<i32>} : memref<384x2xf32, #tpu.memory_space<vmem>>, vector<24x2xf32>,
    return
  }
}

module attributes {stable_mosaic.version = 11 : i64} {
  func.func @_gemm_bn_relu_kernel(%arg0: memref<48x216xbf16, #tpu.memory_space<vmem>>, %arg1: memref<216x32xbf16, #tpu.memory_space<vmem>>, %arg2: memref<12x1xf32, #tpu.memory_space<vmem>>, %arg3: memref<12x1xf32, #tpu.memory_space<vmem>>, %arg4: memref<48x32xf32, #tpu.memory_space<vmem>>) attributes {dimension_semantics = [], scalar_prefetch = 0 : i64, scratch_operands = 0 : i64, tpu.core_type = #tpu.core_type<tc>} {
    %c0 = arith.constant 0 : index
    %c0_0 = arith.constant 0 : index
    %0 = vector.load %arg0[%c0, %c0_0] : memref<48x216xbf16, #tpu.memory_space<vmem>>, vector<48x216xbf16>
    %c0_1 = arith.constant 0 : index
    %c0_2 = arith.constant 0 : index
    %1 = vector.load %arg1[%c0_1, %c0_2] : memref<216x32xbf16, #tpu.memory_space<vmem>>, vector<216x32xbf16>
    %cst = arith.constant dense<0.000000e+00> : vector<48x32xf32>
    %2 = tpu.matmul %0, %1, %cst {dimension_numbers = #tpu.dot_dimension_numbers<[1], [0], [0], [1], [0, 0, 1, 1], [], []>} : vector<48x216xbf16>, vector<216x32xbf16>, vector<48x32xf32> -> vector<48x32xf32>
    %c0_3 = arith.constant 0 : index
    %c0_4 = arith.constant 0 : index
    %3 = vector.load %arg4[%c0_3, %c0_4] : memref<48x32xf32, #tpu.memory_space<vmem>>, vector<48x32xf32>
    tpu.vector_store %arg4[%c0_3, %c0_4], %2 {strides = array<i32>} : memref<48x32xf32, #tpu.memory_space<vmem>>, vector<48x32xf32>,
    %cst_5 = arith.constant 0.000000e+00 : f32
    %4 = vector.broadcast %cst_5 : f32 to vector<12x1xf32>
    %c0_6 = arith.constant 0 : index
    %c0_7 = arith.constant 0 : index
    %5 = vector.load %arg4[%c0_6, %c0_7] : memref<48x32xf32, #tpu.memory_space<vmem>>, vector<12x32xf32>
    %cst_8 = arith.constant dense<0.000000e+00> : vector<12xf32>
    %6 = vector.multi_reduction <add>, %5, %cst_8 [1] : vector<12x32xf32> to vector<12xf32>
    %7 = vector.shape_cast %6 : vector<12xf32> to vector<12x1xf32>
    %8 = arith.addf %4, %7 : vector<12x1xf32>
    %c12 = arith.constant 12 : index
    %c0_9 = arith.constant 0 : index
    %9 = vector.load %arg4[%c12, %c0_9] : memref<48x32xf32, #tpu.memory_space<vmem>>, vector<12x32xf32>
    %cst_10 = arith.constant dense<0.000000e+00> : vector<12xf32>
    %10 = vector.multi_reduction <add>, %9, %cst_10 [1] : vector<12x32xf32> to vector<12xf32>
    %11 = vector.shape_cast %10 : vector<12xf32> to vector<12x1xf32>
    %12 = arith.addf %8, %11 : vector<12x1xf32>
    %c24 = arith.constant 24 : index
    %c0_11 = arith.constant 0 : index
    %13 = vector.load %arg4[%c24, %c0_11] : memref<48x32xf32, #tpu.memory_space<vmem>>, vector<12x32xf32>
    %cst_12 = arith.constant dense<0.000000e+00> : vector<12xf32>
    %14 = vector.multi_reduction <add>, %13, %cst_12 [1] : vector<12x32xf32> to vector<12xf32>
    %15 = vector.shape_cast %14 : vector<12xf32> to vector<12x1xf32>
    %16 = arith.addf %12, %15 : vector<12x1xf32>
    %c36 = arith.constant 36 : index
    %c0_13 = arith.constant 0 : index
    %17 = vector.load %arg4[%c36, %c0_13] : memref<48x32xf32, #tpu.memory_space<vmem>>, vector<12x32xf32>
    %cst_14 = arith.constant dense<0.000000e+00> : vector<12xf32>
    %18 = vector.multi_reduction <add>, %17, %cst_14 [1] : vector<12x32xf32> to vector<12xf32>
    %19 = vector.shape_cast %18 : vector<12xf32> to vector<12x1xf32>
    %20 = arith.addf %16, %19 : vector<12x1xf32>
    %cst_15 = arith.constant 1.280000e+02 : f32
    %21 = vector.broadcast %cst_15 : f32 to vector<12x1xf32>
    %22 = arith.divf %20, %21 : vector<12x1xf32>
    %cst_16 = arith.constant 0.000000e+00 : f32
    %23 = vector.broadcast %cst_16 : f32 to vector<12x1xf32>
    %c0_17 = arith.constant 0 : index
    %c0_18 = arith.constant 0 : index
    %24 = vector.load %arg4[%c0_17, %c0_18] : memref<48x32xf32, #tpu.memory_space<vmem>>, vector<12x32xf32>
    %25 = vector.broadcast %22 : vector<12x1xf32> to vector<12x32xf32>
    %26 = arith.subf %24, %25 : vector<12x32xf32>
    %27 = arith.mulf %26, %26 : vector<12x32xf32>
    %cst_19 = arith.constant dense<0.000000e+00> : vector<12xf32>
    %28 = vector.multi_reduction <add>, %27, %cst_19 [1] : vector<12x32xf32> to vector<12xf32>
    %29 = vector.shape_cast %28 : vector<12xf32> to vector<12x1xf32>
    %30 = arith.addf %23, %29 : vector<12x1xf32>
    %c12_20 = arith.constant 12 : index
    %c0_21 = arith.constant 0 : index
    %31 = vector.load %arg4[%c12_20, %c0_21] : memref<48x32xf32, #tpu.memory_space<vmem>>, vector<12x32xf32>
    %32 = vector.broadcast %22 : vector<12x1xf32> to vector<12x32xf32>
    %33 = arith.subf %31, %32 : vector<12x32xf32>
    %34 = arith.mulf %33, %33 : vector<12x32xf32>
    %cst_22 = arith.constant dense<0.000000e+00> : vector<12xf32>
    %35 = vector.multi_reduction <add>, %34, %cst_22 [1] : vector<12x32xf32> to vector<12xf32>
    %36 = vector.shape_cast %35 : vector<12xf32> to vector<12x1xf32>
    %37 = arith.addf %30, %36 : vector<12x1xf32>
    %c24_23 = arith.constant 24 : index
    %c0_24 = arith.constant 0 : index
    %38 = vector.load %arg4[%c24_23, %c0_24] : memref<48x32xf32, #tpu.memory_space<vmem>>, vector<12x32xf32>
    %39 = vector.broadcast %22 : vector<12x1xf32> to vector<12x32xf32>
    %40 = arith.subf %38, %39 : vector<12x32xf32>
    %41 = arith.mulf %40, %40 : vector<12x32xf32>
    %cst_25 = arith.constant dense<0.000000e+00> : vector<12xf32>
    %42 = vector.multi_reduction <add>, %41, %cst_25 [1] : vector<12x32xf32> to vector<12xf32>
    %43 = vector.shape_cast %42 : vector<12xf32> to vector<12x1xf32>
    %44 = arith.addf %37, %43 : vector<12x1xf32>
    %c36_26 = arith.constant 36 : index
    %c0_27 = arith.constant 0 : index
    %45 = vector.load %arg4[%c36_26, %c0_27] : memref<48x32xf32, #tpu.memory_space<vmem>>, vector<12x32xf32>
    %46 = vector.broadcast %22 : vector<12x1xf32> to vector<12x32xf32>
    %47 = arith.subf %45, %46 : vector<12x32xf32>
    %48 = arith.mulf %47, %47 : vector<12x32xf32>
    %cst_28 = arith.constant dense<0.000000e+00> : vector<12xf32>
    %49 = vector.multi_reduction <add>, %48, %cst_28 [1] : vector<12x32xf32> to vector<12xf32>
    %50 = vector.shape_cast %49 : vector<12xf32> to vector<12x1xf32>
    %51 = arith.addf %44, %50 : vector<12x1xf32>
    %cst_29 = arith.constant 1.280000e+02 : f32
    %52 = vector.broadcast %cst_29 : f32 to vector<12x1xf32>
    %53 = arith.divf %51, %52 : vector<12x1xf32>
    %cst_30 = arith.constant 9.99999974E-6 : f32
    %54 = vector.broadcast %cst_30 : f32 to vector<12x1xf32>
    %55 = arith.addf %53, %54 : vector<12x1xf32>
    %56 = math.rsqrt %55 : vector<12x1xf32>
    %c0_31 = arith.constant 0 : index
    %c0_32 = arith.constant 0 : index
    %57 = vector.load %arg2[%c0_31, %c0_32] : memref<12x1xf32, #tpu.memory_space<vmem>>, vector<12x1xf32>
    %58 = arith.mulf %56, %57 : vector<12x1xf32>
    %c0_33 = arith.constant 0 : index
    %c0_34 = arith.constant 0 : index
    %59 = vector.load %arg3[%c0_33, %c0_34] : memref<12x1xf32, #tpu.memory_space<vmem>>, vector<12x1xf32>
    %60 = arith.mulf %22, %58 : vector<12x1xf32>
    %61 = arith.subf %59, %60 : vector<12x1xf32>
    %c0_35 = arith.constant 0 : index
    %c0_36 = arith.constant 0 : index
    %62 = vector.load %arg4[%c0_35, %c0_36] : memref<48x32xf32, #tpu.memory_space<vmem>>, vector<12x32xf32>
    %63 = vector.broadcast %58 : vector<12x1xf32> to vector<12x32xf32>
    %64 = arith.mulf %62, %63 : vector<12x32xf32>
    %65 = vector.broadcast %61 : vector<12x1xf32> to vector<12x32xf32>
    %66 = arith.addf %64, %65 : vector<12x32xf32>
    %cst_37 = arith.constant 0.000000e+00 : f32
    %67 = vector.broadcast %cst_37 : f32 to vector<12x32xf32>
    %68 = arith.maximumf %66, %67 : vector<12x32xf32>
    %c0_38 = arith.constant 0 : index
    %c0_39 = arith.constant 0 : index
    %69 = vector.load %arg4[%c0_38, %c0_39] : memref<48x32xf32, #tpu.memory_space<vmem>>, vector<12x32xf32>
    tpu.vector_store %arg4[%c0_38, %c0_39], %68 {strides = array<i32>} : memref<48x32xf32, #tpu.memory_space<vmem>>, vector<12x32xf32>,
    %c12_40 = arith.constant 12 : index
    %c0_41 = arith.constant 0 : index
    %70 = vector.load %arg4[%c12_40, %c0_41] : memref<48x32xf32, #tpu.memory_space<vmem>>, vector<12x32xf32>
    %71 = vector.broadcast %58 : vector<12x1xf32> to vector<12x32xf32>
    %72 = arith.mulf %70, %71 : vector<12x32xf32>
    %73 = vector.broadcast %61 : vector<12x1xf32> to vector<12x32xf32>
    %74 = arith.addf %72, %73 : vector<12x32xf32>
    %cst_42 = arith.constant 0.000000e+00 : f32
    %75 = vector.broadcast %cst_42 : f32 to vector<12x32xf32>
    %76 = arith.maximumf %74, %75 : vector<12x32xf32>
    %c12_43 = arith.constant 12 : index
    %c0_44 = arith.constant 0 : index
    %77 = vector.load %arg4[%c12_43, %c0_44] : memref<48x32xf32, #tpu.memory_space<vmem>>, vector<12x32xf32>
    tpu.vector_store %arg4[%c12_43, %c0_44], %76 {strides = array<i32>} : memref<48x32xf32, #tpu.memory_space<vmem>>, vector<12x32xf32>,
    %c24_45 = arith.constant 24 : index
    %c0_46 = arith.constant 0 : index
    %78 = vector.load %arg4[%c24_45, %c0_46] : memref<48x32xf32, #tpu.memory_space<vmem>>, vector<12x32xf32>
    %79 = vector.broadcast %58 : vector<12x1xf32> to vector<12x32xf32>
    %80 = arith.mulf %78, %79 : vector<12x32xf32>
    %81 = vector.broadcast %61 : vector<12x1xf32> to vector<12x32xf32>
    %82 = arith.addf %80, %81 : vector<12x32xf32>
    %cst_47 = arith.constant 0.000000e+00 : f32
    %83 = vector.broadcast %cst_47 : f32 to vector<12x32xf32>
    %84 = arith.maximumf %82, %83 : vector<12x32xf32>
    %c24_48 = arith.constant 24 : index
    %c0_49 = arith.constant 0 : index
    %85 = vector.load %arg4[%c24_48, %c0_49] : memref<48x32xf32, #tpu.memory_space<vmem>>, vector<12x32xf32>
    tpu.vector_store %arg4[%c24_48, %c0_49], %84 {strides = array<i32>} : memref<48x32xf32, #tpu.memory_space<vmem>>, vector<12x32xf32>,
    %c36_50 = arith.constant 36 : index
    %c0_51 = arith.constant 0 : index
    %86 = vector.load %arg4[%c36_50, %c0_51] : memref<48x32xf32, #tpu.memory_space<vmem>>, vector<12x32xf32>
    %87 = vector.broadcast %58 : vector<12x1xf32> to vector<12x32xf32>
    %88 = arith.mulf %86, %87 : vector<12x32xf32>
    %89 = vector.broadcast %61 : vector<12x1xf32> to vector<12x32xf32>
    %90 = arith.addf %88, %89 : vector<12x32xf32>
    %cst_52 = arith.constant 0.000000e+00 : f32
    %91 = vector.broadcast %cst_52 : f32 to vector<12x32xf32>
    %92 = arith.maximumf %90, %91 : vector<12x32xf32>
    %c36_53 = arith.constant 36 : index
    %c0_54 = arith.constant 0 : index
    %93 = vector.load %arg4[%c36_53, %c0_54] : memref<48x32xf32, #tpu.memory_space<vmem>>, vector<12x32xf32>
    tpu.vector_store %arg4[%c36_53, %c0_54], %92 {strides = array<i32>} : memref<48x32xf32, #tpu.memory_space<vmem>>, vector<12x32xf32>,
    return
  }
}

module attributes {stable_mosaic.version = 11 : i64} {
  func.func @_gemm_bn_relu_kernel(%arg0: memref<24x108xbf16, #tpu.memory_space<vmem>>, %arg1: memref<108x128xbf16, #tpu.memory_space<vmem>>, %arg2: memref<6x1xf32, #tpu.memory_space<vmem>>, %arg3: memref<6x1xf32, #tpu.memory_space<vmem>>, %arg4: memref<24x128xf32, #tpu.memory_space<vmem>>) attributes {dimension_semantics = [], scalar_prefetch = 0 : i64, scratch_operands = 0 : i64, tpu.core_type = #tpu.core_type<tc>} {
    %c0 = arith.constant 0 : index
    %c0_0 = arith.constant 0 : index
    %0 = vector.load %arg0[%c0, %c0_0] : memref<24x108xbf16, #tpu.memory_space<vmem>>, vector<24x108xbf16>
    %c0_1 = arith.constant 0 : index
    %c0_2 = arith.constant 0 : index
    %1 = vector.load %arg1[%c0_1, %c0_2] : memref<108x128xbf16, #tpu.memory_space<vmem>>, vector<108x128xbf16>
    %cst = arith.constant dense<0.000000e+00> : vector<24x128xf32>
    %2 = tpu.matmul %0, %1, %cst {dimension_numbers = #tpu.dot_dimension_numbers<[1], [0], [0], [1], [0, 0, 1, 1], [], []>} : vector<24x108xbf16>, vector<108x128xbf16>, vector<24x128xf32> -> vector<24x128xf32>
    %c0_3 = arith.constant 0 : index
    %c0_4 = arith.constant 0 : index
    %3 = vector.load %arg4[%c0_3, %c0_4] : memref<24x128xf32, #tpu.memory_space<vmem>>, vector<24x128xf32>
    tpu.vector_store %arg4[%c0_3, %c0_4], %2 {strides = array<i32>} : memref<24x128xf32, #tpu.memory_space<vmem>>, vector<24x128xf32>,
    %cst_5 = arith.constant 0.000000e+00 : f32
    %4 = vector.broadcast %cst_5 : f32 to vector<6x1xf32>
    %c0_6 = arith.constant 0 : index
    %c0_7 = arith.constant 0 : index
    %5 = vector.load %arg4[%c0_6, %c0_7] : memref<24x128xf32, #tpu.memory_space<vmem>>, vector<6x128xf32>
    %cst_8 = arith.constant dense<0.000000e+00> : vector<6xf32>
    %6 = vector.multi_reduction <add>, %5, %cst_8 [1] : vector<6x128xf32> to vector<6xf32>
    %7 = vector.shape_cast %6 : vector<6xf32> to vector<6x1xf32>
    %8 = arith.addf %4, %7 : vector<6x1xf32>
    %c6 = arith.constant 6 : index
    %c0_9 = arith.constant 0 : index
    %9 = vector.load %arg4[%c6, %c0_9] : memref<24x128xf32, #tpu.memory_space<vmem>>, vector<6x128xf32>
    %cst_10 = arith.constant dense<0.000000e+00> : vector<6xf32>
    %10 = vector.multi_reduction <add>, %9, %cst_10 [1] : vector<6x128xf32> to vector<6xf32>
    %11 = vector.shape_cast %10 : vector<6xf32> to vector<6x1xf32>
    %12 = arith.addf %8, %11 : vector<6x1xf32>
    %c12 = arith.constant 12 : index
    %c0_11 = arith.constant 0 : index
    %13 = vector.load %arg4[%c12, %c0_11] : memref<24x128xf32, #tpu.memory_space<vmem>>, vector<6x128xf32>
    %cst_12 = arith.constant dense<0.000000e+00> : vector<6xf32>
    %14 = vector.multi_reduction <add>, %13, %cst_12 [1] : vector<6x128xf32> to vector<6xf32>
    %15 = vector.shape_cast %14 : vector<6xf32> to vector<6x1xf32>
    %16 = arith.addf %12, %15 : vector<6x1xf32>
    %c18 = arith.constant 18 : index
    %c0_13 = arith.constant 0 : index
    %17 = vector.load %arg4[%c18, %c0_13] : memref<24x128xf32, #tpu.memory_space<vmem>>, vector<6x128xf32>
    %cst_14 = arith.constant dense<0.000000e+00> : vector<6xf32>
    %18 = vector.multi_reduction <add>, %17, %cst_14 [1] : vector<6x128xf32> to vector<6xf32>
    %19 = vector.shape_cast %18 : vector<6xf32> to vector<6x1xf32>
    %20 = arith.addf %16, %19 : vector<6x1xf32>
    %cst_15 = arith.constant 5.120000e+02 : f32
    %21 = vector.broadcast %cst_15 : f32 to vector<6x1xf32>
    %22 = arith.divf %20, %21 : vector<6x1xf32>
    %cst_16 = arith.constant 0.000000e+00 : f32
    %23 = vector.broadcast %cst_16 : f32 to vector<6x1xf32>
    %c0_17 = arith.constant 0 : index
    %c0_18 = arith.constant 0 : index
    %24 = vector.load %arg4[%c0_17, %c0_18] : memref<24x128xf32, #tpu.memory_space<vmem>>, vector<6x128xf32>
    %25 = vector.broadcast %22 : vector<6x1xf32> to vector<6x128xf32>
    %26 = arith.subf %24, %25 : vector<6x128xf32>
    %27 = arith.mulf %26, %26 : vector<6x128xf32>
    %cst_19 = arith.constant dense<0.000000e+00> : vector<6xf32>
    %28 = vector.multi_reduction <add>, %27, %cst_19 [1] : vector<6x128xf32> to vector<6xf32>
    %29 = vector.shape_cast %28 : vector<6xf32> to vector<6x1xf32>
    %30 = arith.addf %23, %29 : vector<6x1xf32>
    %c6_20 = arith.constant 6 : index
    %c0_21 = arith.constant 0 : index
    %31 = vector.load %arg4[%c6_20, %c0_21] : memref<24x128xf32, #tpu.memory_space<vmem>>, vector<6x128xf32>
    %32 = vector.broadcast %22 : vector<6x1xf32> to vector<6x128xf32>
    %33 = arith.subf %31, %32 : vector<6x128xf32>
    %34 = arith.mulf %33, %33 : vector<6x128xf32>
    %cst_22 = arith.constant dense<0.000000e+00> : vector<6xf32>
    %35 = vector.multi_reduction <add>, %34, %cst_22 [1] : vector<6x128xf32> to vector<6xf32>
    %36 = vector.shape_cast %35 : vector<6xf32> to vector<6x1xf32>
    %37 = arith.addf %30, %36 : vector<6x1xf32>
    %c12_23 = arith.constant 12 : index
    %c0_24 = arith.constant 0 : index
    %38 = vector.load %arg4[%c12_23, %c0_24] : memref<24x128xf32, #tpu.memory_space<vmem>>, vector<6x128xf32>
    %39 = vector.broadcast %22 : vector<6x1xf32> to vector<6x128xf32>
    %40 = arith.subf %38, %39 : vector<6x128xf32>
    %41 = arith.mulf %40, %40 : vector<6x128xf32>
    %cst_25 = arith.constant dense<0.000000e+00> : vector<6xf32>
    %42 = vector.multi_reduction <add>, %41, %cst_25 [1] : vector<6x128xf32> to vector<6xf32>
    %43 = vector.shape_cast %42 : vector<6xf32> to vector<6x1xf32>
    %44 = arith.addf %37, %43 : vector<6x1xf32>
    %c18_26 = arith.constant 18 : index
    %c0_27 = arith.constant 0 : index
    %45 = vector.load %arg4[%c18_26, %c0_27] : memref<24x128xf32, #tpu.memory_space<vmem>>, vector<6x128xf32>
    %46 = vector.broadcast %22 : vector<6x1xf32> to vector<6x128xf32>
    %47 = arith.subf %45, %46 : vector<6x128xf32>
    %48 = arith.mulf %47, %47 : vector<6x128xf32>
    %cst_28 = arith.constant dense<0.000000e+00> : vector<6xf32>
    %49 = vector.multi_reduction <add>, %48, %cst_28 [1] : vector<6x128xf32> to vector<6xf32>
    %50 = vector.shape_cast %49 : vector<6xf32> to vector<6x1xf32>
    %51 = arith.addf %44, %50 : vector<6x1xf32>
    %cst_29 = arith.constant 5.120000e+02 : f32
    %52 = vector.broadcast %cst_29 : f32 to vector<6x1xf32>
    %53 = arith.divf %51, %52 : vector<6x1xf32>
    %cst_30 = arith.constant 9.99999974E-6 : f32
    %54 = vector.broadcast %cst_30 : f32 to vector<6x1xf32>
    %55 = arith.addf %53, %54 : vector<6x1xf32>
    %56 = math.rsqrt %55 : vector<6x1xf32>
    %c0_31 = arith.constant 0 : index
    %c0_32 = arith.constant 0 : index
    %57 = vector.load %arg2[%c0_31, %c0_32] : memref<6x1xf32, #tpu.memory_space<vmem>>, vector<6x1xf32>
    %58 = arith.mulf %56, %57 : vector<6x1xf32>
    %c0_33 = arith.constant 0 : index
    %c0_34 = arith.constant 0 : index
    %59 = vector.load %arg3[%c0_33, %c0_34] : memref<6x1xf32, #tpu.memory_space<vmem>>, vector<6x1xf32>
    %60 = arith.mulf %22, %58 : vector<6x1xf32>
    %61 = arith.subf %59, %60 : vector<6x1xf32>
    %c0_35 = arith.constant 0 : index
    %c0_36 = arith.constant 0 : index
    %62 = vector.load %arg4[%c0_35, %c0_36] : memref<24x128xf32, #tpu.memory_space<vmem>>, vector<6x128xf32>
    %63 = vector.broadcast %58 : vector<6x1xf32> to vector<6x128xf32>
    %64 = arith.mulf %62, %63 : vector<6x128xf32>
    %65 = vector.broadcast %61 : vector<6x1xf32> to vector<6x128xf32>
    %66 = arith.addf %64, %65 : vector<6x128xf32>
    %cst_37 = arith.constant 0.000000e+00 : f32
    %67 = vector.broadcast %cst_37 : f32 to vector<6x128xf32>
    %68 = arith.maximumf %66, %67 : vector<6x128xf32>
    %c0_38 = arith.constant 0 : index
    %c0_39 = arith.constant 0 : index
    %69 = vector.load %arg4[%c0_38, %c0_39] : memref<24x128xf32, #tpu.memory_space<vmem>>, vector<6x128xf32>
    tpu.vector_store %arg4[%c0_38, %c0_39], %68 {strides = array<i32>} : memref<24x128xf32, #tpu.memory_space<vmem>>, vector<6x128xf32>,
    %c6_40 = arith.constant 6 : index
    %c0_41 = arith.constant 0 : index
    %70 = vector.load %arg4[%c6_40, %c0_41] : memref<24x128xf32, #tpu.memory_space<vmem>>, vector<6x128xf32>
    %71 = vector.broadcast %58 : vector<6x1xf32> to vector<6x128xf32>
    %72 = arith.mulf %70, %71 : vector<6x128xf32>
    %73 = vector.broadcast %61 : vector<6x1xf32> to vector<6x128xf32>
    %74 = arith.addf %72, %73 : vector<6x128xf32>
    %cst_42 = arith.constant 0.000000e+00 : f32
    %75 = vector.broadcast %cst_42 : f32 to vector<6x128xf32>
    %76 = arith.maximumf %74, %75 : vector<6x128xf32>
    %c6_43 = arith.constant 6 : index
    %c0_44 = arith.constant 0 : index
    %77 = vector.load %arg4[%c6_43, %c0_44] : memref<24x128xf32, #tpu.memory_space<vmem>>, vector<6x128xf32>
    tpu.vector_store %arg4[%c6_43, %c0_44], %76 {strides = array<i32>} : memref<24x128xf32, #tpu.memory_space<vmem>>, vector<6x128xf32>,
    %c12_45 = arith.constant 12 : index
    %c0_46 = arith.constant 0 : index
    %78 = vector.load %arg4[%c12_45, %c0_46] : memref<24x128xf32, #tpu.memory_space<vmem>>, vector<6x128xf32>
    %79 = vector.broadcast %58 : vector<6x1xf32> to vector<6x128xf32>
    %80 = arith.mulf %78, %79 : vector<6x128xf32>
    %81 = vector.broadcast %61 : vector<6x1xf32> to vector<6x128xf32>
    %82 = arith.addf %80, %81 : vector<6x128xf32>
    %cst_47 = arith.constant 0.000000e+00 : f32
    %83 = vector.broadcast %cst_47 : f32 to vector<6x128xf32>
    %84 = arith.maximumf %82, %83 : vector<6x128xf32>
    %c12_48 = arith.constant 12 : index
    %c0_49 = arith.constant 0 : index
    %85 = vector.load %arg4[%c12_48, %c0_49] : memref<24x128xf32, #tpu.memory_space<vmem>>, vector<6x128xf32>
    tpu.vector_store %arg4[%c12_48, %c0_49], %84 {strides = array<i32>} : memref<24x128xf32, #tpu.memory_space<vmem>>, vector<6x128xf32>,
    %c18_50 = arith.constant 18 : index
    %c0_51 = arith.constant 0 : index
    %86 = vector.load %arg4[%c18_50, %c0_51] : memref<24x128xf32, #tpu.memory_space<vmem>>, vector<6x128xf32>
    %87 = vector.broadcast %58 : vector<6x1xf32> to vector<6x128xf32>
    %88 = arith.mulf %86, %87 : vector<6x128xf32>
    %89 = vector.broadcast %61 : vector<6x1xf32> to vector<6x128xf32>
    %90 = arith.addf %88, %89 : vector<6x128xf32>
    %cst_52 = arith.constant 0.000000e+00 : f32
    %91 = vector.broadcast %cst_52 : f32 to vector<6x128xf32>
    %92 = arith.maximumf %90, %91 : vector<6x128xf32>
    %c18_53 = arith.constant 18 : index
    %c0_54 = arith.constant 0 : index
    %93 = vector.load %arg4[%c18_53, %c0_54] : memref<24x128xf32, #tpu.memory_space<vmem>>, vector<6x128xf32>
    tpu.vector_store %arg4[%c18_53, %c0_54], %92 {strides = array<i32>} : memref<24x128xf32, #tpu.memory_space<vmem>>, vector<6x128xf32>,
    return
  }
}

module attributes {stable_mosaic.version = 11 : i64} {
  func.func @_gemm_bn_relu_kernel(%arg0: memref<12x54xbf16, #tpu.memory_space<vmem>>, %arg1: memref<54x512xbf16, #tpu.memory_space<vmem>>, %arg2: memref<3x1xf32, #tpu.memory_space<vmem>>, %arg3: memref<3x1xf32, #tpu.memory_space<vmem>>, %arg4: memref<12x512xf32, #tpu.memory_space<vmem>>) attributes {dimension_semantics = [], scalar_prefetch = 0 : i64, scratch_operands = 0 : i64, tpu.core_type = #tpu.core_type<tc>} {
    %c0 = arith.constant 0 : index
    %c0_0 = arith.constant 0 : index
    %0 = vector.load %arg0[%c0, %c0_0] : memref<12x54xbf16, #tpu.memory_space<vmem>>, vector<12x54xbf16>
    %c0_1 = arith.constant 0 : index
    %c0_2 = arith.constant 0 : index
    %1 = vector.load %arg1[%c0_1, %c0_2] : memref<54x512xbf16, #tpu.memory_space<vmem>>, vector<54x512xbf16>
    %cst = arith.constant dense<0.000000e+00> : vector<12x512xf32>
    %2 = tpu.matmul %0, %1, %cst {dimension_numbers = #tpu.dot_dimension_numbers<[1], [0], [0], [1], [0, 0, 1, 1], [], []>} : vector<12x54xbf16>, vector<54x512xbf16>, vector<12x512xf32> -> vector<12x512xf32>
    %c0_3 = arith.constant 0 : index
    %c0_4 = arith.constant 0 : index
    %3 = vector.load %arg4[%c0_3, %c0_4] : memref<12x512xf32, #tpu.memory_space<vmem>>, vector<12x512xf32>
    tpu.vector_store %arg4[%c0_3, %c0_4], %2 {strides = array<i32>} : memref<12x512xf32, #tpu.memory_space<vmem>>, vector<12x512xf32>,
    %cst_5 = arith.constant 0.000000e+00 : f32
    %4 = vector.broadcast %cst_5 : f32 to vector<3x1xf32>
    %c0_6 = arith.constant 0 : index
    %c0_7 = arith.constant 0 : index
    %5 = vector.load %arg4[%c0_6, %c0_7] : memref<12x512xf32, #tpu.memory_space<vmem>>, vector<3x512xf32>
    %cst_8 = arith.constant dense<0.000000e+00> : vector<3xf32>
    %6 = vector.multi_reduction <add>, %5, %cst_8 [1] : vector<3x512xf32> to vector<3xf32>
    %7 = vector.shape_cast %6 : vector<3xf32> to vector<3x1xf32>
    %8 = arith.addf %4, %7 : vector<3x1xf32>
    %c3 = arith.constant 3 : index
    %c0_9 = arith.constant 0 : index
    %9 = vector.load %arg4[%c3, %c0_9] : memref<12x512xf32, #tpu.memory_space<vmem>>, vector<3x512xf32>
    %cst_10 = arith.constant dense<0.000000e+00> : vector<3xf32>
    %10 = vector.multi_reduction <add>, %9, %cst_10 [1] : vector<3x512xf32> to vector<3xf32>
    %11 = vector.shape_cast %10 : vector<3xf32> to vector<3x1xf32>
    %12 = arith.addf %8, %11 : vector<3x1xf32>
    %c6 = arith.constant 6 : index
    %c0_11 = arith.constant 0 : index
    %13 = vector.load %arg4[%c6, %c0_11] : memref<12x512xf32, #tpu.memory_space<vmem>>, vector<3x512xf32>
    %cst_12 = arith.constant dense<0.000000e+00> : vector<3xf32>
    %14 = vector.multi_reduction <add>, %13, %cst_12 [1] : vector<3x512xf32> to vector<3xf32>
    %15 = vector.shape_cast %14 : vector<3xf32> to vector<3x1xf32>
    %16 = arith.addf %12, %15 : vector<3x1xf32>
    %c9 = arith.constant 9 : index
    %c0_13 = arith.constant 0 : index
    %17 = vector.load %arg4[%c9, %c0_13] : memref<12x512xf32, #tpu.memory_space<vmem>>, vector<3x512xf32>
    %cst_14 = arith.constant dense<0.000000e+00> : vector<3xf32>
    %18 = vector.multi_reduction <add>, %17, %cst_14 [1] : vector<3x512xf32> to vector<3xf32>
    %19 = vector.shape_cast %18 : vector<3xf32> to vector<3x1xf32>
    %20 = arith.addf %16, %19 : vector<3x1xf32>
    %cst_15 = arith.constant 2.048000e+03 : f32
    %21 = vector.broadcast %cst_15 : f32 to vector<3x1xf32>
    %22 = arith.divf %20, %21 : vector<3x1xf32>
    %cst_16 = arith.constant 0.000000e+00 : f32
    %23 = vector.broadcast %cst_16 : f32 to vector<3x1xf32>
    %c0_17 = arith.constant 0 : index
    %c0_18 = arith.constant 0 : index
    %24 = vector.load %arg4[%c0_17, %c0_18] : memref<12x512xf32, #tpu.memory_space<vmem>>, vector<3x512xf32>
    %25 = vector.broadcast %22 : vector<3x1xf32> to vector<3x512xf32>
    %26 = arith.subf %24, %25 : vector<3x512xf32>
    %27 = arith.mulf %26, %26 : vector<3x512xf32>
    %cst_19 = arith.constant dense<0.000000e+00> : vector<3xf32>
    %28 = vector.multi_reduction <add>, %27, %cst_19 [1] : vector<3x512xf32> to vector<3xf32>
    %29 = vector.shape_cast %28 : vector<3xf32> to vector<3x1xf32>
    %30 = arith.addf %23, %29 : vector<3x1xf32>
    %c3_20 = arith.constant 3 : index
    %c0_21 = arith.constant 0 : index
    %31 = vector.load %arg4[%c3_20, %c0_21] : memref<12x512xf32, #tpu.memory_space<vmem>>, vector<3x512xf32>
    %32 = vector.broadcast %22 : vector<3x1xf32> to vector<3x512xf32>
    %33 = arith.subf %31, %32 : vector<3x512xf32>
    %34 = arith.mulf %33, %33 : vector<3x512xf32>
    %cst_22 = arith.constant dense<0.000000e+00> : vector<3xf32>
    %35 = vector.multi_reduction <add>, %34, %cst_22 [1] : vector<3x512xf32> to vector<3xf32>
    %36 = vector.shape_cast %35 : vector<3xf32> to vector<3x1xf32>
    %37 = arith.addf %30, %36 : vector<3x1xf32>
    %c6_23 = arith.constant 6 : index
    %c0_24 = arith.constant 0 : index
    %38 = vector.load %arg4[%c6_23, %c0_24] : memref<12x512xf32, #tpu.memory_space<vmem>>, vector<3x512xf32>
    %39 = vector.broadcast %22 : vector<3x1xf32> to vector<3x512xf32>
    %40 = arith.subf %38, %39 : vector<3x512xf32>
    %41 = arith.mulf %40, %40 : vector<3x512xf32>
    %cst_25 = arith.constant dense<0.000000e+00> : vector<3xf32>
    %42 = vector.multi_reduction <add>, %41, %cst_25 [1] : vector<3x512xf32> to vector<3xf32>
    %43 = vector.shape_cast %42 : vector<3xf32> to vector<3x1xf32>
    %44 = arith.addf %37, %43 : vector<3x1xf32>
    %c9_26 = arith.constant 9 : index
    %c0_27 = arith.constant 0 : index
    %45 = vector.load %arg4[%c9_26, %c0_27] : memref<12x512xf32, #tpu.memory_space<vmem>>, vector<3x512xf32>
    %46 = vector.broadcast %22 : vector<3x1xf32> to vector<3x512xf32>
    %47 = arith.subf %45, %46 : vector<3x512xf32>
    %48 = arith.mulf %47, %47 : vector<3x512xf32>
    %cst_28 = arith.constant dense<0.000000e+00> : vector<3xf32>
    %49 = vector.multi_reduction <add>, %48, %cst_28 [1] : vector<3x512xf32> to vector<3xf32>
    %50 = vector.shape_cast %49 : vector<3xf32> to vector<3x1xf32>
    %51 = arith.addf %44, %50 : vector<3x1xf32>
    %cst_29 = arith.constant 2.048000e+03 : f32
    %52 = vector.broadcast %cst_29 : f32 to vector<3x1xf32>
    %53 = arith.divf %51, %52 : vector<3x1xf32>
    %cst_30 = arith.constant 9.99999974E-6 : f32
    %54 = vector.broadcast %cst_30 : f32 to vector<3x1xf32>
    %55 = arith.addf %53, %54 : vector<3x1xf32>
    %56 = math.rsqrt %55 : vector<3x1xf32>
    %c0_31 = arith.constant 0 : index
    %c0_32 = arith.constant 0 : index
    %57 = vector.load %arg2[%c0_31, %c0_32] : memref<3x1xf32, #tpu.memory_space<vmem>>, vector<3x1xf32>
    %58 = arith.mulf %56, %57 : vector<3x1xf32>
    %c0_33 = arith.constant 0 : index
    %c0_34 = arith.constant 0 : index
    %59 = vector.load %arg3[%c0_33, %c0_34] : memref<3x1xf32, #tpu.memory_space<vmem>>, vector<3x1xf32>
    %60 = arith.mulf %22, %58 : vector<3x1xf32>
    %61 = arith.subf %59, %60 : vector<3x1xf32>
    %c0_35 = arith.constant 0 : index
    %c0_36 = arith.constant 0 : index
    %62 = vector.load %arg4[%c0_35, %c0_36] : memref<12x512xf32, #tpu.memory_space<vmem>>, vector<3x512xf32>
    %63 = vector.broadcast %58 : vector<3x1xf32> to vector<3x512xf32>
    %64 = arith.mulf %62, %63 : vector<3x512xf32>
    %65 = vector.broadcast %61 : vector<3x1xf32> to vector<3x512xf32>
    %66 = arith.addf %64, %65 : vector<3x512xf32>
    %cst_37 = arith.constant 0.000000e+00 : f32
    %67 = vector.broadcast %cst_37 : f32 to vector<3x512xf32>
    %68 = arith.maximumf %66, %67 : vector<3x512xf32>
    %c0_38 = arith.constant 0 : index
    %c0_39 = arith.constant 0 : index
    %69 = vector.load %arg4[%c0_38, %c0_39] : memref<12x512xf32, #tpu.memory_space<vmem>>, vector<3x512xf32>
    tpu.vector_store %arg4[%c0_38, %c0_39], %68 {strides = array<i32>} : memref<12x512xf32, #tpu.memory_space<vmem>>, vector<3x512xf32>,
    %c3_40 = arith.constant 3 : index
    %c0_41 = arith.constant 0 : index
    %70 = vector.load %arg4[%c3_40, %c0_41] : memref<12x512xf32, #tpu.memory_space<vmem>>, vector<3x512xf32>
    %71 = vector.broadcast %58 : vector<3x1xf32> to vector<3x512xf32>
    %72 = arith.mulf %70, %71 : vector<3x512xf32>
    %73 = vector.broadcast %61 : vector<3x1xf32> to vector<3x512xf32>
    %74 = arith.addf %72, %73 : vector<3x512xf32>
    %cst_42 = arith.constant 0.000000e+00 : f32
    %75 = vector.broadcast %cst_42 : f32 to vector<3x512xf32>
    %76 = arith.maximumf %74, %75 : vector<3x512xf32>
    %c3_43 = arith.constant 3 : index
    %c0_44 = arith.constant 0 : index
    %77 = vector.load %arg4[%c3_43, %c0_44] : memref<12x512xf32, #tpu.memory_space<vmem>>, vector<3x512xf32>
    tpu.vector_store %arg4[%c3_43, %c0_44], %76 {strides = array<i32>} : memref<12x512xf32, #tpu.memory_space<vmem>>, vector<3x512xf32>,
    %c6_45 = arith.constant 6 : index
    %c0_46 = arith.constant 0 : index
    %78 = vector.load %arg4[%c6_45, %c0_46] : memref<12x512xf32, #tpu.memory_space<vmem>>, vector<3x512xf32>
    %79 = vector.broadcast %58 : vector<3x1xf32> to vector<3x512xf32>
    %80 = arith.mulf %78, %79 : vector<3x512xf32>
    %81 = vector.broadcast %61 : vector<3x1xf32> to vector<3x512xf32>
    %82 = arith.addf %80, %81 : vector<3x512xf32>
    %cst_47 = arith.constant 0.000000e+00 : f32
    %83 = vector.broadcast %cst_47 : f32 to vector<3x512xf32>
    %84 = arith.maximumf %82, %83 : vector<3x512xf32>
    %c6_48 = arith.constant 6 : index
    %c0_49 = arith.constant 0 : index
    %85 = vector.load %arg4[%c6_48, %c0_49] : memref<12x512xf32, #tpu.memory_space<vmem>>, vector<3x512xf32>
    tpu.vector_store %arg4[%c6_48, %c0_49], %84 {strides = array<i32>} : memref<12x512xf32, #tpu.memory_space<vmem>>, vector<3x512xf32>,
    %c9_50 = arith.constant 9 : index
    %c0_51 = arith.constant 0 : index
    %86 = vector.load %arg4[%c9_50, %c0_51] : memref<12x512xf32, #tpu.memory_space<vmem>>, vector<3x512xf32>
    %87 = vector.broadcast %58 : vector<3x1xf32> to vector<3x512xf32>
    %88 = arith.mulf %86, %87 : vector<3x512xf32>
    %89 = vector.broadcast %61 : vector<3x1xf32> to vector<3x512xf32>
    %90 = arith.addf %88, %89 : vector<3x512xf32>
    %cst_52 = arith.constant 0.000000e+00 : f32
    %91 = vector.broadcast %cst_52 : f32 to vector<3x512xf32>
    %92 = arith.maximumf %90, %91 : vector<3x512xf32>
    %c9_53 = arith.constant 9 : index
    %c0_54 = arith.constant 0 : index
    %93 = vector.load %arg4[%c9_53, %c0_54] : memref<12x512xf32, #tpu.memory_space<vmem>>, vector<3x512xf32>
    tpu.vector_store %arg4[%c9_53, %c0_54], %92 {strides = array<i32>} : memref<12x512xf32, #tpu.memory_space<vmem>>, vector<3x512xf32>,
    return
  }
}

module attributes {stable_mosaic.version = 11 : i64} {
  func.func @_gemm_tanh_kernel(%arg0: i32, %arg1: memref<12x27xbf16, #tpu.memory_space<vmem>>, %arg2: memref<27x512xbf16, #tpu.memory_space<vmem>>, %arg3: memref<12x512xf32, #tpu.memory_space<vmem>>) attributes {dimension_semantics = [#tpu.dimension_semantics<parallel>], iteration_bounds = array<i64: 4>, scalar_prefetch = 0 : i64, scratch_operands = 0 : i64, tpu.core_type = #tpu.core_type<tc>, window_params = [{pipeline_mode = #tpu.pipeline_mode<synchronous>, transform_indices = @transform_0, window_bounds = array<i64: 12, 27>}, {transform_indices = @transform_1, window_bounds = array<i64: 27, 512>}, {transform_indices = @transform_2, window_bounds = array<i64: 12, 512>}]} {
    %c0 = arith.constant 0 : index
    %c0_0 = arith.constant 0 : index
    %0 = vector.load %arg1[%c0, %c0_0] : memref<12x27xbf16, #tpu.memory_space<vmem>>, vector<12x27xbf16>
    %c0_1 = arith.constant 0 : index
    %c0_2 = arith.constant 0 : index
    %1 = vector.load %arg2[%c0_1, %c0_2] : memref<27x512xbf16, #tpu.memory_space<vmem>>, vector<27x512xbf16>
    %cst = arith.constant dense<0.000000e+00> : vector<12x512xf32>
    %2 = tpu.matmul %0, %1, %cst {dimension_numbers = #tpu.dot_dimension_numbers<[1], [0], [0], [1], [0, 0, 1, 1], [], []>} : vector<12x27xbf16>, vector<27x512xbf16>, vector<12x512xf32> -> vector<12x512xf32>
    %3 = math.tanh %2 : vector<12x512xf32>
    %c0_3 = arith.constant 0 : index
    %c0_4 = arith.constant 0 : index
    %4 = vector.load %arg3[%c0_3, %c0_4] : memref<12x512xf32, #tpu.memory_space<vmem>>, vector<12x512xf32>
    tpu.vector_store %arg3[%c0_3, %c0_4], %3 {strides = array<i32>} : memref<12x512xf32, #tpu.memory_space<vmem>>, vector<12x512xf32>,
    return
  }
  func.func @transform_0(%arg0: i32) -> (i32, i32) {
    %c0_i32 = arith.constant 0 : i32
    %c0_i32_0 = arith.constant 0 : i32
    %c0_i32_1 = arith.constant 0 : i32
    return %c0_i32, %c0_i32_0 : i32, i32
  }
  func.func @transform_1(%arg0: i32) -> (i32, i32) {
    %c0_i32 = arith.constant 0 : i32
    %c0_i32_0 = arith.constant 0 : i32
    return %c0_i32, %arg0 : i32, i32
  }
  func.func @transform_2(%arg0: i32) -> (i32, i32) {
    %c0_i32 = arith.constant 0 : i32
    %c0_i32_0 = arith.constant 0 : i32
    return %c0_i32, %arg0 : i32, i32
  }
}

</mosaic_0001>

<bundles_post_ra>
// kernel: generator_forward.6
= control target key start
LH: loop header
LB: loop body
LE: loop exit
PB: predicated region body
PF: predicated region fallthrough
CT: control target
= control target key end

     0   :  { %9 = vsyncpa [#allocation3], 0  ;;  %s530_s15 = smov [#allocation2]   ;;  %s795_s0 = inlined_call_operand.hbm [shape: bf16[48,216], index: 0, kind: input, shape index: {}]   ;;  %s796_s1 = inlined_call_operand.vmem [shape: bf16[216,32], index: 1, kind: input, shape index: {}]   ;;  %s797_s2 = inlined_call_operand.vmem [shape: f32[12,1], index: 2, kind: input, shape index: {}]   ;;  %s798_s3 = inlined_call_operand.vmem [shape: f32[12,1], index: 3, kind: input, shape index: {}]   ;;  %s799_s4 = inlined_call_operand.vmem [shape: f32[48,32], index: 4, kind: output, shape index: {}]  }
   0x1   :  { %s15_s16 = sshll.u32 %s530_s15, 4  ;;  %s506_s19 = scalar_lea.hbm %s795_s0, 768  ;;  %s16_s16 = int_to_ptr.vmem [resolvable:$true] %s15_s16 }
   0x2   :  { %p507_p0 = scmp.ne.s32.totalorder %s795_s0, %s506_s19  ;;  %p510_p1 = scmp.lt.u32.totalorder %s506_s19, %s795_s0 }
   0x4   :  { %p512_p2 = pnand %p510_p1, %p507_p0 }
   0x6   :  { %515 = shalt.err (!%p512_p2)
}
   0x7   :  { %s516_s24 = scalar_lea.vmem %s16_s16, 768  ;;  %p521_p4 = scmp.lt.s32.totalorder %s16_s16, %s16_s16 }
   0x8   :  { %p517_p3 = scmp.ne.s32.totalorder %s16_s16, %s516_s24  ;;  %p522_p5 = scmp.lt.s32.totalorder %s516_s24, %s516_s24 }
   0xa   :  { %p523_p6 = por %p522_p5, %p521_p4 }
   0xc   :  { %p524_p7 = pnand %p523_p6, %p517_p3 }
   0xe   :  { %527 = shalt.err (!%p524_p7)
}
   0xf   :  { %s531_s25 = smov 128   ;;  %s532_s26 = smov 8  }
  0x10   :  { %21 = dma.hbm_to_vmem [thread:$0]  %s795_s0, 768, %s16_s16, [#allocation3], %s531_s25, %s531_s25, %s532_s26  }
  0x11   :  { %528 = dma.done.wait [#allocation3], 768  }
  0x12   :  { %529 = vsyncadd [#allocation3], 4294966528  ;;  %v533_v0 = vmov 0   ;;  %v479_v1 = vld [vmem:[%s796_s1] sm:$0xff]   ;;  %v480_v2 = vld [vmem:[%s796_s1 + $0x8] sm:$0xff]   ;;  %vm173_vm0 = vcmask 719872  }
  0x13   :  { %187 = vmatprep.subr.bf16.mxu0 %v533_v0  ;;  %445 = vmatprep.subr.bf16.mxu1 %v533_v0  ;;  %v481_v3 = vld [vmem:[%s796_s1 + $0x10] sm:$0xff]   ;;  %v482_v4 = vld [vmem:[%s796_s1 + $0x18] sm:$0xff]   ;;  %v483_v5 = vld [vmem:[%s796_s1 + $0x20] sm:$0xff]   ;;  %vm183_vm1 = vcmask 1043456   ;;  %vm244_vm2 = vcmask 261120   ;;  %vm256_vm3 = vcmask 257024  }
  0x14   :  { %478 = vset.pattern.permute.xlu1 %v533_v0  ;;  %477 = vset.pattern.permute.xlu0 %v533_v0  ;;  %v495_v6 = vld [vmem:[#allocation2 + $0x4] ss:$8 sps:$4 sm:$0xff]   ;;  %v498_v7 = vld [vmem:[#allocation2 + $0x14] ss:$8 sps:$4 sm:$0xff]   ;;  %v492_v16 = vld [vmem:[%s796_s1 + $0x68] ss:$0 sps:$4 sm:$0xff]  }
  0x15   :  { %188 = vmatpush1.bf16.msra.mxu0 %v479_v1  ;;  %459 = vmatpush1.bf16.msra.mxu1 %v479_v1  ;;  %v484_v8 = vld [vmem:[%s796_s1 + $0x28] sm:$0xff]   ;;  %v485_v9 = vld [vmem:[%s796_s1 + $0x30] sm:$0xff]   ;;  %v486_v10 = vld [vmem:[%s796_s1 + $0x38] sm:$0xff]   ;;  %v185_v17 = vsel %vm183_vm1, %v492_v16, 0 }
  0x16   :  { %189 = vmatprep.subr.bf16.mxu0 %v533_v0  ;;  %446 = vmatprep.subr.bf16.mxu1 %v533_v0  ;;  %v487_v11 = vld [vmem:[%s796_s1 + $0x40] sm:$0xff]   ;;  %v488_v12 = vld [vmem:[%s796_s1 + $0x48] sm:$0xff]   ;;  %v489_v13 = vld [vmem:[%s796_s1 + $0x50] sm:$0xff]  }
  0x17   :  { %442 = vmatprep.mubr.msk.bf16.mxu0 %vm173_vm0, %v495_v6  ;;  %443 = vmatprep.mubr.msk.bf16.mxu1 %vm173_vm0, %v498_v7  ;;  %v490_v14 = vld [vmem:[%s796_s1 + $0x58] sm:$0xff]   ;;  %v491_v15 = vld [vmem:[%s796_s1 + $0x60] sm:$0xff]  }
  0x18   :  { %v493_v18 = vld [vmem:[#allocation2] ss:$8 sps:$4 sm:$0xff]   ;;  %v496_v19 = vld [vmem:[#allocation2 + $0x10] ss:$8 sps:$4 sm:$0xff]   ;;  %v499_v20 = vld [vmem:[#allocation2 + $0x24] ss:$8 sps:$4 sm:$0xff]  }
  0x19   :  { %190 = vmatpush1.bf16.msra.mxu0 %v480_v2  ;;  %460 = vmatpush1.bf16.msra.mxu1 %v480_v2  ;;  %v501_v21 = vld [vmem:[#allocation2 + $0x20] ss:$8 sps:$4 sm:$0xff]  }
  0x1a   :  { %191 = vmatprep.subr.bf16.mxu0 %v533_v0  ;;  %447 = vmatprep.subr.bf16.mxu1 %v533_v0 }
  0x1d   :  { %192 = vmatpush1.bf16.msra.mxu0 %v481_v3  ;;  %461 = vmatpush1.bf16.msra.mxu1 %v481_v3 }
  0x1e   :  { %193 = vmatprep.subr.bf16.mxu0 %v533_v0  ;;  %448 = vmatprep.subr.bf16.mxu1 %v533_v0 }
  0x21   :  { %194 = vmatpush1.bf16.msra.mxu0 %v482_v4  ;;  %462 = vmatpush1.bf16.msra.mxu1 %v482_v4 }
  0x22   :  { %195 = vmatprep.subr.bf16.mxu0 %v533_v0  ;;  %449 = vmatprep.subr.bf16.mxu1 %v533_v0 }
  0x25   :  { %196 = vmatpush1.bf16.msra.mxu0 %v483_v5  ;;  %463 = vmatpush1.bf16.msra.mxu1 %v483_v5 }
  0x26   :  { %197 = vmatprep.subr.bf16.mxu0 %v533_v0  ;;  %450 = vmatprep.subr.bf16.mxu1 %v533_v0 }
  0x29   :  { %198 = vmatpush1.bf16.msra.mxu0 %v484_v8  ;;  %464 = vmatpush1.bf16.msra.mxu1 %v484_v8 }
  0x2a   :  { %199 = vmatprep.subr.bf16.mxu0 %v533_v0  ;;  %451 = vmatprep.subr.bf16.mxu1 %v533_v0 }
  0x2d   :  { %200 = vmatpush1.bf16.msra.mxu0 %v485_v9  ;;  %465 = vmatpush1.bf16.msra.mxu1 %v485_v9 }
  0x2e   :  { %201 = vmatprep.subr.bf16.mxu0 %v533_v0  ;;  %452 = vmatprep.subr.bf16.mxu1 %v533_v0 }
  0x31   :  { %202 = vmatpush1.bf16.msra.mxu0 %v486_v10  ;;  %466 = vmatpush1.bf16.msra.mxu1 %v486_v10 }
  0x32   :  { %203 = vmatprep.subr.bf16.mxu0 %v533_v0  ;;  %453 = vmatprep.subr.bf16.mxu1 %v533_v0 }
  0x35   :  { %204 = vmatpush1.bf16.msra.mxu0 %v487_v11  ;;  %467 = vmatpush1.bf16.msra.mxu1 %v487_v11 }
  0x36   :  { %205 = vmatprep.subr.bf16.mxu0 %v533_v0  ;;  %454 = vmatprep.subr.bf16.mxu1 %v533_v0 }
  0x39   :  { %206 = vmatpush1.bf16.msra.mxu0 %v488_v12  ;;  %468 = vmatpush1.bf16.msra.mxu1 %v488_v12 }
  0x3a   :  { %207 = vmatprep.subr.bf16.mxu0 %v533_v0  ;;  %455 = vmatprep.subr.bf16.mxu1 %v533_v0 }
  0x3d   :  { %208 = vmatpush1.bf16.msra.mxu0 %v489_v13  ;;  %469 = vmatpush1.bf16.msra.mxu1 %v489_v13 }
  0x3e   :  { %209 = vmatprep.subr.bf16.mxu0 %v533_v0  ;;  %456 = vmatprep.subr.bf16.mxu1 %v533_v0 }
  0x41   :  { %210 = vmatpush1.bf16.msra.mxu0 %v490_v14  ;;  %470 = vmatpush1.bf16.msra.mxu1 %v490_v14 }
  0x42   :  { %211 = vmatprep.subr.bf16.mxu0 %v533_v0  ;;  %457 = vmatprep.subr.bf16.mxu1 %v533_v0 }
  0x45   :  { %212 = vmatpush1.bf16.msra.mxu0 %v491_v15  ;;  %471 = vmatpush1.bf16.msra.mxu1 %v491_v15 }
  0x46   :  { %213 = vmatprep.subr.bf16.mxu0 %v533_v0  ;;  %458 = vmatprep.subr.bf16.mxu1 %v533_v0 }
  0x49   :  { %214 = vmatpush1.bf16.msra.mxu0 %v185_v17  ;;  %472 = vmatpush1.bf16.msra.mxu1 %v185_v17 }
  0x4c   :  { %220 = vmatmul.mubr.bf16.vlgmr.msra.gmra.mrb[0].mxu0 %v493_v18  ;;  %228 = vmatmul.mubr.bf16.vlgmr.msra.gmra.mrb[0].mxu1 %v496_v19 }
  0x4d   :  { %444 = vmatprep.mubr.msk.bf16.mxu1 %vm173_vm0, %v499_v20 }
  0x54   :  { %236 = vmatmul.mubr.bf16.gmra.mrb[4].mxu1 %v501_v21 }
 0x11f   :  { %v221_v22 = vpop.f32.mrb[0].mxu0  ;;  %v229_v23 = vpop.f32.mrb[0].mxu1 }
 0x120   :  { %245 = vst.msk [vmem:[%s799_s4] sm:$0xff] %vm244_vm2, %v221_v22  ;;  %247 = vst.msk [vmem:[%s799_s4 + $0x10] sm:$0xff] %vm244_vm2, %v229_v23  ;;  %v223_v24 = vpop.f32.mrb[1].mxu0  ;;  %v231_v25 = vpop.f32.mrb[1].mxu1 }
 0x121   :  { %v224_v26 = vpop.f32.mrb[2].mxu0  ;;  %v232_v27 = vpop.f32.mrb[2].mxu1 }
 0x122   :  { %246 = vst.msk [vmem:[%s799_s4 + $0x8] sm:$0xff] %vm244_vm2, %v224_v26  ;;  %248 = vst.msk [vmem:[%s799_s4 + $0x18] sm:$0xff] %vm244_vm2, %v232_v27  ;;  %v226_v28 = vpop.f32.mrb[3].mxu0  ;;  %v234_v29 = vpop.f32.mrb[3].mxu1 }
 0x127   :  { %v237_v30 = vpop.f32.mrb[4].mxu1  ;;  %v263_v31 = vld [vmem:[%s799_s4 + $0x14] sm:$0xf]  ;;  %v668_v32 = vld [vmem:[%s799_s4] sm:$0xff] }
 0x128   :  { %249 = vst.msk [vmem:[%s799_s4 + $0x20] sm:$0xff] %vm244_vm2, %v237_v30  ;;  %v239_v33 = vpop.f32.mrb[5].mxu1  ;;  %v267_v34 = vsel %vm256_vm3, %v263_v31, 0.0  ;;  %v253_v35 = vsel %vm244_vm2, %v668_v32, 0.0 }
 0x129   :  { %268 = vadd.xlane.f32.xlu1 %v267_v34  ;;  %v240_v36 = vpop.f32.mrb[6].mxu1  ;;  %254 = vadd.xlane.f32.xlu0 %v253_v35  ;;  %v680_v37 = vld [vmem:[%s799_s4 + $0xc] sm:$0xff]  ;;  %v685_v38 = vld [vmem:[%s799_s4 + $0x8] sm:$0xf]  ;;  %v698_v42 = vld [vmem:[%s799_s4 + $0x18] sm:$0xff] }
 0x12a   :  { %250 = vst.msk [vmem:[%s799_s4 + $0x28] sm:$0xff] %vm244_vm2, %v240_v36  ;;  %v242_v39 = vpop.f32.mrb[7].mxu1  ;;  %v264_v40 = vsel %vm244_vm2, %v680_v37, 0.0  ;;  %v257_v41 = vsel %vm256_vm3, %v685_v38, 0.0  ;;  %v274_v45 = vsel %vm244_vm2, %v698_v42, 0.0 }
 0x12d   :  { %265 = vadd.xlane.f32.xlu1 %v264_v40  ;;  %258 = vadd.xlane.f32.xlu0 %v257_v41 }
 0x12f   :  { %v273_v43 = vld [vmem:[%s799_s4 + $0x20] sm:$0xf] }
 0x130   :  { %v277_v44 = vsel %vm256_vm3, %v273_v43, 0.0 }
 0x131   :  { %278 = vadd.xlane.f32.xlu1 %v277_v44  ;;  %275 = vadd.xlane.f32.xlu0 %v274_v45  ;;  %v283_v46 = vld [vmem:[%s799_s4 + $0x2c] sm:$0xf]  ;;  %v712_v47 = vld [vmem:[%s799_s4 + $0x24] sm:$0xff] }
 0x132   :  { %v287_v48 = vsel %vm256_vm3, %v283_v46, 0.0  ;;  %v284_v49 = vsel %vm244_vm2, %v712_v47, 0.0 }
 0x135   :  { %288 = vadd.xlane.f32.xlu1 %v287_v48  ;;  %285 = vadd.xlane.f32.xlu0 %v284_v49  ;;  %v350_v49 = vld [vmem:[%s797_s2 + $0x8] sm:$0xf] }
 0x1b6   :  { %v269_v50 = vpop.xlane.xlu1 %268  ;;  %v255_v51 = vpop.xlane.xlu0 %254 }
 0x1ba   :  { %v266_v52 = vpop.xlane.xlu1 %265  ;;  %v259_v53 = vpop.xlane.xlu0 %258 }
 0x1bb   :  { %v270_v56 = vadd.f32 %v266_v52, %v255_v51  ;;  %v271_v57 = vadd.f32 %v269_v50, %v259_v53  ;;  %v349_v50 = vld [vmem:[%s797_s2] sm:$0xff] }
 0x1be   :  { %v279_v54 = vpop.xlane.xlu1 %278  ;;  %v276_v55 = vpop.xlane.xlu0 %275 }
 0x1bf   :  { %v281_v58 = vadd.f32 %v279_v54, %v271_v57  ;;  %v280_v59 = vadd.f32 %v276_v55, %v270_v56  ;;  %v353_v55 = vld [vmem:[%s798_s3] sm:$0xff] }
 0x1c2   :  { %v289_v60 = vpop.xlane.xlu1 %288  ;;  %v286_v61 = vpop.xlane.xlu0 %285 }
 0x1c3   :  { %v291_v62 = vadd.f32 %v289_v60, %v281_v58  ;;  %v290_v63 = vadd.f32 %v286_v61, %v280_v59  ;;  %v354_v59 = vld [vmem:[%s798_s3 + $0x8] sm:$0xf] }
 0x1c5   :  { %v717_v0 = vmul.f32 0.0078125, %v291_v62  ;;  %v293_v1 = vmul.f32 0.0078125, %v290_v63 }
 0x1c7   :  { %v296_v2 = vsub.f32 %v685_v38, %v717_v0  ;;  %v295_v3 = vsub.f32 %v668_v32, %v293_v1  ;;  %v308_v4 = vsub.f32 %v263_v31, %v717_v0  ;;  %v307_v5 = vsub.f32 %v680_v37, %v293_v1 }
 0x1c8   :  { %v320_v8 = vsub.f32 %v273_v43, %v717_v0  ;;  %v319_v9 = vsub.f32 %v698_v42, %v293_v1  ;;  %v332_v14 = vsub.f32 %v283_v46, %v717_v0  ;;  %v331_v15 = vsub.f32 %v712_v47, %v293_v1 }
 0x1c9   :  { %v298_v6 = vmul.f32 %v296_v2, %v296_v2  ;;  %v297_v7 = vmul.f32 %v295_v3, %v295_v3  ;;  %v310_v12 = vmul.f32 %v308_v4, %v308_v4  ;;  %v309_v13 = vmul.f32 %v307_v5, %v307_v5 }
 0x1ca   :  { %v322_v18 = vmul.f32 %v320_v8, %v320_v8  ;;  %v321_v19 = vmul.f32 %v319_v9, %v319_v9  ;;  %v334_v22 = vmul.f32 %v332_v14, %v332_v14  ;;  %v333_v23 = vmul.f32 %v331_v15, %v331_v15  ;;  %v388_v8 = vld [vmem:[%s799_s4 + $0x14] sm:$0xf]  ;;  %v398_v9 = vld [vmem:[%s799_s4 + $0x20] sm:$0xf] }
 0x1cb   :  { %v302_v10 = vsel %vm256_vm3, %v298_v6, 0.0  ;;  %v299_v11 = vsel %vm244_vm2, %v297_v7, 0.0  ;;  %v314_v16 = vsel %vm256_vm3, %v310_v12, 0.0  ;;  %v311_v17 = vsel %vm244_vm2, %v309_v13, 0.0 }
 0x1cc   :  { %303 = vadd.xlane.f32.xlu1 %v302_v10  ;;  %300 = vadd.xlane.f32.xlu0 %v299_v11  ;;  %v326_v20 = vsel %vm256_vm3, %v322_v18, 0.0  ;;  %v323_v21 = vsel %vm244_vm2, %v321_v19, 0.0  ;;  %v338_v24 = vsel %vm256_vm3, %v334_v22, 0.0  ;;  %v335_v25 = vsel %vm244_vm2, %v333_v23, 0.0 }
 0x1d0   :  { %315 = vadd.xlane.f32.xlu1 %v314_v16  ;;  %312 = vadd.xlane.f32.xlu0 %v311_v17 }
 0x1d4   :  { %327 = vadd.xlane.f32.xlu1 %v326_v20  ;;  %324 = vadd.xlane.f32.xlu0 %v323_v21 }
 0x1d8   :  { %339 = vadd.xlane.f32.xlu1 %v338_v24  ;;  %336 = vadd.xlane.f32.xlu0 %v335_v25 }
 0x259   :  { %v304_v26 = vpop.xlane.xlu1 %303  ;;  %v301_v27 = vpop.xlane.xlu0 %300 }
 0x25d   :  { %v316_v28 = vpop.xlane.xlu1 %315  ;;  %v313_v29 = vpop.xlane.xlu0 %312 }
 0x25e   :  { %v318_v33 = vadd.f32 %v316_v28, %v304_v26  ;;  %v317_v34 = vadd.f32 %v313_v29, %v301_v27 }
 0x261   :  { %v328_v30 = vpop.xlane.xlu1 %327  ;;  %v325_v31 = vpop.xlane.xlu0 %324 }
 0x262   :  { %v330_v35 = vadd.f32 %v328_v30, %v318_v33  ;;  %v329_v36 = vadd.f32 %v325_v31, %v317_v34 }
 0x265   :  { %v340_v39 = vpop.xlane.xlu1 %339  ;;  %v337_v40 = vpop.xlane.xlu0 %336 }
 0x266   :  { %v342_v41 = vadd.f32 %v340_v39, %v330_v35  ;;  %v341_v43 = vadd.f32 %v337_v40, %v329_v36 }
 0x268   :  { %v344_v44 = vmul.f32 0.0078125, %v342_v41  ;;  %v343_v45 = vmul.f32 0.0078125, %v341_v43 }
 0x26a   :  { %v346_v46 = vadd.f32 1e-05, %v344_v44  ;;  %v345_v48 = vadd.f32 1e-05, %v343_v45 }
 0x26c   :  { %502 = vrsqrt.f32 %v346_v46 }
 0x26d   :  { %504 = vrsqrt.f32 %v345_v48 }
 0x276   :  { %v503_v51 = vpop.eup %502 }
 0x277   :  { %v505_v52 = vpop.eup %504  ;;  %v352_v53 = vmul.f32 %v503_v51, %v350_v49 }
 0x278   :  { %v351_v54 = vmul.f32 %v505_v52, %v349_v50 }
 0x279   :  { %366 = vperm.xlu1 %478, %v352_v53   ;;  %v356_v58 = vmul.f32 %v352_v53, %v717_v0 }
 0x27a   :  { %361 = vperm.xlu0 %477, %v351_v54   ;;  %v355_v56 = vmul.f32 %v351_v54, %v293_v1 }
 0x27b   :  { %v358_v60 = vsub.f32 %v354_v59, %v356_v58 }
 0x27c   :  { %v357_v57 = vsub.f32 %v353_v55, %v355_v56 }
 0x27e   :  { %373 = vperm.xlu1 %478, %v357_v57  }
 0x282   :  { %378 = vperm.xlu1 %478, %v358_v60  }
 0x2f8   :  { %v367_v61 = vpop.permute.xlu1 %366 }
 0x2f9   :  { %v362_v62 = vpop.permute.xlu0 %361 }
 0x2fa   :  { %v369_v63 = vmul.f32 %v362_v62, %v668_v32  ;;  %v389_v2 = vmul.f32 %v362_v62, %v680_v37  ;;  %v399_v3 = vmul.f32 %v362_v62, %v698_v42  ;;  %v409_v1 = vmul.f32 %v362_v62, %v712_v47  ;;  %v408_v32 = vld [vmem:[%s799_s4 + $0x2c] sm:$0xf] }
 0x2fb   :  { %v370_v37 = vmul.f32 %v367_v61, %v685_v38  ;;  %v390_v42 = vmul.f32 %v388_v8, %v367_v61  ;;  %v400_v47 = vmul.f32 %v398_v9, %v367_v61  ;;  %v410_v10 = vmul.f32 %v408_v32, %v367_v61 }
 0x2fd   :  { %v374_v4 = vpop.permute.xlu1 %373 }
 0x2fe   :  { %v381_v5 = vadd.f32 %v374_v4, %v369_v63  ;;  %v391_v0 = vadd.f32 %v389_v2, %v374_v4  ;;  %v401_v6 = vadd.f32 %v399_v3, %v374_v4  ;;  %v411_v7 = vadd.f32 %v409_v1, %v374_v4 }
 0x300   :  { %v383_v11 = vmax.f32 %v381_v5, 0.0  ;;  %v393_v12 = vmax.f32 %v391_v0, 0.0  ;;  %v403_v13 = vmax.f32 %v401_v6, 0.0  ;;  %v413_v14 = vmax.f32 %v411_v7, 0.0 }
 0x301   :  { %v379_v15 = vpop.permute.xlu1 %378 }
 0x302   :  { %385 = vst.msk [vmem:[%s799_s4] sm:$0xff] %vm244_vm2, %v383_v11  ;;  %395 = vst.msk [vmem:[%s799_s4 + $0xc] sm:$0xff] %vm244_vm2, %v393_v12  ;;  %v382_v38 = vadd.f32 %v379_v15, %v370_v37  ;;  %v392_v16 = vadd.f32 %v390_v42, %v379_v15  ;;  %v402_v17 = vadd.f32 %v400_v47, %v379_v15 }
 0x303   :  { %405 = vst.msk [vmem:[%s799_s4 + $0x18] sm:$0xff] %vm244_vm2, %v403_v13  ;;  %415 = vst.msk [vmem:[%s799_s4 + $0x24] sm:$0xff] %vm244_vm2, %v413_v14  ;;  %v412_v18 = vadd.f32 %v410_v10, %v379_v15 }
 0x304   :  { %v384_v19 = vmax.f32 %v382_v38, 0.0  ;;  %v394_v20 = vmax.f32 %v392_v16, 0.0  ;;  %v404_v21 = vmax.f32 %v402_v17, 0.0 }
 0x305   :  { %v414_v22 = vmax.f32 %v412_v18, 0.0 }
 0x306   :  { %386 = vst.msk [vmem:[%s799_s4 + $0x8] sm:$0xf] %vm256_vm3, %v384_v19  ;;  %396 = vst.msk [vmem:[%s799_s4 + $0x14] sm:$0xf] %vm256_vm3, %v394_v20 }
 0x307   :  { %406 = vst.msk [vmem:[%s799_s4 + $0x20] sm:$0xf] %vm256_vm3, %v404_v21  ;;  %416 = vst.msk [vmem:[%s799_s4 + $0x2c] sm:$0xf] %vm256_vm3, %v414_v22 }
 0x308   :  { %421 = vsyncpa [#allocation3], 1 }

// kernel: generator_forward.5
= control target key start
LH: loop header
LB: loop body
LE: loop exit
PB: predicated region body
PF: predicated region fallthrough
CT: control target
= control target key end

     0   :  { %vm260_vm0 = vcmask 1040384   ;;  %vm261_vm1 = vcmask 1041408   ;;  %vm187_vm2 = vcmask 23552   ;;  %v1551_v1 = vmov 65535   ;;  %s2763_s1 = inlined_call_operand.vmem [shape: bf16[3,2], index: 1, kind: input, shape index: {}]   ;;  %s2764_s0 = inlined_call_operand.vmem [shape: bf16[384,3], index: 0, kind: input, shape index: {}]   ;;  %s2765_s4 = inlined_call_operand.vmem [shape: f32[384,2], index: 4, kind: output, shape index: {}]   ;;  %s2766_s2 = inlined_call_operand.vmem [shape: f32[24,1], index: 2, kind: input, shape index: {}]   ;;  %s2767_s3 = inlined_call_operand.vmem [shape: f32[24,1], index: 3, kind: input, shape index: {}]  }
   0x1   :  { %v66_v0 = vld [vmem:[%s2763_s1] sm:$0x3]  ;;  %v262_v2 = vsel %vm260_vm0, 4294967295, %v1551_v1  ;;  %v1499_v7 = vld [vmem:[%s2764_s0 + $0x8] sm:$0xff]   ;;  %v1501_v9 = vld [vmem:[%s2764_s0 + $0x10] sm:$0xff]   ;;  %vm492_vm3 = vcmask 15360  }
   0x2   :  { %v1497_v3 = vld [vmem:[%s2764_s0] sm:$0xff]   ;;  %v263_v4 = vsel %vm261_vm1, %v262_v2, 0  ;;  %v1500_v8 = vld [vmem:[%s2764_s0 + $0x68] sm:$0xff]   ;;  %v1503_v10 = vld [vmem:[%s2764_s0 + $0x70] sm:$0xff]  }
   0x3   :  { %v1498_v5 = vld [vmem:[%s2764_s0 + $0x60] sm:$0xff]   ;;  %v265_v6 = vand.u32 %v263_v4, %v66_v0  ;;  %1443 = vmatprep.mubr.msk.bf16.mxu0 %vm187_vm2, %v1497_v3  ;;  %v1502_v11 = vld [vmem:[%s2764_s0 + $0x18] sm:$0xff]   ;;  %v1506_v15 = vld [vmem:[%s2764_s0 + $0x28] sm:$0xff]  }
   0x4   :  { %1467 = vmatprep.mubr.msk.bf16.mxu1 %vm187_vm2, %v1498_v5  ;;  %v1504_v12 = vld [vmem:[%s2764_s0 + $0x78] sm:$0xff]   ;;  %v1505_v13 = vld [vmem:[%s2764_s0 + $0x20] sm:$0xff]   ;;  %v1508_v16 = vld [vmem:[%s2764_s0 + $0x88] sm:$0xff]  }
   0x5   :  { %1441 = vmatprep.subr.bf16.mxu0 %v265_v6  ;;  %1491 = vmatprep.subr.bf16.mxu1 %v265_v6  ;;  %v1507_v14 = vld [vmem:[%s2764_s0 + $0x80] sm:$0xff]   ;;  %v1509_v17 = vld [vmem:[%s2764_s0 + $0x30] sm:$0xff]   ;;  %v1510_v19 = vld [vmem:[%s2764_s0 + $0x38] sm:$0xff]  }
   0x6   :  { %1442 = vmatpush3.bf16.msra.mxu0 %v265_v6  ;;  %1492 = vmatpush3.bf16.msra.mxu1 %v265_v6  ;;  %v1511_v18 = vld [vmem:[%s2764_s0 + $0x90] sm:$0xff]   ;;  %v1512_v20 = vld [vmem:[%s2764_s0 + $0x98] sm:$0xff]   ;;  %v1513_v21 = vld [vmem:[%s2764_s0 + $0x40] sm:$0xff]  }
   0x7   :  { %v1517_v22 = vld [vmem:[%s2764_s0 + $0xa0] sm:$0xff]   ;;  %v1514_v23 = vld [vmem:[%s2764_s0 + $0x48] sm:$0xff]   ;;  %v1515_v25 = vld [vmem:[%s2764_s0 + $0x50] sm:$0xff]  }
   0x8   :  { %v1518_v24 = vld [vmem:[%s2764_s0 + $0xa8] sm:$0xff]   ;;  %v1519_v26 = vld [vmem:[%s2764_s0 + $0xb0] sm:$0xff]   ;;  %v1516_v27 = vld [vmem:[%s2764_s0 + $0x58] sm:$0xff]  }
   0x9   :  { %1444 = vmatmul.mubr.msk.bf16.vlgmr.msra.gmra.mrb[0].mxu0 %vm187_vm2, %v1499_v7  ;;  %1468 = vmatmul.mubr.msk.bf16.vlgmr.msra.gmra.mrb[0].mxu1 %vm187_vm2, %v1500_v8  ;;  %v1520_v28 = vld [vmem:[%s2764_s0 + $0xb8] sm:$0xff]  }
   0xa   :  { %1447 = vmatprep.mubr.msk.bf16.mxu0 %vm187_vm2, %v1501_v9  ;;  %1471 = vmatprep.mubr.msk.bf16.mxu1 %vm187_vm2, %v1503_v10 }
  0x11   :  { %1448 = vmatmul.mubr.msk.bf16.gmra.mrb[4].mxu0 %vm187_vm2, %v1502_v11  ;;  %1472 = vmatmul.mubr.msk.bf16.gmra.mrb[4].mxu1 %vm187_vm2, %v1504_v12 }
  0x12   :  { %1451 = vmatprep.mubr.msk.bf16.mxu0 %vm187_vm2, %v1505_v13  ;;  %1475 = vmatprep.mubr.msk.bf16.mxu1 %vm187_vm2, %v1507_v14 }
  0x19   :  { %1452 = vmatmul.mubr.msk.bf16.gmra.mrb[8].mxu0 %vm187_vm2, %v1506_v15  ;;  %1476 = vmatmul.mubr.msk.bf16.gmra.mrb[8].mxu1 %vm187_vm2, %v1508_v16 }
  0x1a   :  { %1455 = vmatprep.mubr.msk.bf16.mxu0 %vm187_vm2, %v1509_v17  ;;  %1479 = vmatprep.mubr.msk.bf16.mxu1 %vm187_vm2, %v1511_v18 }
  0x21   :  { %1456 = vmatmul.mubr.msk.bf16.gmra.mrb[12].mxu0 %vm187_vm2, %v1510_v19  ;;  %1480 = vmatmul.mubr.msk.bf16.gmra.mrb[12].mxu1 %vm187_vm2, %v1512_v20 }
  0x22   :  { %1459 = vmatprep.mubr.msk.bf16.mxu0 %vm187_vm2, %v1513_v21  ;;  %1483 = vmatprep.mubr.msk.bf16.mxu1 %vm187_vm2, %v1517_v22 }
  0x29   :  { %1460 = vmatmul.mubr.msk.bf16.gmra.mrb[16].mxu0 %vm187_vm2, %v1514_v23  ;;  %1484 = vmatmul.mubr.msk.bf16.gmra.mrb[16].mxu1 %vm187_vm2, %v1518_v24 }
  0x2a   :  { %1463 = vmatprep.mubr.msk.bf16.mxu0 %vm187_vm2, %v1515_v25  ;;  %1487 = vmatprep.mubr.msk.bf16.mxu1 %vm187_vm2, %v1519_v26 }
  0x31   :  { %1464 = vmatmul.mubr.msk.bf16.gmra.mrb[20].mxu0 %vm187_vm2, %v1516_v27  ;;  %1488 = vmatmul.mubr.msk.bf16.gmra.mrb[20].mxu1 %vm187_vm2, %v1520_v28 }
  0xdc   :  { %v1445_v29 = vpop.f32.mrb[0].mxu0  ;;  %v1469_v30 = vpop.f32.mrb[0].mxu1 }
  0xdd   :  { %495 = vst.msk [vmem:[%s2765_s4 + $0x10] sm:$0xff] %vm492_vm3, %v1445_v29  ;;  %519 = vst.msk [vmem:[%s2765_s4 + $0xd0] sm:$0xff] %vm492_vm3, %v1469_v30  ;;  %v301_v31 = vpop.f32.mrb[1].mxu0  ;;  %v397_v32 = vpop.f32.mrb[1].mxu1 }
  0xde   :  { %493 = vst.msk [vmem:[%s2765_s4] sm:$0xff] %vm492_vm3, %v301_v31  ;;  %517 = vst.msk [vmem:[%s2765_s4 + $0xc0] sm:$0xff] %vm492_vm3, %v397_v32  ;;  %v1446_v33 = vpop.f32.mrb[2].mxu0  ;;  %v1470_v34 = vpop.f32.mrb[2].mxu1 }
  0xdf   :  { %496 = vst.msk [vmem:[%s2765_s4 + $0x18] sm:$0xff] %vm492_vm3, %v1446_v33  ;;  %520 = vst.msk [vmem:[%s2765_s4 + $0xd8] sm:$0xff] %vm492_vm3, %v1470_v34  ;;  %v304_v35 = vpop.f32.mrb[3].mxu0  ;;  %v400_v36 = vpop.f32.mrb[3].mxu1 }
  0xe0   :  { %494 = vst.msk [vmem:[%s2765_s4 + $0x8] sm:$0xff] %vm492_vm3, %v304_v35  ;;  %518 = vst.msk [vmem:[%s2765_s4 + $0xc8] sm:$0xff] %vm492_vm3, %v400_v36 }
  0xe4   :  { %v1712_v37 = vld [vmem:[%s2765_s4 + $0xd0] sm:$0xff]  ;;  %v1449_v39 = vpop.f32.mrb[4].mxu0  ;;  %v1473_v40 = vpop.f32.mrb[4].mxu1 }
  0xe5   :  { %2818 = vst [vmem:[#allocation2_spill] sm:$0xff] %v1712_v37  ;;  %v1717_v38 = vld [vmem:[%s2765_s4 + $0x10] sm:$0xff]  ;;  %v670_v41 = vsel %vm492_vm3, %v1712_v37, 0.0  ;;  %499 = vst.msk [vmem:[%s2765_s4 + $0x30] sm:$0xff] %vm492_vm3, %v1449_v39  ;;  %v1730_v43 = vld [vmem:[%s2765_s4] sm:$0xff]  ;;  %v317_v44 = vpop.f32.mrb[5].mxu0 }
  0xe6   :  { %2819 = vst [vmem:[#allocation3_spill] sm:$0xff] %v1717_v38  ;;  %v550_v42 = vsel %vm492_vm3, %v1717_v38, 0.0  ;;  %523 = vst.msk [vmem:[%s2765_s4 + $0xf0] sm:$0xff] %vm492_vm3, %v1473_v40  ;;  %v413_v45 = vpop.f32.mrb[5].mxu1  ;;  %v1739_v46 = vld [vmem:[%s2765_s4 + $0x18] sm:$0xff]  ;;  %671 = vadd.xlane.f32.xlu0 %v670_v41  ;;  %v1450_v47 = vpop.f32.mrb[6].mxu0 }
  0xe7   :  { %2820 = vst [vmem:[#allocation4_spill] sm:$0xff] %v1739_v46  ;;  %551 = vadd.xlane.f32.xlu1 %v550_v42  ;;  %497 = vst.msk [vmem:[%s2765_s4 + $0x20] sm:$0xff] %vm492_vm3, %v317_v44  ;;  %v1474_v48 = vpop.f32.mrb[6].mxu1  ;;  %v544_v49 = vsel %vm492_vm3, %v1730_v43, 0.0  ;;  %v559_v50 = vsel %vm492_vm3, %v1739_v46, 0.0  ;;  %v320_v51 = vpop.f32.mrb[7].mxu0 }
  0xe8   :  { %521 = vst.msk [vmem:[%s2765_s4 + $0xe0] sm:$0xff] %vm492_vm3, %v413_v45  ;;  %500 = vst.msk [vmem:[%s2765_s4 + $0x38] sm:$0xff] %vm492_vm3, %v1450_v47  ;;  %v416_v52 = vpop.f32.mrb[7].mxu1  ;;  %v1772_v53 = vld [vmem:[%s2765_s4 + $0xc0] sm:$0xff]  ;;  %v1777_v54 = vld [vmem:[%s2765_s4 + $0xd8] sm:$0xff] }
  0xe9   :  { %524 = vst.msk [vmem:[%s2765_s4 + $0xf8] sm:$0xff] %vm492_vm3, %v1474_v48  ;;  %498 = vst.msk [vmem:[%s2765_s4 + $0x28] sm:$0xff] %vm492_vm3, %v320_v51  ;;  %v664_v57 = vsel %vm492_vm3, %v1772_v53, 0.0  ;;  %v679_v58 = vsel %vm492_vm3, %v1777_v54, 0.0  ;;  %v1794_v61 = vld [vmem:[%s2765_s4 + $0xc8] sm:$0xff] }
  0xea   :  { %522 = vst.msk [vmem:[%s2765_s4 + $0xe8] sm:$0xff] %vm492_vm3, %v416_v52  ;;  %2821 = vst [vmem:[#allocation5_spill] sm:$0xff] %v1772_v53  ;;  %545 = vadd.xlane.f32.xlu0 %v544_v49  ;;  %v1799_v62 = vld [vmem:[%s2765_s4 + $0x8] sm:$0xff]  ;;  %v667_v5 = vsel %vm492_vm3, %v1794_v61, 0.0 }
  0xeb   :  { %2822 = vst [vmem:[#allocation6_spill] sm:$0xff] %v1777_v54  ;;  %560 = vadd.xlane.f32.xlu1 %v559_v50  ;;  %v547_v6 = vsel %vm492_vm3, %v1799_v62, 0.0 }
  0xec   :  { %v1453_v55 = vpop.f32.mrb[8].mxu0  ;;  %v1477_v56 = vpop.f32.mrb[8].mxu1  ;;  %v1820_v3 = vld [vmem:[%s2765_s4 + $0x30] sm:$0xff] }
  0xed   :  { %503 = vst.msk [vmem:[%s2765_s4 + $0x50] sm:$0xff] %vm492_vm3, %v1453_v55  ;;  %v333_v59 = vpop.f32.mrb[9].mxu0  ;;  %527 = vst.msk [vmem:[%s2765_s4 + $0x110] sm:$0xff] %vm492_vm3, %v1477_v56  ;;  %v429_v60 = vpop.f32.mrb[9].mxu1  ;;  %v574_v7 = vsel %vm492_vm3, %v1820_v3, 0.0  ;;  %v1846_v9 = vld [vmem:[%s2765_s4 + $0xf0] sm:$0xff] }
  0xee   :  { %665 = vadd.xlane.f32.xlu0 %v664_v57  ;;  %501 = vst.msk [vmem:[%s2765_s4 + $0x40] sm:$0xff] %vm492_vm3, %v333_v59  ;;  %v1454_v63 = vpop.f32.mrb[10].mxu0  ;;  %525 = vst.msk [vmem:[%s2765_s4 + $0x100] sm:$0xff] %vm492_vm3, %v429_v60  ;;  %v1478_v0 = vpop.f32.mrb[10].mxu1  ;;  %v694_v17 = vsel %vm492_vm3, %v1846_v9, 0.0  ;;  %v1892_v21 = vld [vmem:[%s2765_s4 + $0x20] sm:$0xff] }
  0xef   :  { %680 = vadd.xlane.f32.xlu1 %v679_v58  ;;  %504 = vst.msk [vmem:[%s2765_s4 + $0x58] sm:$0xff] %vm492_vm3, %v1454_v63  ;;  %v336_v1 = vpop.f32.mrb[11].mxu0  ;;  %528 = vst.msk [vmem:[%s2765_s4 + $0x118] sm:$0xff] %vm492_vm3, %v1478_v0  ;;  %v432_v2 = vpop.f32.mrb[11].mxu1  ;;  %v1825_v4 = vld [vmem:[%s2765_s4 + $0x38] sm:$0xff]  ;;  %v562_v25 = vsel %vm492_vm3, %v1892_v21, 0.0 }
  0xf0   :  { %2823 = vst [vmem:[#allocation7_spill] sm:$0xff] %v1820_v3  ;;  %502 = vst.msk [vmem:[%s2765_s4 + $0x48] sm:$0xff] %vm492_vm3, %v336_v1  ;;  %v577_v8 = vsel %vm492_vm3, %v1825_v4, 0.0  ;;  %v1851_v10 = vld [vmem:[%s2765_s4 + $0xf8] sm:$0xff]  ;;  %v1897_v22 = vld [vmem:[%s2765_s4 + $0x28] sm:$0xff] }
  0xf1   :  { %526 = vst.msk [vmem:[%s2765_s4 + $0x108] sm:$0xff] %vm492_vm3, %v432_v2  ;;  %2824 = vst [vmem:[#allocation8_spill] sm:$0xff] %v1846_v9  ;;  %v697_v18 = vsel %vm492_vm3, %v1851_v10, 0.0  ;;  %v565_v26 = vsel %vm492_vm3, %v1897_v22, 0.0  ;;  %v1914_v29 = vld [vmem:[%s2765_s4 + $0xe0] sm:$0xff]  ;;  %v1919_v30 = vld [vmem:[%s2765_s4 + $0xe8] sm:$0xff] }
  0xf2   :  { %548 = vadd.xlane.f32.xlu0 %v547_v6  ;;  %2825 = vst [vmem:[#allocation9_spill] sm:$0xff] %v1897_v22  ;;  %2826 = vst [vmem:[#allocation10_spill] sm:$0xff] %v1919_v30  ;;  %v682_v39 = vsel %vm492_vm3, %v1914_v29, 0.0  ;;  %v685_v40 = vsel %vm492_vm3, %v1919_v30, 0.0 }
  0xf3   :  { %668 = vadd.xlane.f32.xlu1 %v667_v5 }
  0xf4   :  { %v1457_v11 = vpop.f32.mrb[12].mxu0  ;;  %v1481_v12 = vpop.f32.mrb[12].mxu1  ;;  %v1940_v35 = vld [vmem:[%s2765_s4 + $0x50] sm:$0xff] }
  0xf5   :  { %507 = vst.msk [vmem:[%s2765_s4 + $0x70] sm:$0xff] %vm492_vm3, %v1457_v11  ;;  %v349_v13 = vpop.f32.mrb[13].mxu0  ;;  %531 = vst.msk [vmem:[%s2765_s4 + $0x130] sm:$0xff] %vm492_vm3, %v1481_v12  ;;  %v445_v14 = vpop.f32.mrb[13].mxu1  ;;  %v592_v41 = vsel %vm492_vm3, %v1940_v35, 0.0  ;;  %v1966_v44 = vld [vmem:[%s2765_s4 + $0x110] sm:$0xff] }
  0xf6   :  { %575 = vadd.xlane.f32.xlu0 %v574_v7  ;;  %505 = vst.msk [vmem:[%s2765_s4 + $0x60] sm:$0xff] %vm492_vm3, %v349_v13  ;;  %v1458_v15 = vpop.f32.mrb[14].mxu0  ;;  %529 = vst.msk [vmem:[%s2765_s4 + $0x120] sm:$0xff] %vm492_vm3, %v445_v14  ;;  %v1482_v16 = vpop.f32.mrb[14].mxu1  ;;  %v1945_v36 = vld [vmem:[%s2765_s4 + $0x58] sm:$0xff]  ;;  %v712_v55 = vsel %vm492_vm3, %v1966_v44, 0.0 }
  0xf7   :  { %578 = vadd.xlane.f32.xlu1 %v577_v8  ;;  %508 = vst.msk [vmem:[%s2765_s4 + $0x78] sm:$0xff] %vm492_vm3, %v1458_v15  ;;  %v352_v19 = vpop.f32.mrb[15].mxu0  ;;  %532 = vst.msk [vmem:[%s2765_s4 + $0x138] sm:$0xff] %vm492_vm3, %v1482_v16  ;;  %v448_v20 = vpop.f32.mrb[15].mxu1  ;;  %v595_v42 = vsel %vm492_vm3, %v1945_v36, 0.0  ;;  %v1971_v45 = vld [vmem:[%s2765_s4 + $0x118] sm:$0xff] }
  0xf8   :  { %506 = vst.msk [vmem:[%s2765_s4 + $0x68] sm:$0xff] %vm492_vm3, %v352_v19  ;;  %530 = vst.msk [vmem:[%s2765_s4 + $0x128] sm:$0xff] %vm492_vm3, %v448_v20  ;;  %v715_v56 = vsel %vm492_vm3, %v1971_v45, 0.0  ;;  %v2012_v59 = vld [vmem:[%s2765_s4 + $0x40] sm:$0xff]  ;;  %v2017_v60 = vld [vmem:[%s2765_s4 + $0x48] sm:$0xff] }
  0xf9   :  { %2827 = vst [vmem:[#allocation11_spill] sm:$0xff] %v1945_v36  ;;  %2828 = vst [vmem:[#allocation12_spill] sm:$0xff] %v1971_v45  ;;  %v580_v63 = vsel %vm492_vm3, %v2012_v59, 0.0  ;;  %v589_v0 = vsel %vm492_vm3, %v2017_v60, 0.0  ;;  %v2026_v1 = vld [vmem:[%s2765_s4 + $0x100] sm:$0xff]  ;;  %v2031_v2 = vld [vmem:[%s2765_s4 + $0x108] sm:$0xff] }
  0xfa   :  { %695 = vadd.xlane.f32.xlu0 %v694_v17  ;;  %2829 = vst [vmem:[#allocation13_spill] sm:$0xff] %v2012_v59  ;;  %2830 = vst [vmem:[#allocation14_spill] sm:$0xff] %v2017_v60  ;;  %v700_v7 = vsel %vm492_vm3, %v2026_v1, 0.0  ;;  %v709_v8 = vsel %vm492_vm3, %v2031_v2, 0.0 }
  0xfb   :  { %698 = vadd.xlane.f32.xlu1 %v697_v18  ;;  %2831 = vst [vmem:[#allocation15_spill] sm:$0xff] %v2026_v1  ;;  %2832 = vst [vmem:[#allocation16_spill] sm:$0xff] %v2031_v2 }
  0xfc   :  { %v1461_v23 = vpop.f32.mrb[16].mxu0  ;;  %v1485_v24 = vpop.f32.mrb[16].mxu1  ;;  %v2036_v5 = vld [vmem:[%s2765_s4 + $0x70] sm:$0xff] }
  0xfd   :  { %511 = vst.msk [vmem:[%s2765_s4 + $0x90] sm:$0xff] %vm492_vm3, %v1461_v23  ;;  %v365_v27 = vpop.f32.mrb[17].mxu0  ;;  %535 = vst.msk [vmem:[%s2765_s4 + $0x150] sm:$0xff] %vm492_vm3, %v1485_v24  ;;  %v461_v28 = vpop.f32.mrb[17].mxu1  ;;  %v610_v11 = vsel %vm492_vm3, %v2036_v5, 0.0  ;;  %v2054_v13 = vld [vmem:[%s2765_s4 + $0x60] sm:$0xff] }
  0xfe   :  { %563 = vadd.xlane.f32.xlu0 %v562_v25  ;;  %509 = vst.msk [vmem:[%s2765_s4 + $0x80] sm:$0xff] %vm492_vm3, %v365_v27  ;;  %v1462_v31 = vpop.f32.mrb[18].mxu0  ;;  %533 = vst.msk [vmem:[%s2765_s4 + $0x140] sm:$0xff] %vm492_vm3, %v461_v28  ;;  %v1486_v32 = vpop.f32.mrb[18].mxu1  ;;  %v2041_v6 = vld [vmem:[%s2765_s4 + $0x78] sm:$0xff]  ;;  %v2064_v15 = vld [vmem:[%s2765_s4 + $0x120] sm:$0xff] }
  0xff   :  { %566 = vadd.xlane.f32.xlu1 %v565_v26  ;;  %512 = vst.msk [vmem:[%s2765_s4 + $0x98] sm:$0xff] %vm492_vm3, %v1462_v31  ;;  %v368_v33 = vpop.f32.mrb[19].mxu0  ;;  %536 = vst.msk [vmem:[%s2765_s4 + $0x158] sm:$0xff] %vm492_vm3, %v1486_v32  ;;  %v464_v34 = vpop.f32.mrb[19].mxu1  ;;  %v619_v12 = vsel %vm492_vm3, %v2041_v6, 0.0  ;;  %v2059_v14 = vld [vmem:[%s2765_s4 + $0x68] sm:$0xff] }
 0x100   :  { %510 = vst.msk [vmem:[%s2765_s4 + $0x88] sm:$0xff] %vm492_vm3, %v368_v33  ;;  %534 = vst.msk [vmem:[%s2765_s4 + $0x148] sm:$0xff] %vm492_vm3, %v464_v34  ;;  %v2069_v16 = vld [vmem:[%s2765_s4 + $0x128] sm:$0xff]  ;;  %v604_v17 = vsel %vm492_vm3, %v2054_v13, 0.0  ;;  %v607_v18 = vsel %vm492_vm3, %v2059_v14, 0.0  ;;  %v724_v19 = vsel %vm492_vm3, %v2064_v15, 0.0 }
 0x101   :  { %2833 = vst [vmem:[#allocation17_spill] sm:$0xff] %v2036_v5  ;;  %2834 = vst [vmem:[#allocation18_spill] sm:$0xff] %v2041_v6  ;;  %v727_v20 = vsel %vm492_vm3, %v2069_v16, 0.0  ;;  %v2115_v34 = vld [vmem:[%s2765_s4 + $0x138] sm:$0xff] }
 0x102   :  { %683 = vadd.xlane.f32.xlu0 %v682_v39  ;;  %2835 = vst [vmem:[#allocation19_spill] sm:$0xff] %v2054_v13  ;;  %2836 = vst [vmem:[#allocation20_spill] sm:$0xff] %v2064_v15 }
 0x103   :  { %686 = vadd.xlane.f32.xlu1 %v685_v40  ;;  %2839 = vst [vmem:[#allocation23_spill] sm:$0xff] %v2115_v34  ;;  %v739_v40 = vsel %vm492_vm3, %v2115_v34, 0.0 }
 0x104   :  { %v1465_v47 = vpop.f32.mrb[20].mxu0  ;;  %v1489_v48 = vpop.f32.mrb[20].mxu1  ;;  %v2082_v23 = vld [vmem:[%s2765_s4 + $0x90] sm:$0xff] }
 0x105   :  { %515 = vst.msk [vmem:[%s2765_s4 + $0xb0] sm:$0xff] %vm492_vm3, %v1465_v47  ;;  %v381_v49 = vpop.f32.mrb[21].mxu0  ;;  %539 = vst.msk [vmem:[%s2765_s4 + $0x170] sm:$0xff] %vm492_vm3, %v1489_v48  ;;  %v477_v50 = vpop.f32.mrb[21].mxu1  ;;  %v634_v25 = vsel %vm492_vm3, %v2082_v23, 0.0  ;;  %v2096_v27 = vld [vmem:[%s2765_s4 + $0x80] sm:$0xff] }
 0x106   :  { %593 = vadd.xlane.f32.xlu0 %v592_v41  ;;  %513 = vst.msk [vmem:[%s2765_s4 + $0xa0] sm:$0xff] %vm492_vm3, %v381_v49  ;;  %v1466_v51 = vpop.f32.mrb[22].mxu0  ;;  %537 = vst.msk [vmem:[%s2765_s4 + $0x160] sm:$0xff] %vm492_vm3, %v477_v50  ;;  %v1490_v52 = vpop.f32.mrb[22].mxu1  ;;  %v2087_v24 = vld [vmem:[%s2765_s4 + $0x98] sm:$0xff]  ;;  %v622_v32 = vsel %vm492_vm3, %v2096_v27, 0.0 }
 0x107   :  { %596 = vadd.xlane.f32.xlu1 %v595_v42  ;;  %516 = vst.msk [vmem:[%s2765_s4 + $0xb8] sm:$0xff] %vm492_vm3, %v1466_v51  ;;  %v384_v57 = vpop.f32.mrb[23].mxu0  ;;  %540 = vst.msk [vmem:[%s2765_s4 + $0x178] sm:$0xff] %vm492_vm3, %v1490_v52  ;;  %v480_v58 = vpop.f32.mrb[23].mxu1  ;;  %v637_v26 = vsel %vm492_vm3, %v2087_v24, 0.0  ;;  %v2101_v28 = vld [vmem:[%s2765_s4 + $0x88] sm:$0xff] }
 0x108   :  { %514 = vst.msk [vmem:[%s2765_s4 + $0xa8] sm:$0xff] %vm492_vm3, %v384_v57  ;;  %538 = vst.msk [vmem:[%s2765_s4 + $0x168] sm:$0xff] %vm492_vm3, %v480_v58  ;;  %v625_v33 = vsel %vm492_vm3, %v2101_v28, 0.0  ;;  %v2138_v49 = vld [vmem:[%s2765_s4 + $0x130] sm:$0xff]  ;;  %v2148_v51 = vld [vmem:[%s2765_s4 + $0x140] sm:$0xff] }
 0x109   :  { %2837 = vst [vmem:[#allocation21_spill] sm:$0xff] %v2082_v23  ;;  %2838 = vst [vmem:[#allocation22_spill] sm:$0xff] %v2101_v28  ;;  %v2153_v52 = vld [vmem:[%s2765_s4 + $0x148] sm:$0xff]  ;;  %v742_v57 = vsel %vm492_vm3, %v2148_v51, 0.0 }
 0x10a   :  { %713 = vadd.xlane.f32.xlu0 %v712_v55  ;;  %2842 = vst [vmem:[#allocation26_spill] sm:$0xff] %v2138_v49  ;;  %2844 = vst [vmem:[#allocation28_spill] sm:$0xff] %v2153_v52  ;;  %v730_v55 = vsel %vm492_vm3, %v2138_v49, 0.0  ;;  %v745_v58 = vsel %vm492_vm3, %v2153_v52, 0.0 }
 0x10b   :  { %716 = vadd.xlane.f32.xlu1 %v715_v56 }
 0x10c   :  { %v2106_v31 = vld [vmem:[%s2765_s4 + $0xb0] sm:$0xff] }
 0x10d   :  { %v652_v39 = vsel %vm492_vm3, %v2106_v31, 0.0  ;;  %v2124_v41 = vld [vmem:[%s2765_s4 + $0xa0] sm:$0xff] }
 0x10e   :  { %581 = vadd.xlane.f32.xlu0 %v580_v63  ;;  %2840 = vst [vmem:[#allocation24_spill] sm:$0xff] %v2124_v41  ;;  %v2129_v42 = vld [vmem:[%s2765_s4 + $0xb8] sm:$0xff]  ;;  %v640_v47 = vsel %vm492_vm3, %v2124_v41, 0.0  ;;  %v2166_v63 = vld [vmem:[%s2765_s4 + $0x150] sm:$0xff] }
 0x10f   :  { %590 = vadd.xlane.f32.xlu1 %v589_v0  ;;  %2841 = vst [vmem:[#allocation25_spill] sm:$0xff] %v2129_v42  ;;  %v655_v48 = vsel %vm492_vm3, %v2129_v42, 0.0  ;;  %v2143_v50 = vld [vmem:[%s2765_s4 + $0xa8] sm:$0xff]  ;;  %2845 = vst [vmem:[#allocation29_spill] sm:$0xff] %v2166_v63  ;;  %v2171_v0 = vld [vmem:[%s2765_s4 + $0x158] sm:$0xff] }
 0x110   :  { %2843 = vst [vmem:[#allocation27_spill] sm:$0xff] %v2143_v50  ;;  %v649_v56 = vsel %vm492_vm3, %v2143_v50, 0.0 }
 0x112   :  { %701 = vadd.xlane.f32.xlu0 %v700_v7  ;;  %v2176_v7 = vld [vmem:[%s2765_s4 + $0x160] sm:$0xff] }
 0x113   :  { %710 = vadd.xlane.f32.xlu1 %v709_v8  ;;  %2846 = vst [vmem:[#allocation30_spill] sm:$0xff] %v2176_v7  ;;  %v2181_v8 = vld [vmem:[%s2765_s4 + $0x168] sm:$0xff] }
 0x114   :  { %2847 = vst [vmem:[#allocation31_spill] sm:$0xff] %v2181_v8 }
 0x116   :  { %611 = vadd.xlane.f32.xlu0 %v610_v11  ;;  %v754_v11 = vsel %vm492_vm3, %v2166_v63, 0.0 }
 0x117   :  { %620 = vadd.xlane.f32.xlu1 %v619_v12  ;;  %v757_v12 = vsel %vm492_vm3, %v2171_v0, 0.0 }
 0x11a   :  { %605 = vadd.xlane.f32.xlu0 %v604_v17  ;;  %v760_v17 = vsel %vm492_vm3, %v2176_v7, 0.0 }
 0x11b   :  { %608 = vadd.xlane.f32.xlu1 %v607_v18  ;;  %v769_v18 = vsel %vm492_vm3, %v2181_v8, 0.0 }
 0x11e   :  { %725 = vadd.xlane.f32.xlu0 %v724_v19  ;;  %v2194_v19 = vld [vmem:[%s2765_s4 + $0x170] sm:$0xff] }
 0x11f   :  { %728 = vadd.xlane.f32.xlu1 %v727_v20  ;;  %2848 = vst [vmem:[#allocation32_spill] sm:$0xff] %v2194_v19  ;;  %v2199_v20 = vld [vmem:[%s2765_s4 + $0x178] sm:$0xff] }
 0x120   :  { %2849 = vst [vmem:[#allocation33_spill] sm:$0xff] %v2199_v20 }
 0x122   :  { %635 = vadd.xlane.f32.xlu0 %v634_v25  ;;  %v772_v25 = vsel %vm492_vm3, %v2194_v19, 0.0 }
 0x123   :  { %638 = vadd.xlane.f32.xlu1 %v637_v26  ;;  %v775_v26 = vsel %vm492_vm3, %v2199_v20, 0.0 }
 0x126   :  { %623 = vadd.xlane.f32.xlu0 %v622_v32 }
 0x127   :  { %626 = vadd.xlane.f32.xlu1 %v625_v33 }
 0x12a   :  { %653 = vadd.xlane.f32.xlu0 %v652_v39 }
 0x12b   :  { %740 = vadd.xlane.f32.xlu1 %v739_v40 }
 0x12e   :  { %641 = vadd.xlane.f32.xlu0 %v640_v47 }
 0x12f   :  { %656 = vadd.xlane.f32.xlu1 %v655_v48 }
 0x132   :  { %731 = vadd.xlane.f32.xlu0 %v730_v55 }
 0x133   :  { %650 = vadd.xlane.f32.xlu1 %v649_v56 }
 0x136   :  { %743 = vadd.xlane.f32.xlu0 %v742_v57 }
 0x137   :  { %746 = vadd.xlane.f32.xlu1 %v745_v58 }
 0x13a   :  { %755 = vadd.xlane.f32.xlu0 %v754_v11 }
 0x13b   :  { %758 = vadd.xlane.f32.xlu1 %v757_v12 }
 0x13e   :  { %761 = vadd.xlane.f32.xlu0 %v760_v17 }
 0x13f   :  { %770 = vadd.xlane.f32.xlu1 %v769_v18 }
 0x142   :  { %773 = vadd.xlane.f32.xlu0 %v772_v25 }
 0x143   :  { %776 = vadd.xlane.f32.xlu1 %v775_v26 }
 0x173   :  { %v672_v32 = vpop.xlane.xlu0 %671 }
 0x174   :  { %v552_v33 = vpop.xlane.xlu1 %551 }
 0x177   :  { %v546_v39 = vpop.xlane.xlu0 %545 }
 0x178   :  { %v561_v40 = vpop.xlane.xlu1 %560 }
 0x179   :  { %v568_v57 = vadd.f32 %v561_v40, %v546_v39 }
 0x17b   :  { %v666_v47 = vpop.xlane.xlu0 %665 }
 0x17c   :  { %v2205_v48 = vpop.xlane.xlu1 %680 }
 0x17f   :  { %v549_v56 = vpop.xlane.xlu0 %548 }
 0x180   :  { %v669_v55 = vpop.xlane.xlu1 %668 }
 0x183   :  { %v576_v58 = vpop.xlane.xlu0 %575 }
 0x184   :  { %v579_v11 = vpop.xlane.xlu1 %578  ;;  %v583_v12 = vadd.f32 %v576_v58, %v568_v57 }
 0x187   :  { %v696_v17 = vpop.xlane.xlu0 %695 }
 0x188   :  { %v699_v18 = vpop.xlane.xlu1 %698 }
 0x18b   :  { %v564_v19 = vpop.xlane.xlu0 %563 }
 0x18c   :  { %v567_v7 = vpop.xlane.xlu1 %566  ;;  %v569_v9 = vadd.f32 %v564_v19, %v549_v56 }
 0x18d   :  { %v570_v53 = vadd.f32 %v567_v7, %v552_v33 }
 0x18e   :  { %v584_v30 = vadd.f32 %v579_v11, %v569_v9 }
 0x18f   :  { %v684_v20 = vpop.xlane.xlu0 %683 }
 0x190   :  { %v687_v25 = vpop.xlane.xlu1 %686 }
 0x193   :  { %v594_v26 = vpop.xlane.xlu0 %593 }
 0x194   :  { %v597_v8 = vpop.xlane.xlu1 %596  ;;  %v599_v42 = vadd.f32 %v594_v26, %v584_v30 }
 0x197   :  { %v714_v63 = vpop.xlane.xlu0 %713 }
 0x198   :  { %v717_v52 = vpop.xlane.xlu1 %716 }
 0x19b   :  { %v582_v49 = vpop.xlane.xlu0 %581 }
 0x19c   :  { %v591_v34 = vpop.xlane.xlu1 %590  ;;  %v585_v41 = vadd.f32 %v582_v49, %v570_v53 }
 0x19d   :  { %v598_v6 = vadd.f32 %v591_v34, %v583_v12 }
 0x19e   :  { %v600_v13 = vadd.f32 %v597_v8, %v585_v41 }
 0x19f   :  { %v702_v15 = vpop.xlane.xlu0 %701 }
 0x1a0   :  { %v711_v45 = vpop.xlane.xlu1 %710 }
 0x1a3   :  { %v612_v1 = vpop.xlane.xlu0 %611 }
 0x1a4   :  { %v621_v2 = vpop.xlane.xlu1 %620  ;;  %v615_v3 = vadd.f32 %v612_v1, %v600_v13 }
 0x1a7   :  { %v606_v39 = vpop.xlane.xlu0 %605 }
 0x1a8   :  { %v609_v40 = vpop.xlane.xlu1 %608  ;;  %v613_v22 = vadd.f32 %v606_v39, %v598_v6 }
 0x1a9   :  { %v614_v50 = vadd.f32 %v609_v40, %v599_v42 }
 0x1aa   :  { %v628_v46 = vadd.f32 %v621_v2, %v613_v22 }
 0x1ab   :  { %v726_v57 = vpop.xlane.xlu0 %725 }
 0x1ac   :  { %v729_v58 = vpop.xlane.xlu1 %728 }
 0x1af   :  { %v636_v37 = vpop.xlane.xlu0 %635 }
 0x1b0   :  { %v639_v54 = vpop.xlane.xlu1 %638  ;;  %v643_v53 = vadd.f32 %v636_v37, %v628_v46 }
 0x1b3   :  { %v624_v23 = vpop.xlane.xlu0 %623 }
 0x1b4   :  { %v627_v28 = vpop.xlane.xlu1 %626  ;;  %v629_v5 = vadd.f32 %v624_v23, %v614_v50 }
 0x1b5   :  { %v630_v56 = vadd.f32 %v627_v28, %v615_v3 }
 0x1b6   :  { %v644_v36 = vadd.f32 %v639_v54, %v629_v5 }
 0x1b7   :  { %v654_v60 = vpop.xlane.xlu0 %653 }
 0x1b8   :  { %v741_v59 = vpop.xlane.xlu1 %740  ;;  %v659_v19 = vadd.f32 %v654_v60, %v644_v36 }
 0x1ba   :  { %v674_v38 = vadd.f32 %v669_v55, %v659_v19 }
 0x1bb   :  { %v642_v9 = vpop.xlane.xlu0 %641 }
 0x1bc   :  { %v657_v11 = vpop.xlane.xlu1 %656  ;;  %v689_v7 = vadd.f32 %v684_v20, %v674_v38  ;;  %v645_v30 = vadd.f32 %v642_v9, %v630_v56 }
 0x1be   :  { %v660_v42 = vadd.f32 %v657_v11, %v645_v30  ;;  %v704_v41 = vadd.f32 %v699_v18, %v689_v7 }
 0x1bf   :  { %v732_v49 = vpop.xlane.xlu0 %731 }
 0x1c0   :  { %v651_v33 = vpop.xlane.xlu1 %650  ;;  %v675_v23 = vadd.f32 %v672_v32, %v660_v42  ;;  %v719_v3 = vadd.f32 %v714_v63, %v704_v41 }
 0x1c1   :  { %v658_v34 = vadd.f32 %v651_v33, %v643_v53 }
 0x1c2   :  { %v690_v54 = vadd.f32 %v687_v25, %v675_v23  ;;  %v734_v38 = vadd.f32 %v729_v58, %v719_v3 }
 0x1c3   :  { %v673_v5 = vadd.f32 %v666_v47, %v658_v34  ;;  %v744_v50 = vpop.xlane.xlu0 %743 }
 0x1c4   :  { %v705_v1 = vadd.f32 %v702_v15, %v690_v54  ;;  %v747_v60 = vpop.xlane.xlu1 %746  ;;  %v749_v46 = vadd.f32 %v744_v50, %v734_v38 }
 0x1c5   :  { %v688_v36 = vadd.f32 %v2205_v48, %v673_v5 }
 0x1c6   :  { %v720_v6 = vadd.f32 %v717_v52, %v705_v1 }
 0x1c7   :  { %v703_v13 = vadd.f32 %v696_v17, %v688_v36  ;;  %v756_v22 = vpop.xlane.xlu0 %755 }
 0x1c8   :  { %v759_v2 = vpop.xlane.xlu1 %758  ;;  %v735_v56 = vadd.f32 %v732_v49, %v720_v6 }
 0x1c9   :  { %v764_v28 = vadd.f32 %v759_v2, %v749_v46  ;;  %v718_v55 = vadd.f32 %v711_v45, %v703_v13 }
 0x1ca   :  { %v750_v23 = vadd.f32 %v747_v60, %v735_v56 }
 0x1cb   :  { %v762_v37 = vpop.xlane.xlu0 %761  ;;  %v733_v17 = vadd.f32 %v726_v57, %v718_v55 }
 0x1cc   :  { %v771_v9 = vpop.xlane.xlu1 %770  ;;  %v765_v36 = vadd.f32 %v762_v37, %v750_v23 }
 0x1cf   :  { %v774_v8 = vpop.xlane.xlu0 %773 }
 0x1d0   :  { %v779_v20 = vadd.f32 %v774_v8, %v764_v28  ;;  %v777_v54 = vpop.xlane.xlu1 %776 }
 0x1d1   :  { %v780_v3 = vadd.f32 %v777_v54, %v765_v36  ;;  %v2858_v54 = vld [vmem:[#allocation18_spill] sm:$0xff] }
 0x1d2   :  { %v2208_v32 = vmul.f32 0.03125, %v779_v20  ;;  %v2860_v36 = vld [vmem:[#allocation22_spill] sm:$0xff] }
 0x1d4   :  { %v804_v15 = vsub.f32 %v1892_v21, %v2208_v32  ;;  %v786_v63 = vsub.f32 %v1799_v62, %v2208_v32  ;;  %v840_v52 = vsub.f32 %v1940_v35, %v2208_v32  ;;  %v822_v47 = vsub.f32 %v1825_v4, %v2208_v32 }
 0x1d5   :  { %v876_v18 = vsub.f32 %v2096_v27, %v2208_v32  ;;  %v858_v45 = vsub.f32 %v2059_v14, %v2208_v32  ;;  %v748_v35 = vadd.f32 %v741_v59, %v733_v17  ;;  %v912_v4 = vsub.f32 %v2106_v31, %v2208_v32 }
 0x1d6   :  { %v807_v48 = vmul.f32 %v804_v15, %v804_v15  ;;  %v789_v12 = vmul.f32 %v786_v63, %v786_v63  ;;  %v843_v62 = vmul.f32 %v840_v52, %v840_v52  ;;  %v825_v26 = vmul.f32 %v822_v47, %v822_v47  ;;  %v2850_v52 = vld [vmem:[#allocation4_spill] sm:$0xff] }
 0x1d7   :  { %v894_v39 = vsub.f32 %v2087_v24, %v2208_v32  ;;  %v879_v58 = vmul.f32 %v876_v18, %v876_v18  ;;  %v861_v19 = vmul.f32 %v858_v45, %v858_v45  ;;  %v763_v11 = vadd.f32 %v756_v22, %v748_v35  ;;  %v2854_v35 = vld [vmem:[#allocation14_spill] sm:$0xff] }
 0x1d8   :  { %v812_v21 = vsel %vm492_vm3, %v807_v48, 0.0  ;;  %v794_v25 = vsel %vm492_vm3, %v789_v12, 0.0  ;;  %v848_v40 = vsel %vm492_vm3, %v843_v62, 0.0  ;;  %v830_v57 = vsel %vm492_vm3, %v825_v26, 0.0  ;;  %v2851_v48 = vld [vmem:[#allocation3_spill] sm:$0xff] }
 0x1d9   :  { %813 = vadd.xlane.f32.xlu0 %v812_v21  ;;  %795 = vadd.xlane.f32.xlu1 %v794_v25  ;;  %v915_v7 = vmul.f32 %v912_v4, %v912_v4  ;;  %v897_v30 = vmul.f32 %v894_v39, %v894_v39  ;;  %v884_v59 = vsel %vm492_vm3, %v879_v58, 0.0  ;;  %v866_v53 = vsel %vm492_vm3, %v861_v19, 0.0  ;;  %v2853_v62 = vld [vmem:[#allocation7_spill] sm:$0xff]  ;;  %v2855_v39 = vld [vmem:[#allocation13_spill] sm:$0xff] }
 0x1da   :  { %v948_v42 = vsub.f32 %v1914_v29, %v2208_v32  ;;  %v930_v33 = vsub.f32 %v1794_v61, %v2208_v32  ;;  %v778_v49 = vadd.f32 %v771_v9, %v763_v11  ;;  %v984_v1 = vsub.f32 %v1966_v44, %v2208_v32  ;;  %v2856_v11 = vld [vmem:[#allocation11_spill] sm:$0xff] }
 0x1db   :  { %v920_v34 = vsel %vm492_vm3, %v915_v7, 0.0  ;;  %v902_v41 = vsel %vm492_vm3, %v897_v30, 0.0  ;;  %v966_v29 = vsub.f32 %v1851_v10, %v2208_v32  ;;  %v1020_v60 = vsub.f32 %v2148_v51, %v2208_v32 }
 0x1dc   :  { %v951_v5 = vmul.f32 %v948_v42, %v948_v42  ;;  %v933_v50 = vmul.f32 %v930_v33, %v930_v33  ;;  %v2242_v61 = vmul.f32 0.03125, %v778_v49  ;;  %v1002_v6 = vsub.f32 %v2069_v16, %v2208_v32  ;;  %v2857_v42 = vld [vmem:[#allocation19_spill] sm:$0xff] }
 0x1dd   :  { %849 = vadd.xlane.f32.xlu0 %v848_v40  ;;  %831 = vadd.xlane.f32.xlu1 %v830_v57  ;;  %v987_v44 = vmul.f32 %v984_v1, %v984_v1  ;;  %v969_v38 = vmul.f32 %v966_v29, %v966_v29  ;;  %v2250_v10 = vmul.f32 0.03125, %v780_v3  ;;  %v1023_v2 = vmul.f32 %v1020_v60, %v1020_v60 }
 0x1de   :  { %v956_v13 = vsel %vm492_vm3, %v951_v5, 0.0  ;;  %v938_v22 = vsel %vm492_vm3, %v933_v50, 0.0  ;;  %v1038_v37 = vsub.f32 %v2171_v0, %v2208_v32  ;;  %v1005_v8 = vmul.f32 %v1002_v6, %v1002_v6  ;;  %v2859_v50 = vld [vmem:[#allocation17_spill] sm:$0xff] }
 0x1df   :  { %v992_v46 = vsel %vm492_vm3, %v987_v44, 0.0  ;;  %v974_v28 = vsel %vm492_vm3, %v969_v38, 0.0  ;;  %v785_v16 = vsub.f32 %v1730_v43, %v2242_v61  ;;  %v1028_v20 = vsel %vm492_vm3, %v1023_v2, 0.0  ;;  %v2852_v43 = vld [vmem:[#allocation9_spill] sm:$0xff]  ;;  %v2862_v38 = vld [vmem:[#allocation27_spill] sm:$0xff] }
 0x1e0   :  { %v1041_v55 = vmul.f32 %v1038_v37, %v1038_v37  ;;  %v1010_v15 = vsel %vm492_vm3, %v1005_v8, 0.0  ;;  %v803_v47 = vsub.f32 %v2850_v52, %v2242_v61  ;;  %v787_v12 = vsub.f32 %v2851_v48, %v2250_v10  ;;  %v2863_v37 = vld [vmem:[#allocation24_spill] sm:$0xff] }
 0x1e1   :  { %885 = vadd.xlane.f32.xlu0 %v884_v59  ;;  %867 = vadd.xlane.f32.xlu1 %v866_v53  ;;  %v788_v63 = vmul.f32 %v785_v16, %v785_v16  ;;  %v805_v18 = vsub.f32 %v2852_v43, %v2250_v10  ;;  %v821_v26 = vsub.f32 %v2853_v62, %v2242_v61 }
 0x1e2   :  { %v1046_v17 = vsel %vm492_vm3, %v1041_v55, 0.0  ;;  %v806_v21 = vmul.f32 %v803_v47, %v803_v47  ;;  %v790_v25 = vmul.f32 %v787_v12, %v787_v12  ;;  %v839_v4 = vsub.f32 %v2854_v35, %v2242_v61  ;;  %v2865_v12 = vld [vmem:[#allocation5_spill] sm:$0xff] }
 0x1e3   :  { %v791_v45 = vsel %vm492_vm3, %v788_v63, 0.0  ;;  %v823_v40 = vsub.f32 %v2855_v39, %v2250_v10  ;;  %v808_v19 = vmul.f32 %v805_v18, %v805_v18  ;;  %v824_v56 = vmul.f32 %v821_v26, %v821_v26  ;;  %v2867_v26 = vld [vmem:[#allocation2_spill] sm:$0xff] }
 0x1e4   :  { %v809_v57 = vsel %vm492_vm3, %v806_v21, 0.0  ;;  %v797_v58 = vsel %vm492_vm3, %v790_v25, 0.0  ;;  %v842_v9 = vmul.f32 %v839_v4, %v839_v4  ;;  %v841_v7 = vsub.f32 %v2856_v11, %v2250_v10  ;;  %v2866_v25 = vld [vmem:[#allocation6_spill] sm:$0xff] }
 0x1e5   :  { %921 = vadd.xlane.f32.xlu0 %v920_v34  ;;  %903 = vadd.xlane.f32.xlu1 %v902_v41  ;;  %v815_v30 = vsel %vm492_vm3, %v808_v19, 0.0  ;;  %v827_v59 = vsel %vm492_vm3, %v824_v56, 0.0  ;;  %v826_v53 = vmul.f32 %v823_v40, %v823_v40  ;;  %v857_v33 = vsub.f32 %v2857_v42, %v2242_v61  ;;  %v2868_v40 = vld [vmem:[#allocation10_spill] sm:$0xff] }
 0x1e6   :  { %v845_v23 = vsel %vm492_vm3, %v842_v9, 0.0  ;;  %v844_v49 = vmul.f32 %v841_v7, %v841_v7  ;;  %v875_v5 = vsub.f32 %v2858_v54, %v2242_v61  ;;  %v859_v1 = vsub.f32 %v2859_v50, %v2250_v10  ;;  %v2869_v9 = vld [vmem:[#allocation8_spill] sm:$0xff] }
 0x1e7   :  { %v833_v34 = vsel %vm492_vm3, %v826_v53, 0.0  ;;  %v860_v41 = vmul.f32 %v857_v33, %v857_v33  ;;  %v877_v3 = vsub.f32 %v2860_v36, %v2250_v10  ;;  %v911_v2 = vsub.f32 %v2862_v38, %v2242_v61  ;;  %v2870_v7 = vld [vmem:[#allocation16_spill] sm:$0xff] }
 0x1e8   :  { %v851_v29 = vsel %vm492_vm3, %v844_v49, 0.0  ;;  %v878_v6 = vmul.f32 %v875_v5, %v875_v5  ;;  %v947_v62 = vsub.f32 %v2866_v25, %v2242_v61  ;;  %v931_v4 = vsub.f32 %v2867_v26, %v2250_v10 }
 0x1e9   :  { %957 = vadd.xlane.f32.xlu0 %v956_v13  ;;  %939 = vadd.xlane.f32.xlu1 %v938_v22  ;;  %v863_v60 = vsel %vm492_vm3, %v860_v41, 0.0  ;;  %v862_v13 = vmul.f32 %v859_v1, %v859_v1  ;;  %v2861_v22 = vld [vmem:[#allocation21_spill] sm:$0xff]  ;;  %v880_v16 = vmul.f32 %v877_v3, %v877_v3  ;;  %v914_v55 = vmul.f32 %v911_v2, %v911_v2 }
 0x1ea   :  { %v893_v44 = vsub.f32 %v2861_v22, %v2242_v61  ;;  %v950_v19 = vmul.f32 %v947_v62, %v947_v62  ;;  %v934_v56 = vmul.f32 %v931_v4, %v931_v4  ;;  %v965_v11 = vsub.f32 %v2869_v9, %v2242_v61 }
 0x1eb   :  { %v869_v8 = vsel %vm492_vm3, %v862_v13, 0.0  ;;  %v887_v52 = vsel %vm492_vm3, %v880_v16, 0.0  ;;  %v917_v43 = vsel %vm492_vm3, %v914_v55, 0.0  ;;  %v2875_v16 = vld [vmem:[#allocation26_spill] sm:$0xff]  ;;  %v2876_v55 = vld [vmem:[#allocation28_spill] sm:$0xff] }
 0x1ec   :  { %v953_v33 = vsel %vm492_vm3, %v950_v19, 0.0 }
 0x1ed   :  { %993 = vadd.xlane.f32.xlu0 %v992_v46  ;;  %975 = vadd.xlane.f32.xlu1 %v974_v28  ;;  %v895_v46 = vsub.f32 %v2863_v37, %v2250_v10  ;;  %v881_v28 = vsel %vm492_vm3, %v878_v6, 0.0 }
 0x1ef   :  { %v898_v48 = vmul.f32 %v895_v46, %v895_v46 }
 0x1f1   :  { %1029 = vadd.xlane.f32.xlu0 %v1028_v20  ;;  %1011 = vadd.xlane.f32.xlu1 %v1010_v15  ;;  %v896_v20 = vmul.f32 %v893_v44, %v893_v44  ;;  %v2864_v15 = vld [vmem:[#allocation25_spill] sm:$0xff] }
 0x1f2   :  { %v913_v63 = vsub.f32 %v2864_v15, %v2250_v10 }
 0x1f3   :  { %v899_v47 = vsel %vm492_vm3, %v896_v20, 0.0  ;;  %v1003_v20 = vsub.f32 %v2875_v16, %v2250_v10 }
 0x1f4   :  { %v916_v18 = vmul.f32 %v913_v63, %v913_v63  ;;  %v1021_v63 = vsub.f32 %v2876_v55, %v2250_v10 }
 0x1f5   :  { %1047 = vadd.xlane.f32.xlu1 %v1046_v17  ;;  %792 = vadd.xlane.f32.xlu0 %v791_v45  ;;  %v929_v17 = vsub.f32 %v2865_v12, %v2242_v61  ;;  %v905_v45 = vsel %vm492_vm3, %v898_v48, 0.0 }
 0x1f6   :  { %v923_v39 = vsel %vm492_vm3, %v916_v18, 0.0  ;;  %v2878_v18 = vld [vmem:[#allocation31_spill] sm:$0xff]  ;;  %v1024_v4 = vmul.f32 %v1021_v63, %v1021_v63 }
 0x1f7   :  { %v932_v21 = vmul.f32 %v929_v17, %v929_v17 }
 0x1f9   :  { %810 = vadd.xlane.f32.xlu1 %v809_v57  ;;  %798 = vadd.xlane.f32.xlu0 %v797_v58  ;;  %v949_v57 = vsub.f32 %v2868_v40, %v2250_v10  ;;  %v935_v58 = vsel %vm492_vm3, %v932_v21, 0.0  ;;  %v2879_v21 = vld [vmem:[#allocation30_spill] sm:$0xff] }
 0x1fa   :  { %v1039_v25 = vsub.f32 %v2879_v21, %v2250_v10 }
 0x1fb   :  { %v952_v49 = vmul.f32 %v949_v57, %v949_v57 }
 0x1fc   :  { %v1042_v57 = vmul.f32 %v1039_v25, %v1039_v25 }
 0x1fd   :  { %816 = vadd.xlane.f32.xlu1 %v815_v30  ;;  %828 = vadd.xlane.f32.xlu0 %v827_v59  ;;  %v983_v30 = vsub.f32 %v2870_v7, %v2242_v61  ;;  %v2871_v59 = vld [vmem:[#allocation15_spill] sm:$0xff]  ;;  %v959_v50 = vsel %vm492_vm3, %v952_v49, 0.0 }
 0x1fe   :  { %v967_v53 = vsub.f32 %v2871_v59, %v2250_v10 }
 0x1ff   :  { %v986_v41 = vmul.f32 %v983_v30, %v983_v30 }
 0x200   :  { %v970_v5 = vmul.f32 %v967_v53, %v967_v53  ;;  %v1049_v53 = vsel %vm492_vm3, %v1042_v57, 0.0 }
 0x201   :  { %846 = vadd.xlane.f32.xlu1 %v845_v23  ;;  %834 = vadd.xlane.f32.xlu0 %v833_v34  ;;  %v941_v23 = vsel %vm492_vm3, %v934_v56, 0.0  ;;  %v968_v34 = vmul.f32 %v965_v11, %v965_v11  ;;  %v989_v13 = vsel %vm492_vm3, %v986_v41, 0.0  ;;  %v2880_v56 = vld [vmem:[#allocation33_spill] sm:$0xff]  ;;  %v2881_v11 = vld [vmem:[#allocation32_spill] sm:$0xff]  ;;  %v1552_v41 = vmov 0  }
 0x202   :  { %v977_v44 = vsel %vm492_vm3, %v970_v5, 0.0  ;;  %v1057_v9 = vsub.f32 %v2880_v56, %v2250_v10  ;;  %v1056_v30 = vsub.f32 %v2881_v11, %v2208_v32  ;;  %1495 = vset.pattern.permute.xlu0 %v1552_v41  ;;  %1496 = vset.pattern.permute.xlu1 %v1552_v41 }
 0x203   :  { %v971_v1 = vsel %vm492_vm3, %v968_v34, 0.0 }
 0x205   :  { %852 = vadd.xlane.f32.xlu1 %v851_v29  ;;  %864 = vadd.xlane.f32.xlu0 %v863_v60  ;;  %v2872_v29 = vld [vmem:[#allocation12_spill] sm:$0xff] }
 0x206   :  { %v985_v3 = vsub.f32 %v2872_v29, %v2250_v10  ;;  %v2873_v60 = vld [vmem:[#allocation20_spill] sm:$0xff] }
 0x207   :  { %v1001_v6 = vsub.f32 %v2873_v60, %v2242_v61 }
 0x208   :  { %v988_v2 = vmul.f32 %v985_v3, %v985_v3 }
 0x209   :  { %882 = vadd.xlane.f32.xlu1 %v881_v28  ;;  %870 = vadd.xlane.f32.xlu0 %v869_v8  ;;  %v1004_v46 = vmul.f32 %v1001_v6, %v1001_v6  ;;  %v2874_v28 = vld [vmem:[#allocation23_spill] sm:$0xff] }
 0x20a   :  { %v1019_v8 = vsub.f32 %v2874_v28, %v2242_v61  ;;  %v995_v48 = vsel %vm492_vm3, %v988_v2, 0.0 }
 0x20b   :  { %v1007_v12 = vsel %vm492_vm3, %v1004_v46, 0.0 }
 0x20c   :  { %v1022_v17 = vmul.f32 %v1019_v8, %v1019_v8 }
 0x20d   :  { %888 = vadd.xlane.f32.xlu1 %v887_v52  ;;  %900 = vadd.xlane.f32.xlu0 %v899_v47  ;;  %v2877_v52 = vld [vmem:[#allocation29_spill] sm:$0xff] }
 0x20e   :  { %v1037_v47 = vsub.f32 %v2877_v52, %v2242_v61  ;;  %v1025_v62 = vsel %vm492_vm3, %v1022_v17, 0.0 }
 0x211   :  { %918 = vadd.xlane.f32.xlu1 %v917_v43  ;;  %906 = vadd.xlane.f32.xlu0 %v905_v45  ;;  %v1006_v43 = vmul.f32 %v1003_v20, %v1003_v20  ;;  %v1055_v45 = vsub.f32 %v2878_v18, %v2242_v61 }
 0x213   :  { %v1013_v26 = vsel %vm492_vm3, %v1006_v43, 0.0  ;;  %v1058_v40 = vmul.f32 %v1055_v45, %v1055_v45 }
 0x215   :  { %924 = vadd.xlane.f32.xlu1 %v923_v39  ;;  %936 = vadd.xlane.f32.xlu0 %v935_v58  ;;  %v1040_v39 = vmul.f32 %v1037_v47, %v1037_v47  ;;  %v1031_v58 = vsel %vm492_vm3, %v1024_v4, 0.0  ;;  %v1061_v59 = vsel %vm492_vm3, %v1058_v40, 0.0 }
 0x217   :  { %v1043_v19 = vsel %vm492_vm3, %v1040_v39, 0.0 }
 0x219   :  { %954 = vadd.xlane.f32.xlu1 %v953_v33  ;;  %942 = vadd.xlane.f32.xlu0 %v941_v23  ;;  %v1060_v33 = vmul.f32 %v1057_v9, %v1057_v9  ;;  %v1059_v23 = vmul.f32 %v1056_v30, %v1056_v30 }
 0x21b   :  { %v1067_v49 = vsel %vm492_vm3, %v1060_v33, 0.0  ;;  %v1064_v34 = vsel %vm492_vm3, %v1059_v23, 0.0 }
 0x21d   :  { %960 = vadd.xlane.f32.xlu1 %v959_v50  ;;  %972 = vadd.xlane.f32.xlu0 %v971_v1 }
 0x221   :  { %990 = vadd.xlane.f32.xlu1 %v989_v13  ;;  %978 = vadd.xlane.f32.xlu0 %v977_v44 }
 0x225   :  { %996 = vadd.xlane.f32.xlu1 %v995_v48  ;;  %1008 = vadd.xlane.f32.xlu0 %v1007_v12 }
 0x229   :  { %1026 = vadd.xlane.f32.xlu1 %v1025_v62  ;;  %1014 = vadd.xlane.f32.xlu0 %v1013_v26 }
 0x22d   :  { %1032 = vadd.xlane.f32.xlu1 %v1031_v58  ;;  %1044 = vadd.xlane.f32.xlu0 %v1043_v19 }
 0x231   :  { %1062 = vadd.xlane.f32.xlu1 %v1061_v59  ;;  %1050 = vadd.xlane.f32.xlu0 %v1049_v53 }
 0x235   :  { %1068 = vadd.xlane.f32.xlu1 %v1067_v49  ;;  %1065 = vadd.xlane.f32.xlu0 %v1064_v34 }
 0x266   :  { %v814_v5 = vpop.xlane.xlu0 %813  ;;  %v796_v50 = vpop.xlane.xlu1 %795 }
 0x267   :  { %v819_v1 = vadd.f32 %v814_v5, %v796_v50 }
 0x26a   :  { %v850_v29 = vpop.xlane.xlu0 %849  ;;  %v832_v3 = vpop.xlane.xlu1 %831 }
 0x26b   :  { %v837_v6 = vadd.f32 %v832_v3, %v819_v1 }
 0x26d   :  { %v855_v13 = vadd.f32 %v850_v29, %v837_v6 }
 0x26e   :  { %v886_v44 = vpop.xlane.xlu0 %885  ;;  %v868_v2 = vpop.xlane.xlu1 %867 }
 0x26f   :  { %v873_v46 = vadd.f32 %v868_v2, %v855_v13 }
 0x271   :  { %v891_v8 = vadd.f32 %v886_v44, %v873_v46 }
 0x272   :  { %v922_v20 = vpop.xlane.xlu0 %921  ;;  %v904_v63 = vpop.xlane.xlu1 %903 }
 0x273   :  { %v909_v47 = vadd.f32 %v904_v63, %v891_v8 }
 0x275   :  { %v927_v48 = vadd.f32 %v922_v20, %v909_v47 }
 0x276   :  { %v958_v12 = vpop.xlane.xlu0 %957  ;;  %v940_v17 = vpop.xlane.xlu1 %939 }
 0x277   :  { %v945_v43 = vadd.f32 %v940_v17, %v927_v48 }
 0x279   :  { %v963_v45 = vadd.f32 %v958_v12, %v945_v43 }
 0x27a   :  { %v994_v25 = vpop.xlane.xlu0 %993  ;;  %v976_v62 = vpop.xlane.xlu1 %975 }
 0x27b   :  { %v981_v26 = vadd.f32 %v976_v62, %v963_v45 }
 0x27d   :  { %v999_v4 = vadd.f32 %v994_v25, %v981_v26 }
 0x27e   :  { %v1030_v39 = vpop.xlane.xlu0 %1029  ;;  %v1012_v40 = vpop.xlane.xlu1 %1011 }
 0x27f   :  { %v1017_v57 = vadd.f32 %v1012_v40, %v999_v4 }
 0x281   :  { %v1035_v58 = vadd.f32 %v1030_v39, %v1017_v57 }
 0x282   :  { %v793_v19 = vpop.xlane.xlu0 %792  ;;  %v1048_v9 = vpop.xlane.xlu1 %1047 }
 0x286   :  { %v799_v30 = vpop.xlane.xlu0 %798  ;;  %v811_v59 = vpop.xlane.xlu1 %810 }
 0x287   :  { %v818_v2 = vadd.f32 %v811_v59, %v793_v19 }
 0x28a   :  { %v829_v53 = vpop.xlane.xlu0 %828  ;;  %v817_v33 = vpop.xlane.xlu1 %816 }
 0x28b   :  { %v836_v46 = vadd.f32 %v829_v53, %v818_v2  ;;  %v820_v63 = vadd.f32 %v817_v33, %v799_v30 }
 0x28e   :  { %v835_v23 = vpop.xlane.xlu0 %834  ;;  %v847_v49 = vpop.xlane.xlu1 %846 }
 0x28f   :  { %v854_v47 = vadd.f32 %v847_v49, %v836_v46  ;;  %v838_v48 = vadd.f32 %v835_v23, %v820_v63 }
 0x292   :  { %v865_v34 = vpop.xlane.xlu0 %864  ;;  %v853_v41 = vpop.xlane.xlu1 %852 }
 0x293   :  { %v872_v12 = vadd.f32 %v865_v34, %v854_v47  ;;  %v856_v45 = vadd.f32 %v853_v41, %v838_v48 }
 0x296   :  { %v871_v5 = vpop.xlane.xlu0 %870  ;;  %v883_v50 = vpop.xlane.xlu1 %882 }
 0x297   :  { %v890_v25 = vadd.f32 %v883_v50, %v872_v12  ;;  %v874_v62 = vadd.f32 %v871_v5, %v856_v45 }
 0x29a   :  { %v901_v1 = vpop.xlane.xlu0 %900  ;;  %v889_v29 = vpop.xlane.xlu1 %888 }
 0x29b   :  { %v908_v26 = vadd.f32 %v901_v1, %v890_v25  ;;  %v892_v40 = vadd.f32 %v889_v29, %v874_v62 }
 0x29e   :  { %v907_v3 = vpop.xlane.xlu0 %906  ;;  %v919_v6 = vpop.xlane.xlu1 %918 }
 0x29f   :  { %v926_v57 = vadd.f32 %v919_v6, %v908_v26  ;;  %v910_v56 = vadd.f32 %v907_v3, %v892_v40 }
 0x2a2   :  { %v937_v13 = vpop.xlane.xlu0 %936  ;;  %v925_v44 = vpop.xlane.xlu1 %924 }
 0x2a3   :  { %v944_v21 = vadd.f32 %v937_v13, %v926_v57  ;;  %v928_v53 = vadd.f32 %v925_v44, %v910_v56  ;;  %v1053_v56 = vadd.f32 %v1048_v9, %v1035_v58  ;;  %v1083_v9 = vld [vmem:[%s2766_s2 + $0x8] sm:$0xff] }
 0x2a6   :  { %v943_v8 = vpop.xlane.xlu0 %942  ;;  %v955_v20 = vpop.xlane.xlu1 %954 }
 0x2a7   :  { %v962_v2 = vadd.f32 %v955_v20, %v944_v21  ;;  %v946_v30 = vadd.f32 %v943_v8, %v928_v53  ;;  %v1084_v53 = vld [vmem:[%s2766_s2 + $0x10] sm:$0xff] }
 0x2aa   :  { %v973_v17 = vpop.xlane.xlu0 %972  ;;  %v961_v43 = vpop.xlane.xlu1 %960 }
 0x2ab   :  { %v980_v33 = vadd.f32 %v973_v17, %v962_v2  ;;  %v964_v34 = vadd.f32 %v961_v43, %v946_v30 }
 0x2ae   :  { %v979_v4 = vpop.xlane.xlu0 %978  ;;  %v991_v39 = vpop.xlane.xlu1 %990 }
 0x2af   :  { %v998_v46 = vadd.f32 %v991_v39, %v980_v33  ;;  %v982_v41 = vadd.f32 %v979_v4, %v964_v34  ;;  %v1082_v39 = vld [vmem:[%s2766_s2] sm:$0xff]  ;;  %v1089_v33 = vld [vmem:[%s2767_s3 + $0x8] sm:$0xff] }
 0x2b0   :  { %v1088_v34 = vld [vmem:[%s2767_s3] sm:$0xff] }
 0x2b2   :  { %v1009_v19 = vpop.xlane.xlu0 %1008  ;;  %v997_v59 = vpop.xlane.xlu1 %996 }
 0x2b3   :  { %v1016_v50 = vadd.f32 %v1009_v19, %v998_v46  ;;  %v1000_v63 = vadd.f32 %v997_v59, %v982_v41 }
 0x2b6   :  { %v1015_v23 = vpop.xlane.xlu0 %1014  ;;  %v1027_v49 = vpop.xlane.xlu1 %1026 }
 0x2b7   :  { %v1034_v47 = vadd.f32 %v1027_v49, %v1016_v50  ;;  %v1018_v29 = vadd.f32 %v1015_v23, %v1000_v63  ;;  %v1528_v63 = vld [vmem:[%s2765_s4 + $0x18] sm:$0xff] }
 0x2ba   :  { %v1045_v5 = vpop.xlane.xlu0 %1044  ;;  %v1033_v1 = vpop.xlane.xlu1 %1032 }
 0x2bb   :  { %v1052_v6 = vadd.f32 %v1045_v5, %v1034_v47  ;;  %v1036_v48 = vadd.f32 %v1033_v1, %v1018_v29 }
 0x2be   :  { %v1051_v3 = vpop.xlane.xlu0 %1050  ;;  %v1063_v13 = vpop.xlane.xlu1 %1062 }
 0x2bf   :  { %v1070_v12 = vadd.f32 %v1063_v13, %v1052_v6  ;;  %v1054_v21 = vadd.f32 %v1051_v3, %v1036_v48 }
 0x2c1   :  { %v1073_v44 = vmul.f32 0.03125, %v1070_v12 }
 0x2c2   :  { %v1066_v8 = vpop.xlane.xlu0 %1065  ;;  %v1069_v20 = vpop.xlane.xlu1 %1068 }
 0x2c3   :  { %v1076_v17 = vadd.f32 1e-05, %v1073_v44  ;;  %v1071_v43 = vadd.f32 %v1066_v8, %v1053_v56  ;;  %v1072_v45 = vadd.f32 %v1069_v20, %v1054_v21  ;;  %v1530_v56 = vld [vmem:[%s2765_s4 + $0xc0] sm:$0xff] }
 0x2c5   :  { %1521 = vrsqrt.f32 %v1076_v17  ;;  %v1074_v25 = vmul.f32 0.03125, %v1071_v43  ;;  %v1075_v62 = vmul.f32 0.03125, %v1072_v45  ;;  %v1533_v45 = vld [vmem:[%s2765_s4 + $0x8] sm:$0xff] }
 0x2c7   :  { %v1077_v26 = vadd.f32 1e-05, %v1074_v25  ;;  %v1078_v4 = vadd.f32 1e-05, %v1075_v62 }
 0x2c9   :  { %1523 = vrsqrt.f32 %v1077_v26 }
 0x2ca   :  { %1525 = vrsqrt.f32 %v1078_v4 }
 0x2cf   :  { %v1522_v40 = vpop.eup %1521 }
 0x2d0   :  { %v1085_v58 = vmul.f32 %v1522_v40, %v1082_v39 }
 0x2d2   :  { %1099 = vperm.xlu0 %1495, %v1085_v58   ;;  %v1091_v23 = vmul.f32 %v1085_v58, %v2242_v61  ;;  %v1527_v61 = vld [vmem:[%s2765_s4] sm:$0xff]  ;;  %v1537_v58 = vld [vmem:[%s2765_s4 + $0xc8] sm:$0xff] }
 0x2d3   :  { %v1524_v57 = vpop.eup %1523 }
 0x2d4   :  { %v1086_v19 = vmul.f32 %v1524_v57, %v1083_v9  ;;  %v1526_v59 = vpop.eup %1525  ;;  %v1094_v46 = vsub.f32 %v1088_v34, %v1091_v23  ;;  %v1538_v57 = vld [vmem:[%s2765_s4 + $0xe0] sm:$0xff] }
 0x2d5   :  { %v1087_v30 = vmul.f32 %v1526_v59, %v1084_v53 }
 0x2d6   :  { %1104 = vperm.xlu1 %1496, %v1086_v19   ;;  %v1092_v2 = vmul.f32 %v1086_v19, %v2208_v32  ;;  %v1090_v32 = vld [vmem:[%s2767_s3 + $0x10] sm:$0xff] }
 0x2d7   :  { %v1093_v41 = vmul.f32 %v1087_v30, %v2250_v10  ;;  %v1529_v10 = vld [vmem:[%s2765_s4 + $0x30] sm:$0xff] }
 0x2d8   :  { %v1095_v49 = vsub.f32 %v1089_v33, %v1092_v2 }
 0x2d9   :  { %v1096_v50 = vsub.f32 %v1090_v32, %v1093_v41 }
 0x2da   :  { %1109 = vperm.xlu1 %1496, %v1087_v30  }
 0x2de   :  { %1122 = vperm.xlu1 %1496, %v1095_v49   ;;  %v1542_v49 = vld [vmem:[%s2765_s4 + $0x10] sm:$0xff] }
 0x2e2   :  { %1117 = vperm.xlu1 %1496, %v1094_v46   ;;  %v1543_v46 = vld [vmem:[%s2765_s4 + $0x28] sm:$0xff] }
 0x2e6   :  { %1127 = vperm.xlu1 %1496, %v1096_v50   ;;  %v1546_v50 = vld [vmem:[%s2765_s4 + $0x70] sm:$0xff] }
 0x351   :  { %v1100_v5 = vpop.permute.xlu0 %1099 }
 0x352   :  { %v2382_v1 = vmul.f32 %v1527_v61, %v1100_v5  ;;  %v2387_v47 = vmul.f32 %v1528_v63, %v1100_v5  ;;  %v2392_v29 = vmul.f32 %v1529_v10, %v1100_v5  ;;  %v2395_v6 = vmul.f32 %v2854_v35, %v1100_v5  ;;  %v1531_v35 = vld [vmem:[%s2765_s4 + $0xd8] sm:$0xff] }
 0x353   :  { %v2398_v3 = vmul.f32 %v2857_v42, %v1100_v5  ;;  %v2401_v13 = vmul.f32 %v2858_v54, %v1100_v5  ;;  %v2404_v48 = vmul.f32 %v2861_v22, %v1100_v5  ;;  %v2407_v12 = vmul.f32 %v2862_v38, %v1100_v5  ;;  %v1532_v54 = vld [vmem:[%s2765_s4 + $0xf0] sm:$0xff] }
 0x354   :  { %v2412_v21 = vmul.f32 %v1530_v56, %v1100_v5  ;;  %v2417_v42 = vmul.f32 %v1531_v35, %v1100_v5  ;;  %v2422_v22 = vmul.f32 %v1532_v54, %v1100_v5  ;;  %v2425_v38 = vmul.f32 %v2870_v7, %v1100_v5  ;;  %v1534_v7 = vld [vmem:[%s2765_s4 + $0x20] sm:$0xff]  ;;  %v1547_v56 = vld [vmem:[%s2765_s4 + $0xd0] sm:$0xff]  ;;  %v1548_v54 = vld [vmem:[%s2765_s4 + $0xe8] sm:$0xff] }
 0x355   :  { %v2428_v44 = vmul.f32 %v2873_v60, %v1100_v5  ;;  %v2431_v8 = vmul.f32 %v2874_v28, %v1100_v5  ;;  %v2434_v20 = vmul.f32 %v2877_v52, %v1100_v5  ;;  %v2437_v17 = vmul.f32 %v2878_v18, %v1100_v5  ;;  %v1105_v43 = vpop.permute.xlu1 %1104  ;;  %v1535_v28 = vld [vmem:[%s2765_s4 + $0x38] sm:$0xff]  ;;  %v1536_v18 = vld [vmem:[%s2765_s4 + $0x50] sm:$0xff] }
 0x356   :  { %v1113_v25 = vmul.f32 %v1533_v45, %v1105_v43  ;;  %v1143_v60 = vmul.f32 %v1534_v7, %v1105_v43  ;;  %v1158_v52 = vmul.f32 %v1535_v28, %v1105_v43  ;;  %v1173_v62 = vmul.f32 %v1536_v18, %v1105_v43 }
 0x357   :  { %v1188_v26 = vmul.f32 %v2059_v14, %v1105_v43  ;;  %v1203_v4 = vmul.f32 %v2096_v27, %v1105_v43  ;;  %v1218_v39 = vmul.f32 %v2087_v24, %v1105_v43  ;;  %v1233_v40 = vmul.f32 %v2106_v31, %v1105_v43  ;;  %v1539_v14 = vld [vmem:[%s2765_s4 + $0xf8] sm:$0xff]  ;;  %v1540_v24 = vld [vmem:[%s2765_s4 + $0x110] sm:$0xff]  ;;  %v1541_v31 = vld [vmem:[%s2765_s4 + $0x128] sm:$0xff] }
 0x358   :  { %v1248_v9 = vmul.f32 %v1537_v58, %v1105_v43  ;;  %v1263_v19 = vmul.f32 %v1538_v57, %v1105_v43  ;;  %v1278_v59 = vmul.f32 %v1539_v14, %v1105_v43  ;;  %v1293_v27 = vmul.f32 %v1540_v24, %v1105_v43  ;;  %v2885_v58 = vld [vmem:[#allocation30_spill] sm:$0xff]  ;;  %v2886_v14 = vld [vmem:[#allocation33_spill] sm:$0xff] }
 0x359   :  { %v1308_v53 = vmul.f32 %v1541_v31, %v1105_v43  ;;  %v1323_v2 = vmul.f32 %v2148_v51, %v1105_v43  ;;  %v1338_v30 = vmul.f32 %v2171_v0, %v1105_v43  ;;  %v1353_v33 = vmul.f32 %v2881_v11, %v1105_v43  ;;  %v1110_v23 = vpop.permute.xlu1 %1109  ;;  %v1544_v51 = vld [vmem:[%s2765_s4 + $0x40] sm:$0xff]  ;;  %v1545_v11 = vld [vmem:[%s2765_s4 + $0x58] sm:$0xff] }
 0x35a   :  { %v2476_v34 = vmul.f32 %v1542_v49, %v1110_v23  ;;  %v2481_v41 = vmul.f32 %v1543_v46, %v1110_v23  ;;  %v2486_v0 = vmul.f32 %v1544_v51, %v1110_v23  ;;  %v2491_v32 = vmul.f32 %v1545_v11, %v1110_v23 }
 0x35b   :  { %v2496_v5 = vmul.f32 %v1546_v50, %v1110_v23  ;;  %v2499_v61 = vmul.f32 %v2860_v36, %v1110_v23  ;;  %v2502_v63 = vmul.f32 %v2863_v37, %v1110_v23  ;;  %v2505_v10 = vmul.f32 %v2864_v15, %v1110_v23  ;;  %v1549_v36 = vld [vmem:[%s2765_s4 + $0x100] sm:$0xff]  ;;  %v1550_v15 = vld [vmem:[%s2765_s4 + $0x118] sm:$0xff] }
 0x35c   :  { %v2510_v35 = vmul.f32 %v1547_v56, %v1110_v23  ;;  %v2515_v43 = vmul.f32 %v1548_v54, %v1110_v23  ;;  %v2520_v37 = vmul.f32 %v1549_v36, %v1110_v23  ;;  %v2525_v45 = vmul.f32 %v1550_v15, %v1110_v23 }
 0x35d   :  { %v1123_v7 = vpop.permute.xlu1 %1122  ;;  %v2528_v28 = vmul.f32 %v2875_v16, %v1110_v23  ;;  %v2531_v18 = vmul.f32 %v2876_v55, %v1110_v23  ;;  %v2534_v57 = vmul.f32 %v2885_v58, %v1110_v23  ;;  %v2537_v24 = vmul.f32 %v2886_v14, %v1110_v23 }
 0x35e   :  { %2882 = vst [vmem:[#allocation4_spill] sm:$0xff] %v2525_v45  ;;  %v1131_v31 = vadd.f32 %v1123_v7, %v1113_v25  ;;  %v1146_v49 = vadd.f32 %v1143_v60, %v1123_v7  ;;  %v1161_v46 = vadd.f32 %v1158_v52, %v1123_v7  ;;  %v1176_v51 = vadd.f32 %v1173_v62, %v1123_v7 }
 0x35f   :  { %2883 = vst [vmem:[#allocation3_spill] sm:$0xff] %v2528_v28  ;;  %2884 = vst [vmem:[#allocation9_spill] sm:$0xff] %v2531_v18  ;;  %v1191_v11 = vadd.f32 %v1188_v26, %v1123_v7  ;;  %v1206_v50 = vadd.f32 %v1203_v4, %v1123_v7  ;;  %v1221_v56 = vadd.f32 %v1218_v39, %v1123_v7 }
 0x360   :  { %v1236_v54 = vadd.f32 %v1233_v40, %v1123_v7  ;;  %v1134_v36 = vmax.f32 %v1131_v31, 0.0  ;;  %v1149_v16 = vmax.f32 %v1146_v49, 0.0  ;;  %v1164_v15 = vmax.f32 %v1161_v46, 0.0 }
 0x361   :  { %v1179_v28 = vmax.f32 %v1176_v51, 0.0  ;;  %v1194_v55 = vmax.f32 %v1191_v11, 0.0  ;;  %v1209_v18 = vmax.f32 %v1206_v50, 0.0  ;;  %v1224_v45 = vmax.f32 %v1221_v56, 0.0 }
 0x362   :  { %v1239_v58 = vmax.f32 %v1236_v54, 0.0  ;;  %1137 = vst.msk [vmem:[%s2765_s4 + $0x8] sm:$0xff] %vm492_vm3, %v1134_v36  ;;  %1152 = vst.msk [vmem:[%s2765_s4 + $0x20] sm:$0xff] %vm492_vm3, %v1149_v16  ;;  %v1251_v25 = vadd.f32 %v1248_v9, %v1123_v7  ;;  %v1266_v60 = vadd.f32 %v1263_v19, %v1123_v7  ;;  %v1281_v52 = vadd.f32 %v1278_v59, %v1123_v7  ;;  %v1118_v9 = vpop.permute.xlu1 %1117 }
 0x363   :  { %1167 = vst.msk [vmem:[%s2765_s4 + $0x38] sm:$0xff] %vm492_vm3, %v1164_v15  ;;  %1182 = vst.msk [vmem:[%s2765_s4 + $0x50] sm:$0xff] %vm492_vm3, %v1179_v28  ;;  %v1296_v62 = vadd.f32 %v1293_v27, %v1123_v7  ;;  %v1311_v26 = vadd.f32 %v1308_v53, %v1123_v7  ;;  %v1326_v4 = vadd.f32 %v1323_v2, %v1123_v7 }
 0x364   :  { %1197 = vst.msk [vmem:[%s2765_s4 + $0x68] sm:$0xff] %vm492_vm3, %v1194_v55  ;;  %1212 = vst.msk [vmem:[%s2765_s4 + $0x80] sm:$0xff] %vm492_vm3, %v1209_v18  ;;  %v1341_v39 = vadd.f32 %v1338_v30, %v1123_v7  ;;  %v1356_v40 = vadd.f32 %v1353_v33, %v1123_v7  ;;  %v1254_v19 = vmax.f32 %v1251_v25, 0.0  ;;  %v1269_v59 = vmax.f32 %v1266_v60, 0.0 }
 0x365   :  { %1227 = vst.msk [vmem:[%s2765_s4 + $0x98] sm:$0xff] %vm492_vm3, %v1224_v45  ;;  %1242 = vst.msk [vmem:[%s2765_s4 + $0xb0] sm:$0xff] %vm492_vm3, %v1239_v58  ;;  %v1284_v27 = vmax.f32 %v1281_v52, 0.0  ;;  %v1299_v23 = vmax.f32 %v1296_v62, 0.0  ;;  %v1314_v28 = vmax.f32 %v1311_v26, 0.0  ;;  %v1329_v18 = vmax.f32 %v1326_v4, 0.0 }
 0x366   :  { %v1344_v14 = vmax.f32 %v1341_v39, 0.0  ;;  %v1359_v31 = vmax.f32 %v1356_v40, 0.0  ;;  %1257 = vst.msk [vmem:[%s2765_s4 + $0xc8] sm:$0xff] %vm492_vm3, %v1254_v19  ;;  %1272 = vst.msk [vmem:[%s2765_s4 + $0xe0] sm:$0xff] %vm492_vm3, %v1269_v59  ;;  %v1130_v53 = vadd.f32 %v1118_v9, %v2382_v1  ;;  %v1145_v2 = vadd.f32 %v2387_v47, %v1118_v9  ;;  %v1128_v54 = vpop.permute.xlu1 %1127 }
 0x367   :  { %1287 = vst.msk [vmem:[%s2765_s4 + $0xf8] sm:$0xff] %vm492_vm3, %v1284_v27  ;;  %1302 = vst.msk [vmem:[%s2765_s4 + $0x110] sm:$0xff] %vm492_vm3, %v1299_v23  ;;  %v1160_v30 = vadd.f32 %v2392_v29, %v1118_v9  ;;  %v1175_v33 = vadd.f32 %v2395_v6, %v1118_v9  ;;  %v1190_v1 = vadd.f32 %v2398_v3, %v1118_v9 }
 0x368   :  { %1317 = vst.msk [vmem:[%s2765_s4 + $0x128] sm:$0xff] %vm492_vm3, %v1314_v28  ;;  %1332 = vst.msk [vmem:[%s2765_s4 + $0x140] sm:$0xff] %vm492_vm3, %v1329_v18  ;;  %v1205_v47 = vadd.f32 %v2401_v13, %v1118_v9  ;;  %v1220_v29 = vadd.f32 %v2404_v48, %v1118_v9  ;;  %v1235_v6 = vadd.f32 %v2407_v12, %v1118_v9  ;;  %v1133_v45 = vmax.f32 %v1130_v53, 0.0 }
 0x369   :  { %1347 = vst.msk [vmem:[%s2765_s4 + $0x158] sm:$0xff] %vm492_vm3, %v1344_v14  ;;  %1362 = vst.msk [vmem:[%s2765_s4 + $0x170] sm:$0xff] %vm492_vm3, %v1359_v31  ;;  %v1148_v7 = vmax.f32 %v1145_v2, 0.0  ;;  %v1163_v49 = vmax.f32 %v1160_v30, 0.0  ;;  %v1178_v46 = vmax.f32 %v1175_v33, 0.0  ;;  %v1193_v51 = vmax.f32 %v1190_v1, 0.0 }
 0x36a   :  { %v1208_v11 = vmax.f32 %v1205_v47, 0.0  ;;  %v1223_v50 = vmax.f32 %v1220_v29, 0.0  ;;  %v1238_v56 = vmax.f32 %v1235_v6, 0.0  ;;  %1136 = vst.msk [vmem:[%s2765_s4] sm:$0xff] %vm492_vm3, %v1133_v45  ;;  %v1250_v3 = vadd.f32 %v2412_v21, %v1118_v9 }
 0x36b   :  { %1151 = vst.msk [vmem:[%s2765_s4 + $0x18] sm:$0xff] %vm492_vm3, %v1148_v7  ;;  %1166 = vst.msk [vmem:[%s2765_s4 + $0x30] sm:$0xff] %vm492_vm3, %v1163_v49  ;;  %v1265_v13 = vadd.f32 %v2417_v42, %v1118_v9  ;;  %v1280_v48 = vadd.f32 %v2422_v22, %v1118_v9  ;;  %v1295_v12 = vadd.f32 %v2425_v38, %v1118_v9 }
 0x36c   :  { %1181 = vst.msk [vmem:[%s2765_s4 + $0x48] sm:$0xff] %vm492_vm3, %v1178_v46  ;;  %1196 = vst.msk [vmem:[%s2765_s4 + $0x60] sm:$0xff] %vm492_vm3, %v1193_v51  ;;  %v1310_v21 = vadd.f32 %v2428_v44, %v1118_v9  ;;  %v1325_v42 = vadd.f32 %v2431_v8, %v1118_v9  ;;  %v1340_v22 = vadd.f32 %v2434_v20, %v1118_v9  ;;  %v1253_v36 = vmax.f32 %v1250_v3, 0.0 }
 0x36d   :  { %1211 = vst.msk [vmem:[%s2765_s4 + $0x78] sm:$0xff] %vm492_vm3, %v1208_v11  ;;  %1226 = vst.msk [vmem:[%s2765_s4 + $0x90] sm:$0xff] %vm492_vm3, %v1223_v50  ;;  %v1355_v38 = vadd.f32 %v2437_v17, %v1118_v9  ;;  %v1268_v16 = vmax.f32 %v1265_v13, 0.0  ;;  %v1283_v15 = vmax.f32 %v1280_v48, 0.0  ;;  %v1298_v55 = vmax.f32 %v1295_v12, 0.0 }
 0x36e   :  { %1241 = vst.msk [vmem:[%s2765_s4 + $0xa8] sm:$0xff] %vm492_vm3, %v1238_v56  ;;  %v1313_v58 = vmax.f32 %v1310_v21, 0.0  ;;  %v1328_v25 = vmax.f32 %v1325_v42, 0.0  ;;  %v1343_v60 = vmax.f32 %v1340_v22, 0.0  ;;  %1256 = vst.msk [vmem:[%s2765_s4 + $0xc0] sm:$0xff] %vm492_vm3, %v1253_v36  ;;  %v1132_v44 = vadd.f32 %v1128_v54, %v2476_v34 }
 0x36f   :  { %v1358_v52 = vmax.f32 %v1355_v38, 0.0  ;;  %1271 = vst.msk [vmem:[%s2765_s4 + $0xd8] sm:$0xff] %vm492_vm3, %v1268_v16  ;;  %1286 = vst.msk [vmem:[%s2765_s4 + $0xf0] sm:$0xff] %vm492_vm3, %v1283_v15  ;;  %v1147_v8 = vadd.f32 %v2481_v41, %v1128_v54  ;;  %v1162_v20 = vadd.f32 %v2486_v0, %v1128_v54  ;;  %v1177_v17 = vadd.f32 %v2491_v32, %v1128_v54 }
 0x370   :  { %1301 = vst.msk [vmem:[%s2765_s4 + $0x108] sm:$0xff] %vm492_vm3, %v1298_v55  ;;  %1316 = vst.msk [vmem:[%s2765_s4 + $0x120] sm:$0xff] %vm492_vm3, %v1313_v58  ;;  %v1192_v34 = vadd.f32 %v2496_v5, %v1128_v54  ;;  %v1207_v41 = vadd.f32 %v2499_v61, %v1128_v54  ;;  %v1222_v0 = vadd.f32 %v2502_v63, %v1128_v54  ;;  %v1135_v62 = vmax.f32 %v1132_v44, 0.0 }
 0x371   :  { %1331 = vst.msk [vmem:[%s2765_s4 + $0x138] sm:$0xff] %vm492_vm3, %v1328_v25  ;;  %1346 = vst.msk [vmem:[%s2765_s4 + $0x150] sm:$0xff] %vm492_vm3, %v1343_v60  ;;  %v1237_v32 = vadd.f32 %v2505_v10, %v1128_v54  ;;  %v1150_v26 = vmax.f32 %v1147_v8, 0.0  ;;  %v1165_v4 = vmax.f32 %v1162_v20, 0.0  ;;  %v1180_v39 = vmax.f32 %v1177_v17, 0.0  ;;  %v2887_v10 = vld [vmem:[#allocation4_spill] sm:$0xff] }
 0x372   :  { %1361 = vst.msk [vmem:[%s2765_s4 + $0x168] sm:$0xff] %vm492_vm3, %v1358_v52  ;;  %v1195_v40 = vmax.f32 %v1192_v34, 0.0  ;;  %v1210_v9 = vmax.f32 %v1207_v41, 0.0  ;;  %v1225_v19 = vmax.f32 %v1222_v0, 0.0  ;;  %1138 = vst.msk [vmem:[%s2765_s4 + $0x10] sm:$0xff] %vm492_vm3, %v1135_v62  ;;  %v1252_v5 = vadd.f32 %v2510_v35, %v1128_v54  ;;  %v2888_v35 = vld [vmem:[#allocation3_spill] sm:$0xff] }
 0x373   :  { %v1240_v59 = vmax.f32 %v1237_v32, 0.0  ;;  %1153 = vst.msk [vmem:[%s2765_s4 + $0x28] sm:$0xff] %vm492_vm3, %v1150_v26  ;;  %1168 = vst.msk [vmem:[%s2765_s4 + $0x40] sm:$0xff] %vm492_vm3, %v1165_v4  ;;  %v1267_v61 = vadd.f32 %v2515_v43, %v1128_v54  ;;  %v1282_v63 = vadd.f32 %v2520_v37, %v1128_v54  ;;  %v1297_v27 = vadd.f32 %v2887_v10, %v1128_v54  ;;  %v2889_v37 = vld [vmem:[#allocation9_spill] sm:$0xff] }
 0x374   :  { %1183 = vst.msk [vmem:[%s2765_s4 + $0x58] sm:$0xff] %vm492_vm3, %v1180_v39  ;;  %1198 = vst.msk [vmem:[%s2765_s4 + $0x70] sm:$0xff] %vm492_vm3, %v1195_v40  ;;  %v1312_v43 = vadd.f32 %v2888_v35, %v1128_v54  ;;  %v1327_v23 = vadd.f32 %v2889_v37, %v1128_v54  ;;  %v1342_v28 = vadd.f32 %v2534_v57, %v1128_v54  ;;  %v1255_v14 = vmax.f32 %v1252_v5, 0.0 }
 0x375   :  { %1213 = vst.msk [vmem:[%s2765_s4 + $0x88] sm:$0xff] %vm492_vm3, %v1210_v9  ;;  %1228 = vst.msk [vmem:[%s2765_s4 + $0xa0] sm:$0xff] %vm492_vm3, %v1225_v19  ;;  %v1357_v18 = vadd.f32 %v2537_v24, %v1128_v54  ;;  %v1270_v31 = vmax.f32 %v1267_v61, 0.0  ;;  %v1285_v53 = vmax.f32 %v1282_v63, 0.0  ;;  %v1300_v2 = vmax.f32 %v1297_v27, 0.0 }
 0x376   :  { %1243 = vst.msk [vmem:[%s2765_s4 + $0xb8] sm:$0xff] %vm492_vm3, %v1240_v59  ;;  %v1315_v30 = vmax.f32 %v1312_v43, 0.0  ;;  %v1330_v33 = vmax.f32 %v1327_v23, 0.0  ;;  %v1345_v1 = vmax.f32 %v1342_v28, 0.0  ;;  %1258 = vst.msk [vmem:[%s2765_s4 + $0xd0] sm:$0xff] %vm492_vm3, %v1255_v14 }
 0x377   :  { %v1360_v47 = vmax.f32 %v1357_v18, 0.0  ;;  %1273 = vst.msk [vmem:[%s2765_s4 + $0xe8] sm:$0xff] %vm492_vm3, %v1270_v31  ;;  %1288 = vst.msk [vmem:[%s2765_s4 + $0x100] sm:$0xff] %vm492_vm3, %v1285_v53 }
 0x378   :  { %1303 = vst.msk [vmem:[%s2765_s4 + $0x118] sm:$0xff] %vm492_vm3, %v1300_v2  ;;  %1318 = vst.msk [vmem:[%s2765_s4 + $0x130] sm:$0xff] %vm492_vm3, %v1315_v30 }
 0x379   :  { %1333 = vst.msk [vmem:[%s2765_s4 + $0x148] sm:$0xff] %vm492_vm3, %v1330_v33  ;;  %1348 = vst.msk [vmem:[%s2765_s4 + $0x160] sm:$0xff] %vm492_vm3, %v1345_v1 }
 0x37a   :  { %1363 = vst.msk [vmem:[%s2765_s4 + $0x178] sm:$0xff] %vm492_vm3, %v1360_v47 }

// kernel: generator_forward.7
= control target key start
LH: loop header
LB: loop body
LE: loop exit
PB: predicated region body
PF: predicated region fallthrough
CT: control target
= control target key end

     0   :  { %9 = vsyncpa [#allocation3], 0  ;;  %s328_s15 = smov [#allocation2]   ;;  %s450_s0 = inlined_call_operand.hbm [shape: bf16[24,108], index: 0, kind: input, shape index: {}]   ;;  %s451_s1 = inlined_call_operand.vmem [shape: bf16[108,128], index: 1, kind: input, shape index: {}]   ;;  %s452_s2 = inlined_call_operand.vmem [shape: f32[6,1], index: 2, kind: input, shape index: {}]   ;;  %s453_s3 = inlined_call_operand.vmem [shape: f32[6,1], index: 3, kind: input, shape index: {}]   ;;  %s454_s4 = inlined_call_operand.vmem [shape: f32[24,128], index: 4, kind: output, shape index: {}]  }
   0x1   :  { %s15_s16 = sshll.u32 %s328_s15, 4  ;;  %s304_s19 = scalar_lea.hbm %s450_s0, 192  ;;  %s16_s16 = int_to_ptr.vmem [resolvable:$true] %s15_s16 }
   0x2   :  { %p305_p0 = scmp.ne.s32.totalorder %s450_s0, %s304_s19  ;;  %p308_p1 = scmp.lt.u32.totalorder %s304_s19, %s450_s0 }
   0x4   :  { %p310_p2 = pnand %p308_p1, %p305_p0 }
   0x6   :  { %313 = shalt.err (!%p310_p2)
}
   0x7   :  { %s314_s24 = scalar_lea.vmem %s16_s16, 192  ;;  %p319_p4 = scmp.lt.s32.totalorder %s16_s16, %s16_s16 }
   0x8   :  { %p315_p3 = scmp.ne.s32.totalorder %s16_s16, %s314_s24  ;;  %p320_p5 = scmp.lt.s32.totalorder %s314_s24, %s314_s24 }
   0xa   :  { %p321_p6 = por %p320_p5, %p319_p4 }
   0xc   :  { %p322_p7 = pnand %p321_p6, %p315_p3 }
   0xe   :  { %325 = shalt.err (!%p322_p7)
}
   0xf   :  { %s329_s25 = smov 64   ;;  %s330_s26 = smov 4  }
  0x10   :  { %21 = dma.hbm_to_vmem [thread:$0]  %s450_s0, 192, %s16_s16, [#allocation3], %s329_s25, %s329_s25, %s330_s26  }
  0x11   :  { %326 = dma.done.wait [#allocation3], 192  }
  0x12   :  { %327 = vsyncadd [#allocation3], 4294967104  ;;  %v293_v0 = vld [vmem:[%s451_s1] sm:$0xff]   ;;  %v294_v1 = vld [vmem:[%s451_s1 + $0x8] sm:$0xff]   ;;  %vm98_vm0 = vcmask 883712   ;;  %vm105_vm1 = vcmask 1045504  }
  0x13   :  { %268 = vmatprep.subr.bf16.mxu0 %v293_v0  ;;  %v295_v2 = vld [vmem:[%s451_s1 + $0x10] sm:$0xff]   ;;  %v300_v3 = vld [vmem:[#allocation2] sm:$0xff]   ;;  %v296_v4 = vld [vmem:[%s451_s1 + $0x18] sm:$0xff]   ;;  %v331_v42 = vmov 0  }
  0x14   :  { %269 = vmatpush3.bf16.msra.mxu0 %v293_v0  ;;  %282 = vmatprep.mubr.msk.bf16.mxu0 %vm98_vm0, %v300_v3  ;;  %v297_v5 = vld [vmem:[%s451_s1 + $0x20] sm:$0xff]   ;;  %v298_v6 = vld [vmem:[%s451_s1 + $0x28] sm:$0xff]   ;;  %v299_v7 = vld [vmem:[%s451_s1 + $0x30] sm:$0x3f]  }
  0x15   :  { %270 = vmatprep.subr.bf16.mxu0 %v294_v1  ;;  %v107_v8 = vsel %vm105_vm1, %v299_v7, 0  ;;  %v301_v9 = vld [vmem:[#allocation2 + $0x8] ss:$0 sps:$4 sm:$0xff]   ;;  %291 = vset.pattern.permute.xlu0 %v331_v42  ;;  %v209_v52 = vld [vmem:[%s452_s2] sm:$0x3f] }
  0x16   :  { %292 = vset.pattern.permute.xlu1 %v331_v42  ;;  %v211_v55 = vld [vmem:[%s453_s3] sm:$0x3f] }
  0x18   :  { %271 = vmatpush3.bf16.msra.mxu0 %v294_v1 }
  0x19   :  { %272 = vmatprep.subr.bf16.mxu0 %v295_v2 }
  0x1c   :  { %273 = vmatpush3.bf16.msra.mxu0 %v295_v2 }
  0x1d   :  { %274 = vmatprep.subr.bf16.mxu0 %v296_v4 }
  0x20   :  { %275 = vmatpush3.bf16.msra.mxu0 %v296_v4 }
  0x21   :  { %276 = vmatprep.subr.bf16.mxu0 %v297_v5 }
  0x24   :  { %277 = vmatpush3.bf16.msra.mxu0 %v297_v5 }
  0x25   :  { %278 = vmatprep.subr.bf16.mxu0 %v298_v6 }
  0x28   :  { %279 = vmatpush3.bf16.msra.mxu0 %v298_v6 }
  0x29   :  { %286 = vmatprep.subr.msk.bf16.mxu0 %vm105_vm1, %v299_v7 }
  0x2c   :  { %281 = vmatpush3.bf16.msra.mxu0 %v107_v8 }
  0x2f   :  { %283 = vmatmul.mubr.msk.bf16.vlgmr.msra.gmra.mrb[0].mxu0 %vm98_vm0, %v301_v9 }
 0x102   :  { %v284_v10 = vpop.f32.mrb[0].mxu0 }
 0x103   :  { %159 = vst [vmem:[%s454_s4 + $0x10] sm:$0xff] %v284_v10  ;;  %v143_v11 = vpop.f32.mrb[1].mxu0 }
 0x104   :  { %157 = vst [vmem:[%s454_s4] sm:$0xff] %v143_v11  ;;  %v285_v12 = vpop.f32.mrb[2].mxu0 }
 0x105   :  { %v146_v13 = vpop.f32.mrb[3].mxu0 }
 0x106   :  { %158 = vst [vmem:[%s454_s4 + $0x8] sm:$0xff] %v146_v13 }
 0x10a   :  { %v175_v19 = vld [vmem:[%s454_s4 + $0x12] sm:$0x3f] }
 0x10b   :  { %v160_v14 = vld [vmem:[%s454_s4] sm:$0x3f]  ;;  %v176_v21 = vsel %vm105_vm1, %v175_v19, 0.0  ;;  %v238_v61 = vld [vmem:[%s454_s4 + $0x12] sm:$0x3f] }
 0x10c   :  { %v161_v15 = vsel %vm105_vm1, %v160_v14, 0.0 }
 0x10d   :  { %162 = vadd.xlane.f32.xlu0 %v161_v15  ;;  %v170_v16 = vld [vmem:[%s454_s4 + $0xc] sm:$0x3f]  ;;  %v165_v17 = vld [vmem:[%s454_s4 + $0x6] sm:$0x3f] }
 0x10e   :  { %v171_v18 = vsel %vm105_vm1, %v170_v16, 0.0  ;;  %v166_v20 = vsel %vm105_vm1, %v165_v17, 0.0  ;;  %v228_v59 = vld [vmem:[%s454_s4 + $0x6] sm:$0x3f]  ;;  %v233_v60 = vld [vmem:[%s454_s4 + $0xc] sm:$0x3f] }
 0x10f   :  { %172 = vadd.xlane.f32.xlu1 %v171_v18 }
 0x111   :  { %167 = vadd.xlane.f32.xlu0 %v166_v20 }
 0x113   :  { %177 = vadd.xlane.f32.xlu1 %v176_v21 }
 0x19a   :  { %v163_v22 = vpop.xlane.xlu0 %162 }
 0x19c   :  { %v173_v23 = vpop.xlane.xlu1 %172 }
 0x19e   :  { %v168_v24 = vpop.xlane.xlu0 %167 }
 0x19f   :  { %v169_v25 = vadd.f32 %v168_v24, %v163_v22 }
 0x1a0   :  { %v178_v27 = vpop.xlane.xlu1 %177 }
 0x1a1   :  { %v174_v26 = vadd.f32 %v173_v23, %v169_v25 }
 0x1a3   :  { %v179_v28 = vadd.f32 %v178_v27, %v174_v26 }
 0x1a5   :  { %v181_v29 = vmul.f32 0.001953125, %v179_v28 }
 0x1a7   :  { %v188_v30 = vsub.f32 %v165_v17, %v181_v29  ;;  %v182_v31 = vsub.f32 %v160_v14, %v181_v29  ;;  %v200_v32 = vsub.f32 %v175_v19, %v181_v29  ;;  %v194_v33 = vsub.f32 %v170_v16, %v181_v29 }
 0x1a9   :  { %v189_v34 = vmul.f32 %v188_v30, %v188_v30  ;;  %v183_v35 = vmul.f32 %v182_v31, %v182_v31  ;;  %v201_v38 = vmul.f32 %v200_v32, %v200_v32  ;;  %v195_v39 = vmul.f32 %v194_v33, %v194_v33 }
 0x1ab   :  { %v190_v36 = vsel %vm105_vm1, %v189_v34, 0.0  ;;  %v184_v37 = vsel %vm105_vm1, %v183_v35, 0.0  ;;  %v202_v40 = vsel %vm105_vm1, %v201_v38, 0.0  ;;  %v196_v41 = vsel %vm105_vm1, %v195_v39, 0.0 }
 0x1ac   :  { %191 = vadd.xlane.f32.xlu1 %v190_v36  ;;  %185 = vadd.xlane.f32.xlu0 %v184_v37 }
 0x1b0   :  { %203 = vadd.xlane.f32.xlu1 %v202_v40  ;;  %197 = vadd.xlane.f32.xlu0 %v196_v41 }
 0x239   :  { %v192_v43 = vpop.xlane.xlu1 %191  ;;  %v186_v44 = vpop.xlane.xlu0 %185 }
 0x23a   :  { %v193_v45 = vadd.f32 %v192_v43, %v186_v44 }
 0x23d   :  { %v198_v46 = vpop.xlane.xlu0 %197  ;;  %v204_v48 = vpop.xlane.xlu1 %203 }
 0x23e   :  { %v199_v47 = vadd.f32 %v198_v46, %v193_v45 }
 0x240   :  { %v205_v49 = vadd.f32 %v204_v48, %v199_v47 }
 0x242   :  { %v206_v50 = vmul.f32 0.001953125, %v205_v49 }
 0x244   :  { %v207_v51 = vadd.f32 1e-05, %v206_v50 }
 0x246   :  { %302 = vrsqrt.f32 %v207_v51 }
 0x250   :  { %v303_v53 = vpop.eup %302 }
 0x251   :  { %v210_v54 = vmul.f32 %v303_v53, %v209_v52 }
 0x253   :  { %216 = vperm.xlu0 %291, %v210_v54   ;;  %v212_v56 = vmul.f32 %v210_v54, %v181_v29 }
 0x255   :  { %v213_v57 = vsub.f32 %v211_v55, %v212_v56 }
 0x257   :  { %222 = vperm.xlu1 %292, %v213_v57  }
 0x2d2   :  { %v217_v58 = vpop.permute.xlu0 %216 }
 0x2d3   :  { %v219_v62 = vmul.f32 %v217_v58, %v160_v14  ;;  %v229_v63 = vmul.f32 %v228_v59, %v217_v58  ;;  %v234_v0 = vmul.f32 %v233_v60, %v217_v58  ;;  %v239_v1 = vmul.f32 %v238_v61, %v217_v58 }
 0x2d6   :  { %v223_v2 = vpop.permute.xlu1 %222 }
 0x2d7   :  { %v225_v3 = vadd.f32 %v223_v2, %v219_v62  ;;  %v230_v4 = vadd.f32 %v229_v63, %v223_v2  ;;  %v235_v5 = vadd.f32 %v234_v0, %v223_v2  ;;  %v240_v6 = vadd.f32 %v239_v1, %v223_v2 }
 0x2d9   :  { %v226_v7 = vmax.f32 %v225_v3, 0.0  ;;  %v231_v8 = vmax.f32 %v230_v4, 0.0  ;;  %v236_v9 = vmax.f32 %v235_v5, 0.0  ;;  %v241_v10 = vmax.f32 %v240_v6, 0.0 }
 0x2db   :  { %227 = vst [vmem:[%s454_s4] sm:$0x3f] %v226_v7  ;;  %232 = vst [vmem:[%s454_s4 + $0x6] sm:$0x3f] %v231_v8 }
 0x2dc   :  { %237 = vst [vmem:[%s454_s4 + $0xc] sm:$0x3f] %v236_v9  ;;  %242 = vst [vmem:[%s454_s4 + $0x12] sm:$0x3f] %v241_v10 }
 0x2dd   :  { %247 = vsyncpa [#allocation3], 1 }

// kernel: generator_forward.8
= control target key start
LH: loop header
LB: loop body
LE: loop exit
PB: predicated region body
PF: predicated region fallthrough
CT: control target
= control target key end

     0   :  { %v599_v1 = vmov 0   ;;  %vm113_vm0 = vcmask 1042432   ;;  %vm109_vm1 = vcmask 441344   ;;  %vm238_vm2 = vcmask 1045507   ;;  %s986_s1 = inlined_call_operand.vmem [shape: bf16[54,512], index: 1, kind: input, shape index: {}]   ;;  %s987_s0 = inlined_call_operand.vmem [shape: bf16[12,54], index: 0, kind: input, shape index: {}]   ;;  %s988_s4 = inlined_call_operand.vmem [shape: f32[12,512], index: 4, kind: output, shape index: {}]   ;;  %s989_s2 = inlined_call_operand.vmem [shape: f32[3,1], index: 2, kind: input, shape index: {}]   ;;  %s990_s3 = inlined_call_operand.vmem [shape: f32[3,1], index: 3, kind: input, shape index: {}]  }
   0x1   :  { %v574_v0 = vld [vmem:[%s986_s1 + $0x4] ss:$16 sps:$4 sm:$0xff]   ;;  %158 = vmatprep.mubr.bf16.mxu0 %v599_v1  ;;  %201 = vmatprep.mubr.bf16.mxu1 %v599_v1  ;;  %v576_v2 = vld [vmem:[%s986_s1 + $0xc] ss:$16 sps:$4 sm:$0xff]   ;;  %v578_v3 = vld [vmem:[%s986_s1] ss:$16 sps:$4 sm:$0xff]  }
   0x2   :  { %572 = vset.pattern.permute.xlu1 %v599_v1  ;;  %573 = vset.pattern.permute.xlu0 %v599_v1  ;;  %v579_v4 = vld [vmem:[%s986_s1 + $0x8] ss:$16 sps:$4 sm:$0xff]   ;;  %v580_v5 = vld [vmem:[%s986_s1 + $0x24] ss:$16 sps:$4 sm:$0xff]   ;;  %v582_v6 = vld [vmem:[%s986_s1 + $0x2c] ss:$16 sps:$4 sm:$0xff]  }
   0x3   :  { %126 = vmatprep.subr.bf16.mxu0 %v574_v0  ;;  %169 = vmatprep.subr.bf16.mxu1 %v576_v2  ;;  %v584_v7 = vld [vmem:[%s986_s1 + $0x20] ss:$16 sps:$4 sm:$0xff]   ;;  %v585_v8 = vld [vmem:[%s986_s1 + $0x28] ss:$16 sps:$4 sm:$0xff]   ;;  %v586_v9 = vld [vmem:[%s986_s1 + $0x44] ss:$16 sps:$4 sm:$0xff]  }
   0x4   :  { %127 = vmatpush1.bf16.msra.mxu0 %v578_v3  ;;  %170 = vmatpush1.bf16.msra.mxu1 %v579_v4  ;;  %v588_v10 = vld [vmem:[%s986_s1 + $0x4c] ss:$16 sps:$4 sm:$0xff]   ;;  %v590_v11 = vld [vmem:[%s986_s1 + $0x40] ss:$16 sps:$4 sm:$0xff]   ;;  %v591_v12 = vld [vmem:[%s986_s1 + $0x48] ss:$16 sps:$4 sm:$0xff]  }
   0x5   :  { %128 = vmatprep.subr.bf16.mxu0 %v580_v5  ;;  %171 = vmatprep.subr.bf16.mxu1 %v582_v6  ;;  %v32_v13 = vld [vmem:[%s986_s1 + $0x60] sm:$0x77]  ;;  %v33_v14 = vld [vmem:[%s986_s1 + $0x68] sm:$0x77]  ;;  %vm270_vm3 = vcmask 1040384   ;;  %vm260_vm4 = vcmask 1047558  }
   0x6   :  { %v564_v15 = vcombine.high %v32_v13, %v32_v13  ;;  %v566_v16 = vcombine.high %v33_v14, %v33_v14  ;;  %v563_v17 = vcombine.low %v32_v13, %v32_v13  ;;  %v565_v18 = vcombine.low %v33_v14, %v33_v14  ;;  %v596_v21 = vld [vmem:[%s987_s0] sm:$0x3f]  }
   0x7   :  { %vm292_vm5 = vcmask 1043457   ;;  %vm282_vm6 = vcmask 1041408  }
   0x8   :  { %129 = vmatpush1.bf16.msra.mxu0 %v584_v7  ;;  %172 = vmatpush1.bf16.msra.mxu1 %v585_v8  ;;  %v115_v19 = vsel %vm113_vm0, %v563_v17, 0  ;;  %v121_v20 = vsel %vm113_vm0, %v565_v18, 0 }
   0x9   :  { %130 = vmatprep.subr.bf16.mxu0 %v586_v9  ;;  %173 = vmatprep.subr.bf16.mxu1 %v588_v10 }
   0xc   :  { %131 = vmatpush1.bf16.msra.mxu0 %v590_v11  ;;  %174 = vmatpush1.bf16.msra.mxu1 %v591_v12 }
   0xd   :  { %567 = vmatprep.subr.msk.bf16.mxu0 %vm113_vm0, %v564_v15  ;;  %569 = vmatprep.subr.msk.bf16.mxu1 %vm113_vm0, %v566_v16 }
  0x10   :  { %133 = vmatpush1.bf16.msra.mxu0 %v115_v19  ;;  %176 = vmatpush1.bf16.msra.mxu1 %v121_v20 }
  0x13   :  { %568 = vmatmul.mubr.msk.bf16.vlgmr.msra.gmra.mrb[0].mxu0 %vm109_vm1, %v596_v21  ;;  %570 = vmatmul.mubr.msk.bf16.vlgmr.msra.gmra.mrb[0].mxu1 %vm109_vm1, %v596_v21 }
  0xe6   :  { %v160_v22 = vpop.f32.mrb[0].mxu0  ;;  %v203_v23 = vpop.f32.mrb[0].mxu1 }
  0xe7   :  { %212 = vst [vmem:[%s988_s4] sm:$0xff] %v160_v22  ;;  %214 = vst [vmem:[%s988_s4 + $0x10] sm:$0xff] %v203_v23  ;;  %v162_v24 = vpop.f32.mrb[1].mxu0  ;;  %v205_v25 = vpop.f32.mrb[1].mxu1 }
  0xe8   :  { %213 = vst [vmem:[%s988_s4 + $0x8] sm:$0xff] %v162_v24  ;;  %215 = vst [vmem:[%s988_s4 + $0x18] sm:$0xff] %v205_v25  ;;  %v164_v26 = vpop.f32.mrb[2].mxu0  ;;  %v207_v27 = vpop.f32.mrb[2].mxu1 }
  0xe9   :  { %216 = vst [vmem:[%s988_s4 + $0x20] sm:$0xf] %v164_v26  ;;  %218 = vst [vmem:[%s988_s4 + $0x30] sm:$0xf] %v207_v27  ;;  %v166_v28 = vpop.f32.mrb[3].mxu0  ;;  %v209_v29 = vpop.f32.mrb[3].mxu1 }
  0xea   :  { %217 = vst [vmem:[%s988_s4 + $0x28] sm:$0xf] %v166_v28  ;;  %219 = vst [vmem:[%s988_s4 + $0x38] sm:$0xf] %v209_v29 }
  0xee   :  { %v701_v30 = vld [vmem:[%s988_s4] sm:$0x38]  ;;  %v711_v32 = vld [vmem:[%s988_s4 + $0x10] sm:$0x38]  ;;  %v748_v44 = vld [vmem:[%s988_s4] sm:$0xc0] }
  0xef   :  { %v706_v31 = vld [vmem:[%s988_s4 + $0x8] sm:$0x38]  ;;  %v716_v33 = vld [vmem:[%s988_s4 + $0x18] sm:$0x38]  ;;  %v239_v34 = vsel %vm238_vm2, %v701_v30, 0.0  ;;  %v242_v36 = vsel %vm238_vm2, %v711_v32, 0.0 }
  0xf0   :  { %v240_v35 = vsel %vm238_vm2, %v706_v31, 0.0  ;;  %v727_v37 = vld [vmem:[%s988_s4 + $0x20] sm:$0x1]  ;;  %v737_v40 = vld [vmem:[%s988_s4 + $0x30] sm:$0x1]  ;;  %v244_v41 = vsel %vm238_vm2, %v716_v33, 0.0 }
  0xf1   :  { %v241_v38 = vadd.f32 %v240_v35, %v239_v34  ;;  %v732_v39 = vld [vmem:[%s988_s4 + $0x28] sm:$0x1]  ;;  %v271_v42 = vsel %vm270_vm3, %v727_v37, 0.0  ;;  %v753_v46 = vld [vmem:[%s988_s4 + $0x38] sm:$0x1]  ;;  %v274_v50 = vsel %vm270_vm3, %v737_v40, 0.0 }
  0xf2   :  { %v272_v43 = vsel %vm270_vm3, %v732_v39, 0.0  ;;  %v758_v48 = vld [vmem:[%s988_s4 + $0x8] sm:$0xc0]  ;;  %v763_v49 = vld [vmem:[%s988_s4 + $0x10] sm:$0xc0]  ;;  %v261_v51 = vsel %vm260_vm4, %v748_v44, 0.0 }
  0xf3   :  { %v243_v45 = vadd.f32 %v242_v36, %v241_v38  ;;  %v273_v47 = vadd.f32 %v272_v43, %v271_v42  ;;  %v262_v52 = vsel %vm260_vm4, %v758_v48, 0.0  ;;  %v264_v53 = vsel %vm260_vm4, %v763_v49, 0.0  ;;  %v776_v54 = vld [vmem:[%s988_s4] sm:$0x7]  ;;  %v781_v57 = vld [vmem:[%s988_s4 + $0x18] sm:$0xc0] }
  0xf4   :  { %v263_v58 = vadd.f32 %v262_v52, %v261_v51  ;;  %v786_v59 = vld [vmem:[%s988_s4 + $0x8] sm:$0x7]  ;;  %v791_v60 = vld [vmem:[%s988_s4 + $0x10] sm:$0x7]  ;;  %v276_v61 = vsel %vm270_vm3, %v753_v46, 0.0  ;;  %v224_v62 = vsel %vm113_vm0, %v776_v54, 0.0 }
  0xf5   :  { %v245_v55 = vadd.f32 %v244_v41, %v243_v45  ;;  %v275_v56 = vadd.f32 %v274_v50, %v273_v47  ;;  %v225_v63 = vsel %vm113_vm0, %v786_v59, 0.0  ;;  %v227_v0 = vsel %vm113_vm0, %v791_v60, 0.0  ;;  %v288_v1 = vld [vmem:[%s988_s4 + $0x20] sm:$0xe]  ;;  %v807_v4 = vld [vmem:[%s988_s4 + $0x18] sm:$0x7] }
  0xf6   :  { %v265_v3 = vadd.f32 %v264_v53, %v263_v58  ;;  %v226_v5 = vadd.f32 %v225_v63, %v224_v62  ;;  %v289_v6 = vld [vmem:[%s988_s4 + $0x28] sm:$0xe]  ;;  %v290_v7 = vld [vmem:[%s988_s4 + $0x30] sm:$0xe]  ;;  %v266_v8 = vsel %vm260_vm4, %v781_v57, 0.0  ;;  %v293_v9 = vsel %vm292_vm5, %v288_v1, 0.0 }
  0xf7   :  { %246 = vadd.xlane.f32.xlu0 %v245_v55  ;;  %v277_v2 = vadd.f32 %v276_v61, %v275_v56  ;;  %v294_v10 = vsel %vm292_vm5, %v289_v6, 0.0  ;;  %v291_v13 = vld [vmem:[%s988_s4 + $0x38] sm:$0xe]  ;;  %v229_v15 = vsel %vm113_vm0, %v807_v4, 0.0  ;;  %v296_v16 = vsel %vm292_vm5, %v290_v7, 0.0 }
  0xf8   :  { %v267_v11 = vadd.f32 %v266_v8, %v265_v3  ;;  %v228_v12 = vadd.f32 %v227_v0, %v226_v5  ;;  %v295_v14 = vadd.f32 %v294_v10, %v293_v9  ;;  %v298_v19 = vsel %vm292_vm5, %v291_v13, 0.0 }
  0xf9   :  { %278 = vadd.xlane.f32.xlu1 %v277_v2 }
  0xfa   :  { %v230_v17 = vadd.f32 %v229_v15, %v228_v12  ;;  %v297_v18 = vadd.f32 %v296_v16, %v295_v14 }
  0xfb   :  { %268 = vadd.xlane.f32.xlu0 %v267_v11 }
  0xfc   :  { %v299_v20 = vadd.f32 %v298_v19, %v297_v18 }
  0xfd   :  { %231 = vadd.xlane.f32.xlu1 %v230_v17 }
  0xff   :  { %300 = vadd.xlane.f32.xlu0 %v299_v20 }
 0x184   :  { %v247_v21 = vpop.xlane.xlu0 %246 }
 0x185   :  { %v249_v24 = vrot.slane %v247_v21, 3 }
 0x186   :  { %v279_v22 = vpop.xlane.xlu1 %278 }
 0x187   :  { %v284_v25 = vrot.slane %v279_v22, 6 }
 0x188   :  { %v269_v23 = vpop.xlane.xlu0 %268 }
 0x189   :  { %v283_v26 = vrot.slane %v269_v23, 6 }
 0x18a   :  { %v232_v27 = vpop.xlane.xlu1 %231 }
 0x18b   :  { %v285_v28 = vsel %vm282_vm6, %v283_v26, %v284_v25  ;;  %v251_v29 = vadd.f32 %v249_v24, %v232_v27 }
 0x18c   :  { %v301_v34 = vpop.xlane.xlu0 %300 }
 0x18d   :  { %v287_v35 = vadd.f32 %v285_v28, %v251_v29  ;;  %v303_v36 = vrot.slane %v301_v34, 1 }
 0x18f   :  { %v305_v38 = vadd.f32 %v303_v36, %v287_v35 }
 0x191   :  { %v827_v41 = vmul.f32 0.00048828125, %v305_v38 }
 0x193   :  { %310 = vperm.xlu1 %572, %v827_v41  }
 0x212   :  { %v311_v42 = vpop.permute.xlu1 %310 }
 0x213   :  { %v397_v43 = vrot.slane %v311_v42, 7  ;;  %v331_v45 = vrot.slane %v311_v42, 5  ;;  %v354_v47 = vrot.slane %v311_v42, 2  ;;  %v313_v50 = vsub.f32 %v776_v54, %v311_v42 }
 0x214   :  { %v314_v51 = vsub.f32 %v786_v59, %v311_v42  ;;  %v315_v52 = vsub.f32 %v791_v60, %v311_v42 }
 0x215   :  { %v399_v53 = vsub.f32 %v288_v1, %v397_v43  ;;  %v400_v55 = vsub.f32 %v289_v6, %v397_v43  ;;  %v401_v56 = vsub.f32 %v290_v7, %v397_v43  ;;  %v402_v58 = vsub.f32 %v291_v13, %v397_v43 }
 0x216   :  { %v333_v61 = vsub.f32 %v701_v30, %v331_v45  ;;  %v334_v62 = vsub.f32 %v706_v31, %v331_v45  ;;  %v335_v63 = vsub.f32 %v711_v32, %v331_v45  ;;  %v336_v0 = vsub.f32 %v716_v33, %v331_v45 }
 0x217   :  { %v403_v2 = vmul.f32 %v399_v53, %v399_v53  ;;  %v404_v3 = vmul.f32 %v400_v55, %v400_v55  ;;  %v405_v5 = vmul.f32 %v401_v56, %v401_v56  ;;  %v406_v8 = vmul.f32 %v402_v58, %v402_v58 }
 0x218   :  { %v337_v9 = vmul.f32 %v333_v61, %v333_v61  ;;  %v338_v10 = vmul.f32 %v334_v62, %v334_v62  ;;  %v339_v11 = vmul.f32 %v335_v63, %v335_v63  ;;  %v340_v12 = vmul.f32 %v336_v0, %v336_v0 }
 0x219   :  { %v407_v1 = vsel %vm292_vm5, %v403_v2, 0.0  ;;  %v408_v6 = vsel %vm292_vm5, %v404_v3, 0.0  ;;  %v410_v30 = vsel %vm292_vm5, %v405_v5, 0.0  ;;  %v412_v31 = vsel %vm292_vm5, %v406_v8, 0.0 }
 0x21a   :  { %v409_v7 = vadd.f32 %v408_v6, %v407_v1  ;;  %v341_v32 = vsel %vm238_vm2, %v337_v9, 0.0  ;;  %v342_v33 = vsel %vm238_vm2, %v338_v10, 0.0  ;;  %v344_v13 = vsel %vm238_vm2, %v339_v11, 0.0 }
 0x21b   :  { %v343_v14 = vadd.f32 %v342_v33, %v341_v32  ;;  %v346_v15 = vsel %vm238_vm2, %v340_v12, 0.0  ;;  %v356_v16 = vsub.f32 %v748_v44, %v354_v47  ;;  %v357_v17 = vsub.f32 %v758_v48, %v354_v47 }
 0x21c   :  { %v411_v18 = vadd.f32 %v410_v30, %v409_v7  ;;  %v358_v19 = vsub.f32 %v763_v49, %v354_v47  ;;  %v359_v20 = vsub.f32 %v781_v57, %v354_v47  ;;  %v360_v21 = vsub.f32 %v727_v37, %v354_v47 }
 0x21d   :  { %v345_v22 = vadd.f32 %v344_v13, %v343_v14  ;;  %v364_v23 = vmul.f32 %v356_v16, %v356_v16  ;;  %v365_v24 = vmul.f32 %v357_v17, %v357_v17  ;;  %v361_v25 = vsub.f32 %v732_v39, %v354_v47 }
 0x21e   :  { %v413_v26 = vadd.f32 %v412_v31, %v411_v18  ;;  %v366_v27 = vmul.f32 %v358_v19, %v358_v19  ;;  %v367_v28 = vmul.f32 %v359_v20, %v359_v20  ;;  %v362_v29 = vsub.f32 %v737_v40, %v354_v47  ;;  %v423_v18 = vld [vmem:[%s989_s2] sm:$0x7] }
 0x21f   :  { %v347_v44 = vadd.f32 %v346_v15, %v345_v22  ;;  %v372_v48 = vsel %vm260_vm4, %v364_v23, 0.0  ;;  %v373_v34 = vsel %vm260_vm4, %v365_v24, 0.0  ;;  %v363_v49 = vsub.f32 %v753_v46, %v354_v47 }
 0x220   :  { %414 = vadd.xlane.f32.xlu1 %v413_v26  ;;  %v374_v57 = vadd.f32 %v373_v34, %v372_v48  ;;  %v368_v37 = vmul.f32 %v360_v21, %v360_v21  ;;  %v375_v35 = vsel %vm260_vm4, %v366_v27, 0.0  ;;  %v369_v36 = vmul.f32 %v361_v25, %v361_v25  ;;  %v425_v21 = vld [vmem:[%s990_s3] sm:$0x7]  ;;  %v478_v25 = vld [vmem:[%s988_s4] sm:$0xc0] }
 0x221   :  { %348 = vadd.xlane.f32.xlu0 %v347_v44  ;;  %v370_v39 = vmul.f32 %v362_v29, %v362_v29  ;;  %v317_v38 = vmul.f32 %v313_v50, %v313_v50  ;;  %v316_v40 = vsub.f32 %v807_v4, %v311_v42  ;;  %v318_v53 = vmul.f32 %v314_v51, %v314_v51  ;;  %v480_v26 = vld [vmem:[%s988_s4 + $0x10] sm:$0xc0]  ;;  %v479_v27 = vld [vmem:[%s988_s4 + $0x8] sm:$0xc0]  ;;  %v455_v44 = vld [vmem:[%s988_s4 + $0x8] sm:$0x38] }
 0x222   :  { %v376_v43 = vadd.f32 %v375_v35, %v374_v57  ;;  %v381_v45 = vsel %vm270_vm3, %v368_v37, 0.0  ;;  %v377_v55 = vsel %vm260_vm4, %v367_v28, 0.0  ;;  %v371_v56 = vmul.f32 %v363_v49, %v363_v49  ;;  %v454_v28 = vld [vmem:[%s988_s4] sm:$0x38]  ;;  %v456_v48 = vld [vmem:[%s988_s4 + $0x10] sm:$0x38] }
 0x223   :  { %v382_v46 = vsel %vm270_vm3, %v369_v36, 0.0  ;;  %v319_v47 = vmul.f32 %v315_v52, %v315_v52  ;;  %v321_v62 = vsel %vm113_vm0, %v317_v38, 0.0  ;;  %v322_v63 = vsel %vm113_vm0, %v318_v53, 0.0  ;;  %v481_v35 = vld [vmem:[%s988_s4 + $0x18] sm:$0xc0] }
 0x224   :  { %v378_v58 = vadd.f32 %v377_v55, %v376_v43  ;;  %v383_v61 = vadd.f32 %v382_v46, %v381_v45  ;;  %v384_v50 = vsel %vm270_vm3, %v370_v39, 0.0  ;;  %v323_v0 = vadd.f32 %v322_v63, %v321_v62  ;;  %v482_v36 = vld [vmem:[%s988_s4 + $0x20] sm:$0x1]  ;;  %v457_v39 = vld [vmem:[%s988_s4 + $0x18] sm:$0x38] }
 0x225   :  { %v386_v42 = vsel %vm270_vm3, %v371_v56, 0.0  ;;  %v320_v51 = vmul.f32 %v316_v40, %v316_v40  ;;  %v324_v3 = vsel %vm113_vm0, %v319_v47, 0.0  ;;  %v483_v45 = vld [vmem:[%s988_s4 + $0x28] sm:$0x1]  ;;  %v485_v40 = vld [vmem:[%s988_s4 + $0x38] sm:$0x1] }
 0x226   :  { %379 = vadd.xlane.f32.xlu0 %v378_v58  ;;  %v385_v2 = vadd.f32 %v384_v50, %v383_v61  ;;  %v325_v8 = vadd.f32 %v324_v3, %v323_v0  ;;  %v522_v47 = vld [vmem:[%s988_s4 + $0x20] sm:$0xe]  ;;  %v523_v58 = vld [vmem:[%s988_s4 + $0x28] sm:$0xe]  ;;  %v524_v61 = vld [vmem:[%s988_s4 + $0x30] sm:$0xe] }
 0x227   :  { %v326_v52 = vsel %vm113_vm0, %v320_v51, 0.0 }
 0x228   :  { %v387_v5 = vadd.f32 %v386_v42, %v385_v2  ;;  %v327_v9 = vadd.f32 %v326_v52, %v325_v8 }
 0x22a   :  { %388 = vadd.xlane.f32.xlu0 %v387_v5  ;;  %v525_v5 = vld [vmem:[%s988_s4 + $0x38] sm:$0xe] }
 0x22e   :  { %328 = vadd.xlane.f32.xlu0 %v327_v9 }
 0x2ad   :  { %v415_v30 = vpop.xlane.xlu1 %414 }
 0x2ae   :  { %v349_v10 = vpop.xlane.xlu0 %348  ;;  %v417_v13 = vrot.slane %v415_v30, 1 }
 0x2af   :  { %v351_v6 = vrot.slane %v349_v10, 3 }
 0x2b3   :  { %v380_v11 = vpop.xlane.xlu0 %379 }
 0x2b4   :  { %v392_v31 = vrot.slane %v380_v11, 6 }
 0x2b7   :  { %v389_v12 = vpop.xlane.xlu0 %388 }
 0x2b8   :  { %v393_v1 = vrot.slane %v389_v12, 6 }
 0x2ba   :  { %v394_v33 = vsel %vm282_vm6, %v392_v31, %v393_v1 }
 0x2bb   :  { %v329_v7 = vpop.xlane.xlu0 %328 }
 0x2bc   :  { %v353_v32 = vadd.f32 %v351_v6, %v329_v7 }
 0x2be   :  { %v396_v14 = vadd.f32 %v394_v33, %v353_v32 }
 0x2c0   :  { %v419_v15 = vadd.f32 %v417_v13, %v396_v14 }
 0x2c2   :  { %v420_v16 = vmul.f32 0.00048828125, %v419_v15 }
 0x2c4   :  { %v421_v17 = vadd.f32 1e-05, %v420_v16 }
 0x2c6   :  { %597 = vrsqrt.f32 %v421_v17 }
 0x2d0   :  { %v598_v19 = vpop.eup %597 }
 0x2d1   :  { %v424_v20 = vmul.f32 %v598_v19, %v423_v18 }
 0x2d3   :  { %430 = vperm.xlu0 %573, %v424_v20   ;;  %v426_v22 = vmul.f32 %v424_v20, %v827_v41 }
 0x2d5   :  { %v427_v23 = vsub.f32 %v425_v21, %v426_v22 }
 0x2d7   :  { %439 = vperm.xlu1 %572, %v427_v23  }
 0x352   :  { %v431_v24 = vpop.permute.xlu0 %430 }
 0x353   :  { %v458_v41 = vrot.slane %v431_v24, 5  ;;  %v486_v29 = vrot.slane %v431_v24, 2  ;;  %v433_v34 = vmul.f32 %v431_v24, %v776_v54  ;;  %v434_v49 = vmul.f32 %v431_v24, %v786_v59 }
 0x354   :  { %v435_v57 = vmul.f32 %v431_v24, %v791_v60  ;;  %v526_v37 = vrot.slane %v431_v24, 7  ;;  %v436_v38 = vmul.f32 %v431_v24, %v807_v4  ;;  %v484_v60 = vld [vmem:[%s988_s4 + $0x30] sm:$0x1] }
 0x355   :  { %v460_v54 = vmul.f32 %v458_v41, %v454_v28  ;;  %v461_v43 = vmul.f32 %v458_v41, %v455_v44  ;;  %v462_v59 = vmul.f32 %v458_v41, %v456_v48  ;;  %v463_v53 = vmul.f32 %v458_v41, %v457_v39 }
 0x356   :  { %v488_v55 = vmul.f32 %v486_v29, %v478_v25  ;;  %v489_v56 = vmul.f32 %v486_v29, %v479_v27  ;;  %v490_v46 = vmul.f32 %v486_v29, %v480_v26  ;;  %v440_v4 = vpop.permute.xlu1 %439  ;;  %v491_v62 = vmul.f32 %v486_v29, %v481_v35 }
 0x357   :  { %v492_v63 = vmul.f32 %v486_v29, %v482_v36  ;;  %v493_v50 = vmul.f32 %v486_v29, %v483_v45  ;;  %v494_v0 = vmul.f32 %v486_v29, %v484_v60  ;;  %v495_v2 = vmul.f32 %v486_v29, %v485_v40 }
 0x358   :  { %v528_v42 = vmul.f32 %v526_v37, %v522_v47  ;;  %v529_v51 = vmul.f32 %v526_v37, %v523_v58  ;;  %v530_v3 = vmul.f32 %v526_v37, %v524_v61  ;;  %v442_v8 = vadd.f32 %v440_v4, %v433_v34 }
 0x359   :  { %v443_v52 = vadd.f32 %v440_v4, %v434_v49  ;;  %v444_v9 = vadd.f32 %v440_v4, %v435_v57  ;;  %v445_v10 = vadd.f32 %v440_v4, %v436_v38  ;;  %v531_v11 = vmul.f32 %v526_v37, %v525_v5 }
 0x35a   :  { %v464_v12 = vrot.slane %v440_v4, 5  ;;  %v496_v1 = vrot.slane %v440_v4, 2  ;;  %v532_v6 = vrot.slane %v440_v4, 7  ;;  %v446_v30 = vmax.f32 %v442_v8, 0.0 }
 0x35b   :  { %v447_v31 = vmax.f32 %v443_v52, 0.0  ;;  %v448_v7 = vmax.f32 %v444_v9, 0.0  ;;  %v449_v32 = vmax.f32 %v445_v10, 0.0 }
 0x35c   :  { %v466_v33 = vadd.f32 %v464_v12, %v460_v54  ;;  %v467_v13 = vadd.f32 %v464_v12, %v461_v43  ;;  %v468_v14 = vadd.f32 %v464_v12, %v462_v59  ;;  %v469_v15 = vadd.f32 %v464_v12, %v463_v53  ;;  %450 = vst [vmem:[%s988_s4] sm:$0x7] %v446_v30 }
 0x35d   :  { %451 = vst [vmem:[%s988_s4 + $0x8] sm:$0x7] %v447_v31  ;;  %452 = vst [vmem:[%s988_s4 + $0x10] sm:$0x7] %v448_v7  ;;  %v498_v16 = vadd.f32 %v496_v1, %v488_v55  ;;  %v499_v17 = vadd.f32 %v496_v1, %v489_v56  ;;  %v500_v18 = vadd.f32 %v496_v1, %v490_v46 }
 0x35e   :  { %453 = vst [vmem:[%s988_s4 + $0x18] sm:$0x7] %v449_v32  ;;  %v501_v19 = vadd.f32 %v496_v1, %v491_v62  ;;  %v470_v20 = vmax.f32 %v466_v33, 0.0  ;;  %v471_v21 = vmax.f32 %v467_v13, 0.0  ;;  %v472_v22 = vmax.f32 %v468_v14, 0.0 }
 0x35f   :  { %v473_v23 = vmax.f32 %v469_v15, 0.0  ;;  %v502_v24 = vadd.f32 %v496_v1, %v492_v63  ;;  %v503_v25 = vadd.f32 %v496_v1, %v493_v50  ;;  %v504_v26 = vadd.f32 %v496_v1, %v494_v0 }
 0x360   :  { %v505_v27 = vadd.f32 %v496_v1, %v495_v2  ;;  %474 = vst [vmem:[%s988_s4] sm:$0x38] %v470_v20  ;;  %475 = vst [vmem:[%s988_s4 + $0x8] sm:$0x38] %v471_v21  ;;  %v506_v28 = vmax.f32 %v498_v16, 0.0  ;;  %v507_v41 = vmax.f32 %v499_v17, 0.0  ;;  %v508_v29 = vmax.f32 %v500_v18, 0.0 }
 0x361   :  { %476 = vst [vmem:[%s988_s4 + $0x10] sm:$0x38] %v472_v22  ;;  %477 = vst [vmem:[%s988_s4 + $0x18] sm:$0x38] %v473_v23  ;;  %v509_v44 = vmax.f32 %v501_v19, 0.0  ;;  %v510_v48 = vmax.f32 %v502_v24, 0.0  ;;  %v534_v37 = vadd.f32 %v532_v6, %v528_v42  ;;  %v535_v35 = vadd.f32 %v532_v6, %v529_v51 }
 0x362   :  { %v511_v34 = vmax.f32 %v503_v25, 0.0  ;;  %v512_v49 = vmax.f32 %v504_v26, 0.0  ;;  %v513_v57 = vmax.f32 %v505_v27, 0.0  ;;  %514 = vst [vmem:[%s988_s4] sm:$0xc0] %v506_v28  ;;  %515 = vst [vmem:[%s988_s4 + $0x8] sm:$0xc0] %v507_v41  ;;  %v536_v36 = vadd.f32 %v532_v6, %v530_v3 }
 0x363   :  { %516 = vst [vmem:[%s988_s4 + $0x10] sm:$0xc0] %v508_v29  ;;  %517 = vst [vmem:[%s988_s4 + $0x18] sm:$0xc0] %v509_v44  ;;  %v537_v39 = vadd.f32 %v532_v6, %v531_v11  ;;  %v538_v38 = vmax.f32 %v534_v37, 0.0  ;;  %v539_v54 = vmax.f32 %v535_v35, 0.0 }
 0x364   :  { %518 = vst [vmem:[%s988_s4 + $0x20] sm:$0x1] %v510_v48  ;;  %519 = vst [vmem:[%s988_s4 + $0x28] sm:$0x1] %v511_v34  ;;  %v540_v43 = vmax.f32 %v536_v36, 0.0 }
 0x365   :  { %520 = vst [vmem:[%s988_s4 + $0x30] sm:$0x1] %v512_v49  ;;  %521 = vst [vmem:[%s988_s4 + $0x38] sm:$0x1] %v513_v57  ;;  %v541_v59 = vmax.f32 %v537_v39, 0.0 }
 0x366   :  { %542 = vst [vmem:[%s988_s4 + $0x20] sm:$0xe] %v538_v38  ;;  %543 = vst [vmem:[%s988_s4 + $0x28] sm:$0xe] %v539_v54 }
 0x367   :  { %544 = vst [vmem:[%s988_s4 + $0x30] sm:$0xe] %v540_v43  ;;  %545 = vst [vmem:[%s988_s4 + $0x38] sm:$0xe] %v541_v59 }

// kernel: generator_forward.9
= control target key start
LH: loop header
LB: loop body
LE: loop exit
PB: predicated region body
PF: predicated region fallthrough
CT: control target
= control target key end

     0   :  { %s569_s9 = smov 0   ;;  %s571_s10 = smov 0   ;;  %s654_s0 = inlined_call_operand.vmem [shape: bf16[12,27], index: 0, kind: input, shape index: {}]   ;;  %s655_s1 = inlined_call_operand.vmem [shape: bf16[27,2048], index: 1, kind: input, shape index: {}]   ;;  %s656_s2 = inlined_call_operand.vmem [shape: f32[12,2048], index: 2, kind: output, shape index: {}]  }
   0x1   :  { %s573_s11 = smov 0  }
   0x2 LB: > { %s445_s12 = sadd.s32 4294967295, %s550_s11   ;;  %s586_s13 = sadd.s32 1, %s550_s11   ;;  %s550_s11 = sphi %s573_s11, %s660_s11   ;;  %s546_s10 = sphi %s571_s10, %s659_s10   ;;  %s542_s9 = sphi %s569_s9, %s658_s9  }
   0x3   : > { %s37_s14 = ssub.s32 %s550_s11, %s586_s13  ;;  %s40_s15 = sadd.s32 1, %s546_s10 }
   0x4   : > { %p38_p0 = scmp.eq.s32.totalorder %s37_s14, 0  ;;  %p47_p1 = scmp.ne.s32.totalorder %s546_s10, %s542_s9 }
   0x5   : > { %p48_p2 = scmp.eq.s32.totalorder %s550_s11, 0  ;;  %p77_p3 = scmp.eq.s32.totalorder %s445_s12, 3 }
   0x6   : > { %s597_s16 = scalar_select %p38_p0, %s546_s10, %s40_s15  }
   0x7   : > { %p49_p4 = por %p48_p2, %p47_p1  ;;  %p599_p5 = por %p77_p3, %p47_p1 }
   0x8   : > { %p448_p6 = scmp.ge.s32.totalorder %s550_s11, 4 }
   0xa   : > { %102 = sbr.rel (%p448_p6) target bundleno = 25 (0x19), region = 20 }
  0x11   : > { %105 = sbr.rel (!%p49_p4) target bundleno = 25 (0x19), region = 24  ;;  %s107_s18 = sand.u32 (%p49_p4), 1, %s546_s10  }
  0x12   : > { %s471_s19 = sshll.u32 (%p49_p4), %s550_s11, 4  ;;  %s449_s20 = sshll.u32 (%p49_p4), %s107_s18, 6 }
  0x13   : > { %s112_s23 = scalar_lea.vmem (%p49_p4), %s655_s1, %s471_s19  ;;  %s109_s24 = scalar_lea.vmem (%p49_p4), [#allocation2], %s449_s20 }
  0x14   : > { %v125_v0 = vld [vmem:[%s112_s23] sm:$0xff] (%p49_p4)  ;;  %v127_v1 = vld [vmem:[%s112_s23 + $0x8] sm:$0xff] (%p49_p4) }
  0x15   : > { %v129_v2 = vld [vmem:[%s112_s23 + $0x40] sm:$0xff] (%p49_p4)  ;;  %126 = vst [vmem:[%s109_s24] sm:$0xff] (%p49_p4), %v125_v0  ;;  %128 = vst [vmem:[%s109_s24 + $0x8] sm:$0xff] (%p49_p4), %v127_v1  ;;  %v131_v3 = vld [vmem:[%s112_s23 + $0x48] sm:$0xff] (%p49_p4) }
  0x16   : > { %130 = vst [vmem:[%s109_s24 + $0x10] sm:$0xff] (%p49_p4), %v129_v2  ;;  %v133_v4 = vld [vmem:[%s112_s23 + $0x80] sm:$0xff] (%p49_p4)  ;;  %v135_v5 = vld [vmem:[%s112_s23 + $0x88] sm:$0xff] (%p49_p4)  ;;  %132 = vst [vmem:[%s109_s24 + $0x18] sm:$0xff] (%p49_p4), %v131_v3 }
  0x17   : > { %134 = vst [vmem:[%s109_s24 + $0x20] sm:$0xff] (%p49_p4), %v133_v4  ;;  %136 = vst [vmem:[%s109_s24 + $0x28] sm:$0xff] (%p49_p4), %v135_v5  ;;  %v137_v6 = vld [vmem:[%s112_s23 + $0xc0] sm:$0xff] (%p49_p4)  ;;  %v139_v7 = vld [vmem:[%s112_s23 + $0xc8] sm:$0xff] (%p49_p4) }
  0x18   : > { %138 = vst [vmem:[%s109_s24 + $0x30] sm:$0xff] %v137_v6  ;;  %140 = vst [vmem:[%s109_s24 + $0x38] sm:$0xff] %v139_v7 }
  0x19 PF: > { %p452_p7 = scmp.ge.s32.totalorder %s550_s11, 1  ;;  %p145_p8 = scmp.lt.s32.totalorder %s550_s11, 5 }
  0x1b   : > { %p146_p9 = pnand %p452_p7, %p145_p8 }
  0x1c   : > { %s152_s25 = sand.u32 (!%p146_p9), 1, %s542_s9   ;;  %vm230_vm0 = vcmask (!%p146_p9), 1044480   ;;  %v552_v8 = vmov (!%p146_p9), 0   ;;  %vm231_vm1 = vcmask (!%p146_p9), 1045504   ;;  %v553_v9 = vmov (!%p146_p9), 65535  }
  0x1d   : > { %149 = sbr.rel (%p146_p9) target bundleno = 279 (0x117), region = 47  ;;  %s612_s26 = sshll.u32 (!%p146_p9), %s152_s25, 6  ;;  %278 = vmatprep.mubr.bf16.mxu0 (!%p146_p9), %v552_v8  ;;  %321 = vmatprep.mubr.bf16.mxu1 (!%p146_p9), %v552_v8  ;;  %v232_v10 = vsel (!%p146_p9), %vm230_vm0, 4294967295, %v553_v9  ;;  %v511_v24 = vld [vmem:[%s654_s0] sm:$0x3f] (!%p146_p9)   ;;  %vm226_vm2 = vcmask (!%p146_p9), 220160  }
  0x1e   : > { %s154_s27 = scalar_lea.vmem (!%p146_p9), [#allocation2], %s612_s26  ;;  %v233_v15 = vsel (!%p146_p9), %vm231_vm1, %v232_v10, 0  ;;  %s619_s30 = scalar_lea.vmem (!%p146_p9), [#allocation3], %s612_s26 }
  0x1f   : > { %v499_v11 = vld [vmem:[%s154_s27 + $0x4] ss:$16 sps:$4 sm:$0xff] (!%p146_p9)   ;;  %v501_v12 = vld [vmem:[%s154_s27 + $0xc] ss:$16 sps:$4 sm:$0xff] (!%p146_p9)   ;;  %v503_v13 = vld [vmem:[%s154_s27] ss:$16 sps:$4 sm:$0xff] (!%p146_p9)  }
  0x20   : > { %246 = vmatprep.subr.bf16.mxu0 (!%p146_p9), %v499_v11  ;;  %v504_v14 = vld [vmem:[%s154_s27 + $0x8] ss:$16 sps:$4 sm:$0xff] (!%p146_p9)   ;;  %289 = vmatprep.subr.bf16.mxu1 (!%p146_p9), %v501_v12  ;;  %v505_v16 = vld [vmem:[%s154_s27 + $0x24] ss:$16 sps:$4 sm:$0x3f] (!%p146_p9)  }
  0x21   : > { %247 = vmatpush1.bf16.msra.mxu0 (!%p146_p9), %v503_v13  ;;  %290 = vmatpush1.bf16.msra.mxu1 (!%p146_p9), %v504_v14  ;;  %v507_v17 = vld [vmem:[%s154_s27 + $0x2c] ss:$16 sps:$4 sm:$0x3f] (!%p146_p9)   ;;  %v238_v18 = vand.u32 (!%p146_p9), %v505_v16, %v233_v15  ;;  %v509_v19 = vld [vmem:[%s154_s27 + $0x20] ss:$16 sps:$4 sm:$0x3f] (!%p146_p9)  }
  0x22   : > { %v510_v20 = vld [vmem:[%s154_s27 + $0x28] ss:$16 sps:$4 sm:$0x3f] (!%p146_p9)   ;;  %v244_v21 = vand.u32 (!%p146_p9), %v507_v17, %v233_v15  ;;  %v235_v22 = vand.u32 (!%p146_p9), %v509_v19, %v233_v15 }
  0x23   : > { %248 = vmatprep.subr.bf16.mxu0 (!%p146_p9), %v238_v18  ;;  %v241_v23 = vand.u32 (!%p146_p9), %v510_v20, %v233_v15 }
  0x24   : > { %291 = vmatprep.subr.bf16.mxu1 %v244_v21  ;;  %s472_s3 = sshll.u32 (%p599_p5), %s445_s12, 5 }
  0x25   : > { %249 = vmatpush1.bf16.msra.mxu0 %v235_v22  ;;  %292 = vmatpush1.bf16.msra.mxu1 %v241_v23  ;;  %s357_s6 = scalar_lea.vmem (%p599_p5), %s656_s2, %s472_s3 }
  0x28   : > { %464 = vmatmul.mubr.msk.bf16.vlgmr.msra.gmra.mrb[0].mxu0 %vm226_vm2, %v511_v24  ;;  %465 = vmatmul.mubr.msk.bf16.vlgmr.msra.gmra.mrb[0].mxu1 %vm226_vm2, %v511_v24 }
  0xfb   : > { %v280_v25 = vpop.f32.mrb[0].mxu0  ;;  %v323_v26 = vpop.f32.mrb[0].mxu1 }
  0xfc   : > { %512 = vtanh.f32 %v280_v25  ;;  %v282_v27 = vpop.f32.mrb[1].mxu0  ;;  %v325_v28 = vpop.f32.mrb[1].mxu1 }
  0xfd   : > { %514 = vtanh.f32 %v323_v26  ;;  %v284_v29 = vpop.f32.mrb[2].mxu0  ;;  %v327_v30 = vpop.f32.mrb[2].mxu1 }
  0xfe   : > { %516 = vtanh.f32 %v282_v27  ;;  %v286_v31 = vpop.f32.mrb[3].mxu0  ;;  %v329_v32 = vpop.f32.mrb[3].mxu1 }
  0xff   : > { %518 = vtanh.f32 %v325_v28 }
 0x100   : > { %520 = vtanh.f32 %v284_v29 }
 0x101   : > { %522 = vtanh.f32 %v327_v30 }
 0x102   : > { %524 = vtanh.f32 %v286_v31 }
 0x103   : > { %526 = vtanh.f32 %v329_v32 }
 0x106   : > { %v513_v33 = vpop.eup %512 }
 0x107   : > { %v515_v34 = vpop.eup %514  ;;  %340 = vst [vmem:[%s619_s30] sm:$0xff] %v513_v33 }
 0x108   : > { %v517_v35 = vpop.eup %516  ;;  %342 = vst [vmem:[%s619_s30 + $0x10] sm:$0xff] %v515_v34  ;;  %354 = sbr.rel (!%p599_p5) target bundleno = 279 (0x117), region = 55 }
 0x109   : > { %v519_v36 = vpop.eup %518  ;;  %341 = vst [vmem:[%s619_s30 + $0x8] sm:$0xff] %v517_v35 }
 0x10a   : > { %v521_v37 = vpop.eup %520  ;;  %343 = vst [vmem:[%s619_s30 + $0x18] sm:$0xff] %v519_v36 }
 0x10b   : > { %v523_v38 = vpop.eup %522  ;;  %344 = vst [vmem:[%s619_s30 + $0x20] sm:$0xf] %v521_v37 }
 0x10c   : > { %v525_v39 = vpop.eup %524  ;;  %346 = vst [vmem:[%s619_s30 + $0x30] sm:$0xf] %v523_v38 }
 0x10d   : > { %v527_v40 = vpop.eup %526  ;;  %345 = vst [vmem:[%s619_s30 + $0x28] sm:$0xf] %v525_v39 }
 0x10e   : > { %347 = vst [vmem:[%s619_s30 + $0x38] sm:$0xf] %v527_v40  ;;  %v370_v41 = vld [vmem:[%s619_s30] sm:$0xff] (%p599_p5) }
 0x10f   : > { %v374_v43 = vld [vmem:[%s619_s30 + $0x10] sm:$0xff]  ;;  %371 = vst [vmem:[%s357_s6] sm:$0xff] %v370_v41 }
 0x110   : > { %v372_v42 = vld [vmem:[%s619_s30 + $0x8] sm:$0xff]  ;;  %375 = vst [vmem:[%s357_s6 + $0x10] sm:$0xff] %v374_v43 }
 0x111   : > { %v376_v44 = vld [vmem:[%s619_s30 + $0x18] sm:$0xff]  ;;  %373 = vst [vmem:[%s357_s6 + $0x8] sm:$0xff] %v372_v42 }
 0x112   : > { %v378_v45 = vld [vmem:[%s619_s30 + $0x20] sm:$0xff]  ;;  %377 = vst [vmem:[%s357_s6 + $0x18] sm:$0xff] %v376_v44 }
 0x113   : > { %379 = vst [vmem:[%s357_s6 + $0x80] sm:$0xff] %v378_v45  ;;  %v382_v47 = vld [vmem:[%s619_s30 + $0x30] sm:$0xff] }
 0x114   : > { %v380_v46 = vld [vmem:[%s619_s30 + $0x28] sm:$0xff]  ;;  %383 = vst [vmem:[%s357_s6 + $0x90] sm:$0xff] %v382_v47 }
 0x115   : > { %381 = vst [vmem:[%s357_s6 + $0x88] sm:$0xff] %v380_v46  ;;  %v384_v48 = vld [vmem:[%s619_s30 + $0x38] sm:$0xff] }
 0x116   : > { %385 = vst [vmem:[%s357_s6 + $0x98] sm:$0xff] %v384_v48 }
 0x117 PF: > { %p9_p10 = scmp.ge.s32.totalorder %s586_s13, 6   ;;  %s658_s9 = smov %s546_s10 }
 0x118   : > { %s659_s10 = smov %s597_s16  ;;  %s660_s11 = smov %s586_s13 }
 0x119   :  { %11 = sbr.rel (!%p9_p10) target bundleno = 2 (0x2), region = 109 }

</bundles_post_ra>
